<compile_context>
chip_gen: v7x
topology: tpu7x:2x2x1
jax: 0.10.0
libtpu: 0.0.40
codegen_flags: <defaults>
</compile_context>

<pallas_src>
import functools

import jax
import jax.numpy as jnp
from jax.experimental import pallas as pl
from jax.experimental.pallas import tpu as pltpu


# ----------------------------------------------------------------------------
# Kernel A: fused "embedding multiply + linear":  o = (x * emb) @ W + b
# ----------------------------------------------------------------------------
def _embed_linear_kernel(x_ref, emb_ref, w_ref, b_ref, o_ref):
    z = (x_ref[...] * emb_ref[...]).astype(jnp.bfloat16)
    o_ref[...] = (
        jnp.dot(z, w_ref[...], preferred_element_type=jnp.float32) + b_ref[...]
    )


def embed_linear(x, emb, w, b):
    n, l = x.shape
    f = w.shape[1]
    return pl.pallas_call(
        _embed_linear_kernel,
        out_shape=jax.ShapeDtypeStruct((n, f), jnp.float32),
        grid=(1,),
        in_specs=[
            pl.BlockSpec((n, l), lambda i: (0, 0)),
            pl.BlockSpec((n, l), lambda i: (0, 0)),
            pl.BlockSpec((l, f), lambda i: (0, 0)),
            pl.BlockSpec((1, f), lambda i: (0, 0)),
        ],
        out_specs=pl.BlockSpec((n, f), lambda i: (0, 0)),
        compiler_params=pltpu.CompilerParams(dimension_semantics=("arbitrary",)),
    )(x, emb, w.astype(jnp.bfloat16), b.reshape(1, f).astype(jnp.float32))


# ----------------------------------------------------------------------------
# Kernel B: fully fused decoder.
# ----------------------------------------------------------------------------
def _bn_cf(x, g, b, eps):
    # x: (C, M) f32; per-channel batch statistics over the lane (M) axis.
    mean = jnp.mean(x, axis=1, keepdims=True)
    var = jnp.mean(jnp.square(x - mean), axis=1, keepdims=True)
    return (x - mean) * jax.lax.rsqrt(var + eps) * g + b


def _leaky(x, slope):
    return jnp.where(x >= 0, x, slope * x)


_EXT_PAD = 128  # lane-aligned zero extension (>= any 3x3 tap offset here)


def _conv_patches(x, masks, width):
    """Build the (9*Cin, M) bf16 im2col block for a 3x3 SAME conv, in VMEM.

    x:     (Cin, M) f32 activation, M = N*H*W flattened (n, y, x), n-major.
    masks: (9, M) f32 validity masks (zero padding at image borders).
    width: spatial row length W (a dy shift is dy*width flat positions).
    """
    cin, m = x.shape
    zeros = jnp.zeros((cin, _EXT_PAD), dtype=x.dtype)
    ext = jnp.concatenate([zeros, x, zeros], axis=1)  # (Cin, M + 2*128), aligned
    taps = []
    for t in range(9):
        dy, dx = t // 3 - 1, t % 3 - 1
        off = dy * width + dx
        shifted = ext[:, _EXT_PAD + off:_EXT_PAD + off + m]  # static lane slice
        taps.append(shifted * masks[t:t + 1, :])
    return jnp.concatenate(taps, axis=0).astype(jnp.bfloat16)  # (9*Cin, M)


def _decoder_kernel(
    act_ref, s1_ref, s2_ref, mask_mid_ref, mask_out_ref,
    bn0g_ref, bn0b_ref,
    w1_ref, b1_ref, bn1g_ref, bn1b_ref,
    w2_ref, b2_ref, bn2g_ref, bn2b_ref,
    w3_ref, b3_ref,
    o_ref, *, w_mid, w_out, norm, slope, eps,
):
    masks_mid = mask_mid_ref[...]
    masks_out = mask_out_ref[...]

    # stage 0: BatchNorm on the reshaped linear output (channels-first layout)
    x = act_ref[...]                                           # (2C, M1)
    if norm:
        x = _bn_cf(x, bn0g_ref[...], bn0b_ref[...], eps)

    # stage 1: nearest 2x upsample (0/1 selection matmul) + conv1 + BN + LReLU
    up1 = jnp.dot(x.astype(jnp.bfloat16), s1_ref[...],
                  preferred_element_type=jnp.float32)          # (2C, M2)
    p1 = _conv_patches(up1, masks_mid, w_mid)                  # (18C, M2)
    c1 = jnp.dot(w1_ref[...], p1,
                 preferred_element_type=jnp.float32) + b1_ref[...]
    if norm:
        c1 = _bn_cf(c1, bn1g_ref[...], bn1b_ref[...], eps)
    h1 = _leaky(c1, slope)

    # stage 2: upsample + conv2 + BN + LReLU
    up2 = jnp.dot(h1.astype(jnp.bfloat16), s2_ref[...],
                  preferred_element_type=jnp.float32)          # (2C, M3)
    p2 = _conv_patches(up2, masks_out, w_out)                  # (18C, M3)
    c2 = jnp.dot(w2_ref[...], p2,
                 preferred_element_type=jnp.float32) + b2_ref[...]
    if norm:
        c2 = _bn_cf(c2, bn2g_ref[...], bn2b_ref[...], eps)
    h2 = _leaky(c2, slope)

    # stage 3: conv3 + tanh (lane-dense (Cimg, M3) output store)
    p3 = _conv_patches(h2, masks_out, w_out)                   # (9C, M3)
    c3 = jnp.dot(w3_ref[...], p3,
                 preferred_element_type=jnp.float32) + b3_ref[...]
    o_ref[...] = jnp.tanh(c3)


def decoder(act1, s1, s2, mask_mid, mask_out, dec_params, *, w_mid, w_out,
            out_channels, norm):
    args = (act1, s1, s2, mask_mid, mask_out) + tuple(dec_params)
    m_out = mask_out.shape[1]
    kernel = functools.partial(
        _decoder_kernel, w_mid=w_mid, w_out=w_out, norm=norm, slope=0.2, eps=1e-5
    )
    in_specs = [pl.BlockSpec(a.shape, lambda i: (0, 0)) for a in args]
    return pl.pallas_call(
        kernel,
        out_shape=jax.ShapeDtypeStruct((out_channels, m_out), jnp.float32),
        grid=(1,),
        in_specs=in_specs,
        out_specs=pl.BlockSpec((out_channels, m_out), lambda i: (0, 0)),
        compiler_params=pltpu.CompilerParams(dimension_semantics=("arbitrary",)),
    )(*args)


# ----------------------------------------------------------------------------
# Constant operators / weight repacking (tiny, one-time, outside the kernels)
# ----------------------------------------------------------------------------
def _upsample_matrix(n, h, w):
    """(N*h*w, N*2h*2w) 0/1 nearest-neighbour 2x upsample operator (bf16)."""
    m_out = n * 4 * h * w
    j = jnp.arange(m_out)
    b = j // (4 * h * w)
    rem = j % (4 * h * w)
    src = (b * h + (rem // (2 * w)) // 2) * w + (rem % (2 * w)) // 2
    return jax.nn.one_hot(src, n * h * w, dtype=jnp.bfloat16).T


def _tap_masks(n, h, w):
    """(9, N*h*w) f32 validity masks for the 9 taps of a 3x3 SAME conv."""
    idx = jnp.arange(n * h * w)
    y = (idx // w) % h
    x = idx % w
    rows = []
    for t in range(9):
        dy, dx = t // 3 - 1, t % 3 - 1
        ok = (y + dy >= 0) & (y + dy < h) & (x + dx >= 0) & (x + dx < w)
        rows.append(ok)
    return jnp.stack(rows, axis=0).astype(jnp.float32)


def _conv_weight_cf(w):
    """(3,3,Cin,Cout) HWIO -> (Cout, 9*Cin) bf16, tap-major / Cin-minor."""
    kh, kw, cin, cout = w.shape
    wt = jnp.transpose(w.reshape(kh * kw, cin, cout), (2, 0, 1))
    return wt.reshape(cout, kh * kw * cin).astype(jnp.bfloat16)


def _col(v):
    return v.reshape(-1, 1).astype(jnp.float32)


def upsample2x(x):  # nearest neighbour x2 (NHWC) -- used by the reference only
    return jnp.repeat(jnp.repeat(x, 2, axis=1), 2, axis=2)


# ----------------------------------------------------------------------------
# Parameter construction (deterministic, synthetic)
# ----------------------------------------------------------------------------
def init_params(key, image_size, image_channel, std_channel, latent_dim, num_class):
    init_size = image_size // 4
    c1 = std_channel * 2
    ks = jax.random.split(key, 8)

    def nrm(k, shape, scale=0.05):
        return (scale * jax.random.normal(k, shape)).astype(jnp.float32)

    return dict(
        emb=nrm(ks[0], (num_class, latent_dim), 1.0),
        l1_w=nrm(ks[1], (latent_dim, c1 * init_size * init_size)),
        l1_b=jnp.zeros((c1 * init_size * init_size,), jnp.float32),
        bn0_g=jnp.ones((c1,), jnp.float32),
        bn0_b=jnp.zeros((c1,), jnp.float32),
        conv1_w=nrm(ks[2], (3, 3, c1, c1)),
        conv1_b=jnp.zeros((c1,), jnp.float32),
        bn1_g=jnp.ones((c1,), jnp.float32),
        bn1_b=jnp.zeros((c1,), jnp.float32),
        conv2_w=nrm(ks[3], (3, 3, c1, std_channel)),
        conv2_b=jnp.zeros((std_channel,), jnp.float32),
        bn2_g=jnp.ones((std_channel,), jnp.float32),
        bn2_b=jnp.zeros((std_channel,), jnp.float32),
        conv3_w=nrm(ks[4], (3, 3, std_channel, image_channel)),
        conv3_b=jnp.zeros((image_channel,), jnp.float32),
    )


# ----------------------------------------------------------------------------
# Generator forward (2 fused Pallas kernels + thin layout glue)
# ----------------------------------------------------------------------------
def generator_forward(params, x, label, *, image_size, std_channel,
                      image_channel, norm=True):
    s0 = image_size // 4
    c1 = std_channel * 2
    n = x.shape[0]

    # Embedding gather is glue; the multiply is fused into the linear kernel.
    emb = jnp.take(params["emb"], label, axis=0)
    h = embed_linear(x, emb, params["l1_w"], params["l1_b"])   # (N, c1*s0*s0)

    # torch .view(N, C, s, s) -> channels-first (C, N*s*s) kernel layout (2 KiB)
    act1 = h.reshape(n, c1, s0, s0).transpose(1, 0, 2, 3).reshape(c1, n * s0 * s0)

    s_mid, s_out = 2 * s0, 4 * s0
    s1 = _upsample_matrix(n, s0, s0)          # (N*s0^2,  N*(2s0)^2)
    s2 = _upsample_matrix(n, s_mid, s_mid)    # (N*(2s0)^2, N*(4s0)^2)
    mask_mid = _tap_masks(n, s_mid, s_mid)
    mask_out = _tap_masks(n, s_out, s_out)

    dec_params = (
        _col(params["bn0_g"]), _col(params["bn0_b"]),
        _conv_weight_cf(params["conv1_w"]), _col(params["conv1_b"]),
        _col(params["bn1_g"]), _col(params["bn1_b"]),
        _conv_weight_cf(params["conv2_w"]), _col(params["conv2_b"]),
        _col(params["bn2_g"]), _col(params["bn2_b"]),
        _conv_weight_cf(params["conv3_w"]), _col(params["conv3_b"]),
    )

    out_cf = decoder(
        act1, s1, s2, mask_mid, mask_out, dec_params,
        w_mid=s_mid, w_out=s_out, out_channels=image_channel, norm=norm,
    )                                                          # (Cimg, N*H*W)

    # back to NCHW to match the PyTorch output convention
    return out_cf.reshape(image_channel, n, image_size, image_size).transpose(
        1, 0, 2, 3
    )


# ----------------------------------------------------------------------------
# Pure-JAX reference (f32 ground truth for the correctness check)
# ----------------------------------------------------------------------------
def _ref_conv3x3(x, w, b):
    y = jax.lax.conv_general_dilated(
        x, w, (1, 1), "SAME", dimension_numbers=("NHWC", "HWIO", "NHWC")
    )
    return y + b


def _ref_bn(x, g, bt, eps=1e-5, slope=None):
    m = jnp.mean(x, axis=(0, 1, 2), keepdims=True)
    v = jnp.mean((x - m) ** 2, axis=(0, 1, 2), keepdims=True)
    y = (x - m) * jax.lax.rsqrt(v + eps) * g + bt
    if slope is not None:
        y = jnp.where(y >= 0, y, slope * y)
    return y


def reference_forward(params, x, label, *, image_size, std_channel, norm=True):
    init_size = image_size // 4
    c1 = std_channel * 2
    n = x.shape[0]
    emb = params["emb"][label]
    h = (x * emb) @ params["l1_w"] + params["l1_b"]
    h = jnp.transpose(h.reshape(n, c1, init_size, init_size), (0, 2, 3, 1))
    if norm:
        h = _ref_bn(h, params["bn0_g"], params["bn0_b"])
    h = upsample2x(h)
    h = _ref_conv3x3(h, params["conv1_w"], params["conv1_b"])
    h = _ref_bn(h, params["bn1_g"], params["bn1_b"], slope=0.2) if norm else jnp.where(h >= 0, h, 0.2 * h)
    h = upsample2x(h)
    h = _ref_conv3x3(h, params["conv2_w"], params["conv2_b"])
    h = _ref_bn(h, params["bn2_g"], params["bn2_b"], slope=0.2) if norm else jnp.where(h >= 0, h, 0.2 * h)
    h = jnp.tanh(_ref_conv3x3(h, params["conv3_w"], params["conv3_b"]))
    return jnp.transpose(h, (0, 3, 1, 2))


if __name__ == "__main__":
    image_size, image_channel, std_channel, latent_dim, num_class = 16, 3, 8, 32, 10
    batch = 2

    key = jax.random.PRNGKey(0)
    kp, kx, kl = jax.random.split(key, 3)
    params = init_params(kp, image_size, image_channel, std_channel, latent_dim, num_class)
    x = jax.random.normal(kx, (batch, latent_dim), dtype=jnp.float32)
    label = jax.random.randint(kl, (batch,), 0, num_class, dtype=jnp.int32)

    fwd = jax.jit(
        functools.partial(
            generator_forward,
            image_size=image_size,
            std_channel=std_channel,
            image_channel=image_channel,
            norm=True,
        )
    )
    out = jax.block_until_ready(fwd(params, x, label))

    assert out.shape == (batch, image_channel, image_size, image_size), out.shape
    assert bool(jnp.all(jnp.isfinite(out)))

    ref = reference_forward(
        params, x, label, image_size=image_size, std_channel=std_channel, norm=True
    )
    assert jnp.allclose(out, ref, atol=3e-2, rtol=3e-2), float(
        jnp.max(jnp.abs(out - ref))
    )

    print("KERNEL_OK")
</pallas_src>

<mosaic_0001>
module attributes {stable_mosaic.version = 11 : i64} {
  func.func @_embed_linear_kernel(%arg0: i32, %arg1: memref<2x32xf32, #tpu.memory_space<vmem>>, %arg2: memref<2x32xf32, #tpu.memory_space<vmem>>, %arg3: memref<32x256xbf16, #tpu.memory_space<vmem>>, %arg4: memref<1x256xf32, #tpu.memory_space<vmem>>, %arg5: memref<2x256xf32, #tpu.memory_space<vmem>>) attributes {dimension_semantics = [#tpu.dimension_semantics<arbitrary>], iteration_bounds = array<i64: 1>, scalar_prefetch = 0 : i64, scratch_operands = 0 : i64, tpu.core_type = #tpu.core_type<tc>, window_params = [{pipeline_mode = #tpu.pipeline_mode<synchronous>, transform_indices = @transform_0, window_bounds = array<i64: 2, 32>}, {pipeline_mode = #tpu.pipeline_mode<synchronous>, transform_indices = @transform_1, window_bounds = array<i64: 2, 32>}, {pipeline_mode = #tpu.pipeline_mode<synchronous>, transform_indices = @transform_2, window_bounds = array<i64: 32, 256>}, {pipeline_mode = #tpu.pipeline_mode<synchronous>, transform_indices = @transform_3, window_bounds = array<i64: 1, 256>}, {pipeline_mode = #tpu.pipeline_mode<synchronous>, transform_indices = @transform_4, window_bounds = array<i64: 2, 256>}]} {
    %c0 = arith.constant 0 : index
    %c0_0 = arith.constant 0 : index
    %0 = vector.load %arg1[%c0, %c0_0] : memref<2x32xf32, #tpu.memory_space<vmem>>, vector<2x32xf32>
    %c0_1 = arith.constant 0 : index
    %c0_2 = arith.constant 0 : index
    %1 = vector.load %arg2[%c0_1, %c0_2] : memref<2x32xf32, #tpu.memory_space<vmem>>, vector<2x32xf32>
    %2 = arith.mulf %0, %1 : vector<2x32xf32>
    %3 = arith.truncf %2 : vector<2x32xf32> to vector<2x32xbf16>
    %c0_3 = arith.constant 0 : index
    %c0_4 = arith.constant 0 : index
    %4 = vector.load %arg3[%c0_3, %c0_4] : memref<32x256xbf16, #tpu.memory_space<vmem>>, vector<32x256xbf16>
    %cst = arith.constant dense<0.000000e+00> : vector<2x256xf32>
    %5 = tpu.matmul %3, %4, %cst {dimension_numbers = #tpu.dot_dimension_numbers<[1], [0], [0], [1], [0, 0, 1, 1], [], []>} : vector<2x32xbf16>, vector<32x256xbf16>, vector<2x256xf32> -> vector<2x256xf32>
    %c0_5 = arith.constant 0 : index
    %c0_6 = arith.constant 0 : index
    %6 = vector.load %arg4[%c0_5, %c0_6] : memref<1x256xf32, #tpu.memory_space<vmem>>, vector<1x256xf32>
    %7 = vector.broadcast %6 : vector<1x256xf32> to vector<2x256xf32>
    %8 = arith.addf %5, %7 : vector<2x256xf32>
    %c0_7 = arith.constant 0 : index
    %c0_8 = arith.constant 0 : index
    %9 = vector.load %arg5[%c0_7, %c0_8] : memref<2x256xf32, #tpu.memory_space<vmem>>, vector<2x256xf32>
    tpu.vector_store %arg5[%c0_7, %c0_8], %8 {strides = array<i32>} : memref<2x256xf32, #tpu.memory_space<vmem>>, vector<2x256xf32>,
    return
  }
  func.func @transform_0(%arg0: i32) -> (i32, i32) {
    %c0_i32 = arith.constant 0 : i32
    %c0_i32_0 = arith.constant 0 : i32
    %c0_i32_1 = arith.constant 0 : i32
    return %c0_i32, %c0_i32_0 : i32, i32
  }
  func.func @transform_1(%arg0: i32) -> (i32, i32) {
    %c0_i32 = arith.constant 0 : i32
    %c0_i32_0 = arith.constant 0 : i32
    %c0_i32_1 = arith.constant 0 : i32
    return %c0_i32, %c0_i32_0 : i32, i32
  }
  func.func @transform_2(%arg0: i32) -> (i32, i32) {
    %c0_i32 = arith.constant 0 : i32
    %c0_i32_0 = arith.constant 0 : i32
    %c0_i32_1 = arith.constant 0 : i32
    return %c0_i32, %c0_i32_0 : i32, i32
  }
  func.func @transform_3(%arg0: i32) -> (i32, i32) {
    %c0_i32 = arith.constant 0 : i32
    %c0_i32_0 = arith.constant 0 : i32
    %c0_i32_1 = arith.constant 0 : i32
    return %c0_i32, %c0_i32_0 : i32, i32
  }
  func.func @transform_4(%arg0: i32) -> (i32, i32) {
    %c0_i32 = arith.constant 0 : i32
    %c0_i32_0 = arith.constant 0 : i32
    %c0_i32_1 = arith.constant 0 : i32
    return %c0_i32, %c0_i32_0 : i32, i32
  }
}

module attributes {stable_mosaic.version = 11 : i64} {
  func.func @_decoder_kernel(%arg0: i32, %arg1: memref<16x32xf32, #tpu.memory_space<vmem>>, %arg2: memref<32x128xbf16, #tpu.memory_space<vmem>>, %arg3: memref<128x512xbf16, #tpu.memory_space<vmem>>, %arg4: memref<9x128xf32, #tpu.memory_space<vmem>>, %arg5: memref<9x512xf32, #tpu.memory_space<vmem>>, %arg6: memref<16x1xf32, #tpu.memory_space<vmem>>, %arg7: memref<16x1xf32, #tpu.memory_space<vmem>>, %arg8: memref<16x144xbf16, #tpu.memory_space<vmem>>, %arg9: memref<16x1xf32, #tpu.memory_space<vmem>>, %arg10: memref<16x1xf32, #tpu.memory_space<vmem>>, %arg11: memref<16x1xf32, #tpu.memory_space<vmem>>, %arg12: memref<8x144xbf16, #tpu.memory_space<vmem>>, %arg13: memref<8x1xf32, #tpu.memory_space<vmem>>, %arg14: memref<8x1xf32, #tpu.memory_space<vmem>>, %arg15: memref<8x1xf32, #tpu.memory_space<vmem>>, %arg16: memref<3x72xbf16, #tpu.memory_space<vmem>>, %arg17: memref<3x1xf32, #tpu.memory_space<vmem>>, %arg18: memref<3x512xf32, #tpu.memory_space<vmem>>) attributes {dimension_semantics = [#tpu.dimension_semantics<arbitrary>], iteration_bounds = array<i64: 1>, scalar_prefetch = 0 : i64, scratch_operands = 0 : i64, tpu.core_type = #tpu.core_type<tc>, window_params = [{pipeline_mode = #tpu.pipeline_mode<synchronous>, transform_indices = @transform_0, window_bounds = array<i64: 16, 32>}, {pipeline_mode = #tpu.pipeline_mode<synchronous>, transform_indices = @transform_1, window_bounds = array<i64: 32, 128>}, {pipeline_mode = #tpu.pipeline_mode<synchronous>, transform_indices = @transform_2, window_bounds = array<i64: 128, 512>}, {pipeline_mode = #tpu.pipeline_mode<synchronous>, transform_indices = @transform_3, window_bounds = array<i64: 9, 128>}, {pipeline_mode = #tpu.pipeline_mode<synchronous>, transform_indices = @transform_4, window_bounds = array<i64: 9, 512>}, {pipeline_mode = #tpu.pipeline_mode<synchronous>, transform_indices = @transform_5, window_bounds = array<i64: 16, 1>}, {pipeline_mode = #tpu.pipeline_mode<synchronous>, transform_indices = @transform_6, window_bounds = array<i64: 16, 1>}, {pipeline_mode = #tpu.pipeline_mode<synchronous>, transform_indices = @transform_7, window_bounds = array<i64: 16, 144>}, {pipeline_mode = #tpu.pipeline_mode<synchronous>, transform_indices = @transform_8, window_bounds = array<i64: 16, 1>}, {pipeline_mode = #tpu.pipeline_mode<synchronous>, transform_indices = @transform_9, window_bounds = array<i64: 16, 1>}, {pipeline_mode = #tpu.pipeline_mode<synchronous>, transform_indices = @transform_10, window_bounds = array<i64: 16, 1>}, {pipeline_mode = #tpu.pipeline_mode<synchronous>, transform_indices = @transform_11, window_bounds = array<i64: 8, 144>}, {pipeline_mode = #tpu.pipeline_mode<synchronous>, transform_indices = @transform_12, window_bounds = array<i64: 8, 1>}, {pipeline_mode = #tpu.pipeline_mode<synchronous>, transform_indices = @transform_13, window_bounds = array<i64: 8, 1>}, {pipeline_mode = #tpu.pipeline_mode<synchronous>, transform_indices = @transform_14, window_bounds = array<i64: 8, 1>}, {pipeline_mode = #tpu.pipeline_mode<synchronous>, transform_indices = @transform_15, window_bounds = array<i64: 3, 72>}, {pipeline_mode = #tpu.pipeline_mode<synchronous>, transform_indices = @transform_16, window_bounds = array<i64: 3, 1>}, {pipeline_mode = #tpu.pipeline_mode<synchronous>, transform_indices = @transform_17, window_bounds = array<i64: 3, 512>}]} {
    %c0 = arith.constant 0 : index
    %c0_0 = arith.constant 0 : index
    %0 = vector.load %arg4[%c0, %c0_0] : memref<9x128xf32, #tpu.memory_space<vmem>>, vector<9x128xf32>
    %c0_1 = arith.constant 0 : index
    %c0_2 = arith.constant 0 : index
    %1 = vector.load %arg5[%c0_1, %c0_2] : memref<9x512xf32, #tpu.memory_space<vmem>>, vector<9x512xf32>
    %c0_3 = arith.constant 0 : index
    %c0_4 = arith.constant 0 : index
    %2 = vector.load %arg1[%c0_3, %c0_4] : memref<16x32xf32, #tpu.memory_space<vmem>>, vector<16x32xf32>
    %c0_5 = arith.constant 0 : index
    %c0_6 = arith.constant 0 : index
    %3 = vector.load %arg6[%c0_5, %c0_6] : memref<16x1xf32, #tpu.memory_space<vmem>>, vector<16x1xf32>
    %c0_7 = arith.constant 0 : index
    %c0_8 = arith.constant 0 : index
    %4 = vector.load %arg7[%c0_7, %c0_8] : memref<16x1xf32, #tpu.memory_space<vmem>>, vector<16x1xf32>
    %cst = arith.constant dense<0.000000e+00> : vector<16xf32>
    %5 = vector.multi_reduction <add>, %2, %cst [1] : vector<16x32xf32> to vector<16xf32>
    %6 = vector.shape_cast %5 : vector<16xf32> to vector<16x1xf32>
    %cst_9 = arith.constant 3.200000e+01 : f32
    %7 = vector.broadcast %cst_9 : f32 to vector<16x1xf32>
    %8 = arith.divf %6, %7 : vector<16x1xf32>
    %9 = vector.broadcast %8 : vector<16x1xf32> to vector<16x32xf32>
    %10 = arith.subf %2, %9 : vector<16x32xf32>
    %11 = arith.mulf %10, %10 : vector<16x32xf32>
    %cst_10 = arith.constant dense<0.000000e+00> : vector<16xf32>
    %12 = vector.multi_reduction <add>, %11, %cst_10 [1] : vector<16x32xf32> to vector<16xf32>
    %13 = vector.shape_cast %12 : vector<16xf32> to vector<16x1xf32>
    %cst_11 = arith.constant 3.200000e+01 : f32
    %14 = vector.broadcast %cst_11 : f32 to vector<16x1xf32>
    %15 = arith.divf %13, %14 : vector<16x1xf32>
    %16 = vector.broadcast %8 : vector<16x1xf32> to vector<16x32xf32>
    %17 = arith.subf %2, %16 : vector<16x32xf32>
    %cst_12 = arith.constant 9.99999974E-6 : f32
    %18 = vector.broadcast %cst_12 : f32 to vector<16x1xf32>
    %19 = arith.addf %15, %18 : vector<16x1xf32>
    %20 = math.rsqrt %19 : vector<16x1xf32>
    %21 = vector.broadcast %20 : vector<16x1xf32> to vector<16x32xf32>
    %22 = arith.mulf %17, %21 : vector<16x32xf32>
    %23 = vector.broadcast %3 : vector<16x1xf32> to vector<16x32xf32>
    %24 = arith.mulf %22, %23 : vector<16x32xf32>
    %25 = vector.broadcast %4 : vector<16x1xf32> to vector<16x32xf32>
    %26 = arith.addf %24, %25 : vector<16x32xf32>
    %27 = arith.truncf %26 : vector<16x32xf32> to vector<16x32xbf16>
    %c0_13 = arith.constant 0 : index
    %c0_14 = arith.constant 0 : index
    %28 = vector.load %arg2[%c0_13, %c0_14] : memref<32x128xbf16, #tpu.memory_space<vmem>>, vector<32x128xbf16>
    %cst_15 = arith.constant dense<0.000000e+00> : vector<16x128xf32>
    %29 = tpu.matmul %27, %28, %cst_15 {dimension_numbers = #tpu.dot_dimension_numbers<[1], [0], [0], [1], [0, 0, 1, 1], [], []>} : vector<16x32xbf16>, vector<32x128xbf16>, vector<16x128xf32> -> vector<16x128xf32>
    %cst_16 = arith.constant 0.000000e+00 : f32
    %30 = vector.broadcast %cst_16 : f32 to vector<16x128xf32>
    %31 = tpu.concatenate %30, %29, %30 in 1 : vector<16x128xf32>, vector<16x128xf32>, vector<16x128xf32> -> vector<16x384xf32>
    %32 = vector.extract_strided_slice %31 {offsets = [0, 119], sizes = [16, 128], strides = [1, 1]} : vector<16x384xf32> to vector<16x128xf32>
    %33 = vector.extract_strided_slice %0 {offsets = [0, 0], sizes = [1, 128], strides = [1, 1]} : vector<9x128xf32> to vector<1x128xf32>
    %34 = vector.broadcast %33 : vector<1x128xf32> to vector<16x128xf32>
    %35 = arith.mulf %32, %34 : vector<16x128xf32>
    %36 = vector.extract_strided_slice %31 {offsets = [0, 120], sizes = [16, 128], strides = [1, 1]} : vector<16x384xf32> to vector<16x128xf32>
    %37 = vector.extract_strided_slice %0 {offsets = [1, 0], sizes = [1, 128], strides = [1, 1]} : vector<9x128xf32> to vector<1x128xf32>
    %38 = vector.broadcast %37 : vector<1x128xf32> to vector<16x128xf32>
    %39 = arith.mulf %36, %38 : vector<16x128xf32>
    %40 = vector.extract_strided_slice %31 {offsets = [0, 121], sizes = [16, 128], strides = [1, 1]} : vector<16x384xf32> to vector<16x128xf32>
    %41 = vector.extract_strided_slice %0 {offsets = [2, 0], sizes = [1, 128], strides = [1, 1]} : vector<9x128xf32> to vector<1x128xf32>
    %42 = vector.broadcast %41 : vector<1x128xf32> to vector<16x128xf32>
    %43 = arith.mulf %40, %42 : vector<16x128xf32>
    %44 = vector.extract_strided_slice %31 {offsets = [0, 127], sizes = [16, 128], strides = [1, 1]} : vector<16x384xf32> to vector<16x128xf32>
    %45 = vector.extract_strided_slice %0 {offsets = [3, 0], sizes = [1, 128], strides = [1, 1]} : vector<9x128xf32> to vector<1x128xf32>
    %46 = vector.broadcast %45 : vector<1x128xf32> to vector<16x128xf32>
    %47 = arith.mulf %44, %46 : vector<16x128xf32>
    %48 = vector.extract_strided_slice %31 {offsets = [0, 128], sizes = [16, 128], strides = [1, 1]} : vector<16x384xf32> to vector<16x128xf32>
    %49 = vector.extract_strided_slice %0 {offsets = [4, 0], sizes = [1, 128], strides = [1, 1]} : vector<9x128xf32> to vector<1x128xf32>
    %50 = vector.broadcast %49 : vector<1x128xf32> to vector<16x128xf32>
    %51 = arith.mulf %48, %50 : vector<16x128xf32>
    %52 = vector.extract_strided_slice %31 {offsets = [0, 129], sizes = [16, 128], strides = [1, 1]} : vector<16x384xf32> to vector<16x128xf32>
    %53 = vector.extract_strided_slice %0 {offsets = [5, 0], sizes = [1, 128], strides = [1, 1]} : vector<9x128xf32> to vector<1x128xf32>
    %54 = vector.broadcast %53 : vector<1x128xf32> to vector<16x128xf32>
    %55 = arith.mulf %52, %54 : vector<16x128xf32>
    %56 = vector.extract_strided_slice %31 {offsets = [0, 135], sizes = [16, 128], strides = [1, 1]} : vector<16x384xf32> to vector<16x128xf32>
    %57 = vector.extract_strided_slice %0 {offsets = [6, 0], sizes = [1, 128], strides = [1, 1]} : vector<9x128xf32> to vector<1x128xf32>
    %58 = vector.broadcast %57 : vector<1x128xf32> to vector<16x128xf32>
    %59 = arith.mulf %56, %58 : vector<16x128xf32>
    %60 = vector.extract_strided_slice %31 {offsets = [0, 136], sizes = [16, 128], strides = [1, 1]} : vector<16x384xf32> to vector<16x128xf32>
    %61 = vector.extract_strided_slice %0 {offsets = [7, 0], sizes = [1, 128], strides = [1, 1]} : vector<9x128xf32> to vector<1x128xf32>
    %62 = vector.broadcast %61 : vector<1x128xf32> to vector<16x128xf32>
    %63 = arith.mulf %60, %62 : vector<16x128xf32>
    %64 = vector.extract_strided_slice %31 {offsets = [0, 137], sizes = [16, 128], strides = [1, 1]} : vector<16x384xf32> to vector<16x128xf32>
    %65 = vector.extract_strided_slice %0 {offsets = [8, 0], sizes = [1, 128], strides = [1, 1]} : vector<9x128xf32> to vector<1x128xf32>
    %66 = vector.broadcast %65 : vector<1x128xf32> to vector<16x128xf32>
    %67 = arith.mulf %64, %66 : vector<16x128xf32>
    %68 = tpu.concatenate %35, %39, %43, %47, %51, %55, %59, %63, %67 in 0 : vector<16x128xf32>, vector<16x128xf32>, vector<16x128xf32>, vector<16x128xf32>, vector<16x128xf32>, vector<16x128xf32>, vector<16x128xf32>, vector<16x128xf32>, vector<16x128xf32> -> vector<144x128xf32>
    %69 = arith.truncf %68 : vector<144x128xf32> to vector<144x128xbf16>
    %c0_17 = arith.constant 0 : index
    %c0_18 = arith.constant 0 : index
    %70 = vector.load %arg8[%c0_17, %c0_18] : memref<16x144xbf16, #tpu.memory_space<vmem>>, vector<16x144xbf16>
    %cst_19 = arith.constant dense<0.000000e+00> : vector<16x128xf32>
    %71 = tpu.matmul %70, %69, %cst_19 {dimension_numbers = #tpu.dot_dimension_numbers<[1], [0], [0], [1], [0, 0, 1, 1], [], []>} : vector<16x144xbf16>, vector<144x128xbf16>, vector<16x128xf32> -> vector<16x128xf32>
    %c0_20 = arith.constant 0 : index
    %c0_21 = arith.constant 0 : index
    %72 = vector.load %arg9[%c0_20, %c0_21] : memref<16x1xf32, #tpu.memory_space<vmem>>, vector<16x1xf32>
    %73 = vector.broadcast %72 : vector<16x1xf32> to vector<16x128xf32>
    %74 = arith.addf %71, %73 : vector<16x128xf32>
    %c0_22 = arith.constant 0 : index
    %c0_23 = arith.constant 0 : index
    %75 = vector.load %arg10[%c0_22, %c0_23] : memref<16x1xf32, #tpu.memory_space<vmem>>, vector<16x1xf32>
    %c0_24 = arith.constant 0 : index
    %c0_25 = arith.constant 0 : index
    %76 = vector.load %arg11[%c0_24, %c0_25] : memref<16x1xf32, #tpu.memory_space<vmem>>, vector<16x1xf32>
    %cst_26 = arith.constant dense<0.000000e+00> : vector<16xf32>
    %77 = vector.multi_reduction <add>, %74, %cst_26 [1] : vector<16x128xf32> to vector<16xf32>
    %78 = vector.shape_cast %77 : vector<16xf32> to vector<16x1xf32>
    %cst_27 = arith.constant 1.280000e+02 : f32
    %79 = vector.broadcast %cst_27 : f32 to vector<16x1xf32>
    %80 = arith.divf %78, %79 : vector<16x1xf32>
    %81 = vector.broadcast %80 : vector<16x1xf32> to vector<16x128xf32>
    %82 = arith.subf %74, %81 : vector<16x128xf32>
    %83 = arith.mulf %82, %82 : vector<16x128xf32>
    %cst_28 = arith.constant dense<0.000000e+00> : vector<16xf32>
    %84 = vector.multi_reduction <add>, %83, %cst_28 [1] : vector<16x128xf32> to vector<16xf32>
    %85 = vector.shape_cast %84 : vector<16xf32> to vector<16x1xf32>
    %cst_29 = arith.constant 1.280000e+02 : f32
    %86 = vector.broadcast %cst_29 : f32 to vector<16x1xf32>
    %87 = arith.divf %85, %86 : vector<16x1xf32>
    %88 = vector.broadcast %80 : vector<16x1xf32> to vector<16x128xf32>
    %89 = arith.subf %74, %88 : vector<16x128xf32>
    %cst_30 = arith.constant 9.99999974E-6 : f32
    %90 = vector.broadcast %cst_30 : f32 to vector<16x1xf32>
    %91 = arith.addf %87, %90 : vector<16x1xf32>
    %92 = math.rsqrt %91 : vector<16x1xf32>
    %93 = vector.broadcast %92 : vector<16x1xf32> to vector<16x128xf32>
    %94 = arith.mulf %89, %93 : vector<16x128xf32>
    %95 = vector.broadcast %75 : vector<16x1xf32> to vector<16x128xf32>
    %96 = arith.mulf %94, %95 : vector<16x128xf32>
    %97 = vector.broadcast %76 : vector<16x1xf32> to vector<16x128xf32>
    %98 = arith.addf %96, %97 : vector<16x128xf32>
    %cst_31 = arith.constant 0.000000e+00 : f32
    %99 = vector.broadcast %cst_31 : f32 to vector<16x128xf32>
    %100 = arith.cmpf oge, %98, %99 : vector<16x128xf32>
    %cst_32 = arith.constant 2.000000e-01 : f32
    %101 = vector.broadcast %cst_32 : f32 to vector<16x128xf32>
    %102 = arith.mulf %101, %98 : vector<16x128xf32>
    %103 = arith.select %100, %98, %102 : vector<16x128xi1>, vector<16x128xf32>
    %104 = arith.truncf %103 : vector<16x128xf32> to vector<16x128xbf16>
    %c0_33 = arith.constant 0 : index
    %c0_34 = arith.constant 0 : index
    %105 = vector.load %arg3[%c0_33, %c0_34] : memref<128x512xbf16, #tpu.memory_space<vmem>>, vector<128x512xbf16>
    %cst_35 = arith.constant dense<0.000000e+00> : vector<16x512xf32>
    %106 = tpu.matmul %104, %105, %cst_35 {dimension_numbers = #tpu.dot_dimension_numbers<[1], [0], [0], [1], [0, 0, 1, 1], [], []>} : vector<16x128xbf16>, vector<128x512xbf16>, vector<16x512xf32> -> vector<16x512xf32>
    %cst_36 = arith.constant 0.000000e+00 : f32
    %107 = vector.broadcast %cst_36 : f32 to vector<16x128xf32>
    %108 = tpu.concatenate %107, %106, %107 in 1 : vector<16x128xf32>, vector<16x512xf32>, vector<16x128xf32> -> vector<16x768xf32>
    %109 = vector.extract_strided_slice %108 {offsets = [0, 111], sizes = [16, 512], strides = [1, 1]} : vector<16x768xf32> to vector<16x512xf32>
    %110 = vector.extract_strided_slice %1 {offsets = [0, 0], sizes = [1, 512], strides = [1, 1]} : vector<9x512xf32> to vector<1x512xf32>
    %111 = vector.broadcast %110 : vector<1x512xf32> to vector<16x512xf32>
    %112 = arith.mulf %109, %111 : vector<16x512xf32>
    %113 = vector.extract_strided_slice %108 {offsets = [0, 112], sizes = [16, 512], strides = [1, 1]} : vector<16x768xf32> to vector<16x512xf32>
    %114 = vector.extract_strided_slice %1 {offsets = [1, 0], sizes = [1, 512], strides = [1, 1]} : vector<9x512xf32> to vector<1x512xf32>
    %115 = vector.broadcast %114 : vector<1x512xf32> to vector<16x512xf32>
    %116 = arith.mulf %113, %115 : vector<16x512xf32>
    %117 = vector.extract_strided_slice %108 {offsets = [0, 113], sizes = [16, 512], strides = [1, 1]} : vector<16x768xf32> to vector<16x512xf32>
    %118 = vector.extract_strided_slice %1 {offsets = [2, 0], sizes = [1, 512], strides = [1, 1]} : vector<9x512xf32> to vector<1x512xf32>
    %119 = vector.broadcast %118 : vector<1x512xf32> to vector<16x512xf32>
    %120 = arith.mulf %117, %119 : vector<16x512xf32>
    %121 = vector.extract_strided_slice %108 {offsets = [0, 127], sizes = [16, 512], strides = [1, 1]} : vector<16x768xf32> to vector<16x512xf32>
    %122 = vector.extract_strided_slice %1 {offsets = [3, 0], sizes = [1, 512], strides = [1, 1]} : vector<9x512xf32> to vector<1x512xf32>
    %123 = vector.broadcast %122 : vector<1x512xf32> to vector<16x512xf32>
    %124 = arith.mulf %121, %123 : vector<16x512xf32>
    %125 = vector.extract_strided_slice %108 {offsets = [0, 128], sizes = [16, 512], strides = [1, 1]} : vector<16x768xf32> to vector<16x512xf32>
    %126 = vector.extract_strided_slice %1 {offsets = [4, 0], sizes = [1, 512], strides = [1, 1]} : vector<9x512xf32> to vector<1x512xf32>
    %127 = vector.broadcast %126 : vector<1x512xf32> to vector<16x512xf32>
    %128 = arith.mulf %125, %127 : vector<16x512xf32>
    %129 = vector.extract_strided_slice %108 {offsets = [0, 129], sizes = [16, 512], strides = [1, 1]} : vector<16x768xf32> to vector<16x512xf32>
    %130 = vector.extract_strided_slice %1 {offsets = [5, 0], sizes = [1, 512], strides = [1, 1]} : vector<9x512xf32> to vector<1x512xf32>
    %131 = vector.broadcast %130 : vector<1x512xf32> to vector<16x512xf32>
    %132 = arith.mulf %129, %131 : vector<16x512xf32>
    %133 = vector.extract_strided_slice %108 {offsets = [0, 143], sizes = [16, 512], strides = [1, 1]} : vector<16x768xf32> to vector<16x512xf32>
    %134 = vector.extract_strided_slice %1 {offsets = [6, 0], sizes = [1, 512], strides = [1, 1]} : vector<9x512xf32> to vector<1x512xf32>
    %135 = vector.broadcast %134 : vector<1x512xf32> to vector<16x512xf32>
    %136 = arith.mulf %133, %135 : vector<16x512xf32>
    %137 = vector.extract_strided_slice %108 {offsets = [0, 144], sizes = [16, 512], strides = [1, 1]} : vector<16x768xf32> to vector<16x512xf32>
    %138 = vector.extract_strided_slice %1 {offsets = [7, 0], sizes = [1, 512], strides = [1, 1]} : vector<9x512xf32> to vector<1x512xf32>
    %139 = vector.broadcast %138 : vector<1x512xf32> to vector<16x512xf32>
    %140 = arith.mulf %137, %139 : vector<16x512xf32>
    %141 = vector.extract_strided_slice %108 {offsets = [0, 145], sizes = [16, 512], strides = [1, 1]} : vector<16x768xf32> to vector<16x512xf32>
    %142 = vector.extract_strided_slice %1 {offsets = [8, 0], sizes = [1, 512], strides = [1, 1]} : vector<9x512xf32> to vector<1x512xf32>
    %143 = vector.broadcast %142 : vector<1x512xf32> to vector<16x512xf32>
    %144 = arith.mulf %141, %143 : vector<16x512xf32>
    %145 = tpu.concatenate %112, %116, %120, %124, %128, %132, %136, %140, %144 in 0 : vector<16x512xf32>, vector<16x512xf32>, vector<16x512xf32>, vector<16x512xf32>, vector<16x512xf32>, vector<16x512xf32>, vector<16x512xf32>, vector<16x512xf32>, vector<16x512xf32> -> vector<144x512xf32>
    %146 = arith.truncf %145 : vector<144x512xf32> to vector<144x512xbf16>
    %c0_37 = arith.constant 0 : index
    %c0_38 = arith.constant 0 : index
    %147 = vector.load %arg12[%c0_37, %c0_38] : memref<8x144xbf16, #tpu.memory_space<vmem>>, vector<8x144xbf16>
    %cst_39 = arith.constant dense<0.000000e+00> : vector<8x512xf32>
    %148 = tpu.matmul %147, %146, %cst_39 {dimension_numbers = #tpu.dot_dimension_numbers<[1], [0], [0], [1], [0, 0, 1, 1], [], []>} : vector<8x144xbf16>, vector<144x512xbf16>, vector<8x512xf32> -> vector<8x512xf32>
    %c0_40 = arith.constant 0 : index
    %c0_41 = arith.constant 0 : index
    %149 = vector.load %arg13[%c0_40, %c0_41] : memref<8x1xf32, #tpu.memory_space<vmem>>, vector<8x1xf32>
    %150 = vector.broadcast %149 : vector<8x1xf32> to vector<8x512xf32>
    %151 = arith.addf %148, %150 : vector<8x512xf32>
    %c0_42 = arith.constant 0 : index
    %c0_43 = arith.constant 0 : index
    %152 = vector.load %arg14[%c0_42, %c0_43] : memref<8x1xf32, #tpu.memory_space<vmem>>, vector<8x1xf32>
    %c0_44 = arith.constant 0 : index
    %c0_45 = arith.constant 0 : index
    %153 = vector.load %arg15[%c0_44, %c0_45] : memref<8x1xf32, #tpu.memory_space<vmem>>, vector<8x1xf32>
    %cst_46 = arith.constant dense<0.000000e+00> : vector<8xf32>
    %154 = vector.multi_reduction <add>, %151, %cst_46 [1] : vector<8x512xf32> to vector<8xf32>
    %155 = vector.shape_cast %154 : vector<8xf32> to vector<8x1xf32>
    %cst_47 = arith.constant 5.120000e+02 : f32
    %156 = vector.broadcast %cst_47 : f32 to vector<8x1xf32>
    %157 = arith.divf %155, %156 : vector<8x1xf32>
    %158 = vector.broadcast %157 : vector<8x1xf32> to vector<8x512xf32>
    %159 = arith.subf %151, %158 : vector<8x512xf32>
    %160 = arith.mulf %159, %159 : vector<8x512xf32>
    %cst_48 = arith.constant dense<0.000000e+00> : vector<8xf32>
    %161 = vector.multi_reduction <add>, %160, %cst_48 [1] : vector<8x512xf32> to vector<8xf32>
    %162 = vector.shape_cast %161 : vector<8xf32> to vector<8x1xf32>
    %cst_49 = arith.constant 5.120000e+02 : f32
    %163 = vector.broadcast %cst_49 : f32 to vector<8x1xf32>
    %164 = arith.divf %162, %163 : vector<8x1xf32>
    %165 = vector.broadcast %157 : vector<8x1xf32> to vector<8x512xf32>
    %166 = arith.subf %151, %165 : vector<8x512xf32>
    %cst_50 = arith.constant 9.99999974E-6 : f32
    %167 = vector.broadcast %cst_50 : f32 to vector<8x1xf32>
    %168 = arith.addf %164, %167 : vector<8x1xf32>
    %169 = math.rsqrt %168 : vector<8x1xf32>
    %170 = vector.broadcast %169 : vector<8x1xf32> to vector<8x512xf32>
    %171 = arith.mulf %166, %170 : vector<8x512xf32>
    %172 = vector.broadcast %152 : vector<8x1xf32> to vector<8x512xf32>
    %173 = arith.mulf %171, %172 : vector<8x512xf32>
    %174 = vector.broadcast %153 : vector<8x1xf32> to vector<8x512xf32>
    %175 = arith.addf %173, %174 : vector<8x512xf32>
    %cst_51 = arith.constant 0.000000e+00 : f32
    %176 = vector.broadcast %cst_51 : f32 to vector<8x512xf32>
    %177 = arith.cmpf oge, %175, %176 : vector<8x512xf32>
    %cst_52 = arith.constant 2.000000e-01 : f32
    %178 = vector.broadcast %cst_52 : f32 to vector<8x512xf32>
    %179 = arith.mulf %178, %175 : vector<8x512xf32>
    %180 = arith.select %177, %175, %179 : vector<8x512xi1>, vector<8x512xf32>
    %cst_53 = arith.constant 0.000000e+00 : f32
    %181 = vector.broadcast %cst_53 : f32 to vector<8x128xf32>
    %182 = tpu.concatenate %181, %180, %181 in 1 : vector<8x128xf32>, vector<8x512xf32>, vector<8x128xf32> -> vector<8x768xf32>
    %183 = vector.extract_strided_slice %182 {offsets = [0, 111], sizes = [8, 512], strides = [1, 1]} : vector<8x768xf32> to vector<8x512xf32>
    %184 = vector.extract_strided_slice %1 {offsets = [0, 0], sizes = [1, 512], strides = [1, 1]} : vector<9x512xf32> to vector<1x512xf32>
    %185 = vector.broadcast %184 : vector<1x512xf32> to vector<8x512xf32>
    %186 = arith.mulf %183, %185 : vector<8x512xf32>
    %187 = vector.extract_strided_slice %182 {offsets = [0, 112], sizes = [8, 512], strides = [1, 1]} : vector<8x768xf32> to vector<8x512xf32>
    %188 = vector.extract_strided_slice %1 {offsets = [1, 0], sizes = [1, 512], strides = [1, 1]} : vector<9x512xf32> to vector<1x512xf32>
    %189 = vector.broadcast %188 : vector<1x512xf32> to vector<8x512xf32>
    %190 = arith.mulf %187, %189 : vector<8x512xf32>
    %191 = vector.extract_strided_slice %182 {offsets = [0, 113], sizes = [8, 512], strides = [1, 1]} : vector<8x768xf32> to vector<8x512xf32>
    %192 = vector.extract_strided_slice %1 {offsets = [2, 0], sizes = [1, 512], strides = [1, 1]} : vector<9x512xf32> to vector<1x512xf32>
    %193 = vector.broadcast %192 : vector<1x512xf32> to vector<8x512xf32>
    %194 = arith.mulf %191, %193 : vector<8x512xf32>
    %195 = vector.extract_strided_slice %182 {offsets = [0, 127], sizes = [8, 512], strides = [1, 1]} : vector<8x768xf32> to vector<8x512xf32>
    %196 = vector.extract_strided_slice %1 {offsets = [3, 0], sizes = [1, 512], strides = [1, 1]} : vector<9x512xf32> to vector<1x512xf32>
    %197 = vector.broadcast %196 : vector<1x512xf32> to vector<8x512xf32>
    %198 = arith.mulf %195, %197 : vector<8x512xf32>
    %199 = vector.extract_strided_slice %182 {offsets = [0, 128], sizes = [8, 512], strides = [1, 1]} : vector<8x768xf32> to vector<8x512xf32>
    %200 = vector.extract_strided_slice %1 {offsets = [4, 0], sizes = [1, 512], strides = [1, 1]} : vector<9x512xf32> to vector<1x512xf32>
    %201 = vector.broadcast %200 : vector<1x512xf32> to vector<8x512xf32>
    %202 = arith.mulf %199, %201 : vector<8x512xf32>
    %203 = vector.extract_strided_slice %182 {offsets = [0, 129], sizes = [8, 512], strides = [1, 1]} : vector<8x768xf32> to vector<8x512xf32>
    %204 = vector.extract_strided_slice %1 {offsets = [5, 0], sizes = [1, 512], strides = [1, 1]} : vector<9x512xf32> to vector<1x512xf32>
    %205 = vector.broadcast %204 : vector<1x512xf32> to vector<8x512xf32>
    %206 = arith.mulf %203, %205 : vector<8x512xf32>
    %207 = vector.extract_strided_slice %182 {offsets = [0, 143], sizes = [8, 512], strides = [1, 1]} : vector<8x768xf32> to vector<8x512xf32>
    %208 = vector.extract_strided_slice %1 {offsets = [6, 0], sizes = [1, 512], strides = [1, 1]} : vector<9x512xf32> to vector<1x512xf32>
    %209 = vector.broadcast %208 : vector<1x512xf32> to vector<8x512xf32>
    %210 = arith.mulf %207, %209 : vector<8x512xf32>
    %211 = vector.extract_strided_slice %182 {offsets = [0, 144], sizes = [8, 512], strides = [1, 1]} : vector<8x768xf32> to vector<8x512xf32>
    %212 = vector.extract_strided_slice %1 {offsets = [7, 0], sizes = [1, 512], strides = [1, 1]} : vector<9x512xf32> to vector<1x512xf32>
    %213 = vector.broadcast %212 : vector<1x512xf32> to vector<8x512xf32>
    %214 = arith.mulf %211, %213 : vector<8x512xf32>
    %215 = vector.extract_strided_slice %182 {offsets = [0, 145], sizes = [8, 512], strides = [1, 1]} : vector<8x768xf32> to vector<8x512xf32>
    %216 = vector.extract_strided_slice %1 {offsets = [8, 0], sizes = [1, 512], strides = [1, 1]} : vector<9x512xf32> to vector<1x512xf32>
    %217 = vector.broadcast %216 : vector<1x512xf32> to vector<8x512xf32>
    %218 = arith.mulf %215, %217 : vector<8x512xf32>
    %219 = tpu.concatenate %186, %190, %194, %198, %202, %206, %210, %214, %218 in 0 : vector<8x512xf32>, vector<8x512xf32>, vector<8x512xf32>, vector<8x512xf32>, vector<8x512xf32>, vector<8x512xf32>, vector<8x512xf32>, vector<8x512xf32>, vector<8x512xf32> -> vector<72x512xf32>
    %220 = arith.truncf %219 : vector<72x512xf32> to vector<72x512xbf16>
    %c0_54 = arith.constant 0 : index
    %c0_55 = arith.constant 0 : index
    %221 = vector.load %arg16[%c0_54, %c0_55] : memref<3x72xbf16, #tpu.memory_space<vmem>>, vector<3x72xbf16>
    %cst_56 = arith.constant dense<0.000000e+00> : vector<3x512xf32>
    %222 = tpu.matmul %221, %220, %cst_56 {dimension_numbers = #tpu.dot_dimension_numbers<[1], [0], [0], [1], [0, 0, 1, 1], [], []>} : vector<3x72xbf16>, vector<72x512xbf16>, vector<3x512xf32> -> vector<3x512xf32>
    %c0_57 = arith.constant 0 : index
    %c0_58 = arith.constant 0 : index
    %223 = vector.load %arg17[%c0_57, %c0_58] : memref<3x1xf32, #tpu.memory_space<vmem>>, vector<3x1xf32>
    %224 = vector.broadcast %223 : vector<3x1xf32> to vector<3x512xf32>
    %225 = arith.addf %222, %224 : vector<3x512xf32>
    %226 = math.tanh %225 : vector<3x512xf32>
    %c0_59 = arith.constant 0 : index
    %c0_60 = arith.constant 0 : index
    %227 = vector.load %arg18[%c0_59, %c0_60] : memref<3x512xf32, #tpu.memory_space<vmem>>, vector<3x512xf32>
    tpu.vector_store %arg18[%c0_59, %c0_60], %226 {strides = array<i32>} : memref<3x512xf32, #tpu.memory_space<vmem>>, vector<3x512xf32>,
    return
  }
  func.func @transform_0(%arg0: i32) -> (i32, i32) {
    %c0_i32 = arith.constant 0 : i32
    %c0_i32_0 = arith.constant 0 : i32
    %c0_i32_1 = arith.constant 0 : i32
    return %c0_i32, %c0_i32_0 : i32, i32
  }
  func.func @transform_1(%arg0: i32) -> (i32, i32) {
    %c0_i32 = arith.constant 0 : i32
    %c0_i32_0 = arith.constant 0 : i32
    %c0_i32_1 = arith.constant 0 : i32
    return %c0_i32, %c0_i32_0 : i32, i32
  }
  func.func @transform_2(%arg0: i32) -> (i32, i32) {
    %c0_i32 = arith.constant 0 : i32
    %c0_i32_0 = arith.constant 0 : i32
    %c0_i32_1 = arith.constant 0 : i32
    return %c0_i32, %c0_i32_0 : i32, i32
  }
  func.func @transform_3(%arg0: i32) -> (i32, i32) {
    %c0_i32 = arith.constant 0 : i32
    %c0_i32_0 = arith.constant 0 : i32
    %c0_i32_1 = arith.constant 0 : i32
    return %c0_i32, %c0_i32_0 : i32, i32
  }
  func.func @transform_4(%arg0: i32) -> (i32, i32) {
    %c0_i32 = arith.constant 0 : i32
    %c0_i32_0 = arith.constant 0 : i32
    %c0_i32_1 = arith.constant 0 : i32
    return %c0_i32, %c0_i32_0 : i32, i32
  }
  func.func @transform_5(%arg0: i32) -> (i32, i32) {
    %c0_i32 = arith.constant 0 : i32
    %c0_i32_0 = arith.constant 0 : i32
    %c0_i32_1 = arith.constant 0 : i32
    return %c0_i32, %c0_i32_0 : i32, i32
  }
  func.func @transform_6(%arg0: i32) -> (i32, i32) {
    %c0_i32 = arith.constant 0 : i32
    %c0_i32_0 = arith.constant 0 : i32
    %c0_i32_1 = arith.constant 0 : i32
    return %c0_i32, %c0_i32_0 : i32, i32
  }
  func.func @transform_7(%arg0: i32) -> (i32, i32) {
    %c0_i32 = arith.constant 0 : i32
    %c0_i32_0 = arith.constant 0 : i32
    %c0_i32_1 = arith.constant 0 : i32
    return %c0_i32, %c0_i32_0 : i32, i32
  }
  func.func @transform_8(%arg0: i32) -> (i32, i32) {
    %c0_i32 = arith.constant 0 : i32
    %c0_i32_0 = arith.constant 0 : i32
    %c0_i32_1 = arith.constant 0 : i32
    return %c0_i32, %c0_i32_0 : i32, i32
  }
  func.func @transform_9(%arg0: i32) -> (i32, i32) {
    %c0_i32 = arith.constant 0 : i32
    %c0_i32_0 = arith.constant 0 : i32
    %c0_i32_1 = arith.constant 0 : i32
    return %c0_i32, %c0_i32_0 : i32, i32
  }
  func.func @transform_10(%arg0: i32) -> (i32, i32) {
    %c0_i32 = arith.constant 0 : i32
    %c0_i32_0 = arith.constant 0 : i32
    %c0_i32_1 = arith.constant 0 : i32
    return %c0_i32, %c0_i32_0 : i32, i32
  }
  func.func @transform_11(%arg0: i32) -> (i32, i32) {
    %c0_i32 = arith.constant 0 : i32
    %c0_i32_0 = arith.constant 0 : i32
    %c0_i32_1 = arith.constant 0 : i32
    return %c0_i32, %c0_i32_0 : i32, i32
  }
  func.func @transform_12(%arg0: i32) -> (i32, i32) {
    %c0_i32 = arith.constant 0 : i32
    %c0_i32_0 = arith.constant 0 : i32
    %c0_i32_1 = arith.constant 0 : i32
    return %c0_i32, %c0_i32_0 : i32, i32
  }
  func.func @transform_13(%arg0: i32) -> (i32, i32) {
    %c0_i32 = arith.constant 0 : i32
    %c0_i32_0 = arith.constant 0 : i32
    %c0_i32_1 = arith.constant 0 : i32
    return %c0_i32, %c0_i32_0 : i32, i32
  }
  func.func @transform_14(%arg0: i32) -> (i32, i32) {
    %c0_i32 = arith.constant 0 : i32
    %c0_i32_0 = arith.constant 0 : i32
    %c0_i32_1 = arith.constant 0 : i32
    return %c0_i32, %c0_i32_0 : i32, i32
  }
  func.func @transform_15(%arg0: i32) -> (i32, i32) {
    %c0_i32 = arith.constant 0 : i32
    %c0_i32_0 = arith.constant 0 : i32
    %c0_i32_1 = arith.constant 0 : i32
    return %c0_i32, %c0_i32_0 : i32, i32
  }
  func.func @transform_16(%arg0: i32) -> (i32, i32) {
    %c0_i32 = arith.constant 0 : i32
    %c0_i32_0 = arith.constant 0 : i32
    %c0_i32_1 = arith.constant 0 : i32
    return %c0_i32, %c0_i32_0 : i32, i32
  }
  func.func @transform_17(%arg0: i32) -> (i32, i32) {
    %c0_i32 = arith.constant 0 : i32
    %c0_i32_0 = arith.constant 0 : i32
    %c0_i32_1 = arith.constant 0 : i32
    return %c0_i32, %c0_i32_0 : i32, i32
  }
}

</mosaic_0001>

<bundles_post_ra>
// kernel: generator_forward.2
= control target key start
LH: loop header
LB: loop body
LE: loop exit
PB: predicated region body
PF: predicated region fallthrough
CT: control target
= control target key end

     0   :  { %v132_v1 = vmov 0   ;;  %vm58_vm0 = vcmask 261120   ;;  %v28_v9 = vlaneseq  ;;  %s182_s2 = inlined_call_operand.vmem [shape: bf16[32,256], index: 2, kind: input, shape index: {}]   ;;  %s183_s0 = inlined_call_operand.vmem [shape: f32[2,32], index: 0, kind: input, shape index: {}]   ;;  %s184_s1 = inlined_call_operand.vmem [shape: f32[2,32], index: 1, kind: input, shape index: {}]   ;;  %s185_s3 = inlined_call_operand.vmem [shape: f32[1,256], index: 3, kind: input, shape index: {}]   ;;  %s186_s4 = inlined_call_operand.vmem [shape: f32[2,256], index: 4, kind: output, shape index: {}]  }
   0x1   :  { %v126_v0 = vld [vmem:[%s182_s2 + $0x4] ss:$8 sps:$4 sm:$0xff]   ;;  %94 = vmatprep.mubr.bf16.mxu0 %v132_v1  ;;  %v128_v2 = vld [vmem:[%s182_s2] ss:$8 sps:$4 sm:$0xff]   ;;  %v129_v3 = vld [vmem:[%s182_s2 + $0x14] ss:$8 sps:$4 sm:$0xff]  }
   0x2   :  { %62 = vmatprep.subr.bf16.mxu0 %v126_v0  ;;  %v18_v4 = vld [vmem:[%s183_s0] sm:$0x3]  ;;  %v131_v5 = vld [vmem:[%s182_s2 + $0x10] ss:$8 sps:$4 sm:$0xff]   ;;  %v29_v10 = vshrl.u32 %v28_v9, 7 }
   0x3   :  { %63 = vmatpush1.bf16.msra.mxu0 %v128_v2  ;;  %v19_v6 = vld [vmem:[%s184_s1] sm:$0x3] }
   0x4   :  { %64 = vmatprep.subr.bf16.mxu0 %v129_v3  ;;  %v20_v7 = vmul.f32 %v19_v6, %v18_v4  ;;  %v30_v11 = vsub.s32 0, %v29_v10  ;;  %v26_v12 = vld [vmem:[%s185_s3] sm:$0x3]  ;;  %v34_v13 = vsub.s32 1, %v29_v10 }
   0x6   :  { %v21_v8 = vpack.c.bf16 %v20_v7, %v20_v7  ;;  %v31_v14 = vrot.slane %v26_v12, %v30_v11  ;;  %v35_v15 = vrot.slane %v26_v12, %v34_v13 }
   0x7   :  { %65 = vmatpush1.bf16.msra.mxu0 %v131_v5 }
   0xa   :  { %123 = vmatmul.mubr.msk.bf16.vlgmr.msra.gmra.mrb[0].mxu0 %vm58_vm0, %v21_v8 }
  0xdd   :  { %v96_v16 = vpop.f32.mrb[0].mxu0 }
  0xde   :  { %v97_v17 = vadd.f32 %v96_v16, %v31_v14  ;;  %v98_v18 = vpop.f32.mrb[1].mxu0 }
  0xdf   :  { %v99_v19 = vadd.f32 %v98_v18, %v35_v15  ;;  %v100_v20 = vpop.f32.mrb[2].mxu0 }
  0xe0   :  { %v101_v21 = vpop.f32.mrb[3].mxu0 }
  0xe1   :  { %v105_v22 = vcombine.low %v97_v17, %v99_v19 }
  0xe3   :  { %124 = vst.sshfl [vmem:[%s186_s4] sm:$0x33 pattern:$0x76325410] %v105_v22 }

// kernel: generator_forward.3
= control target key start
LH: loop header
LB: loop body
LE: loop exit
PB: predicated region body
PF: predicated region fallthrough
CT: control target
= control target key end

     0   :  { %vm73_vm0 = vcmask 261120   ;;  %v4573_v2 = vmov 0   ;;  %v2910_v20 = vmov 0.0   ;;  %vm2911_vm1 = vmmov 0   ;;  %s2913_s28 = smov 8   ;;  %s2914_s29 = smov 121   ;;  %s4553_s0 = inlined_call_operand.vmem [shape: f32[16,32], index: 0, kind: input, shape index: {}]   ;;  %s4554_s5 = inlined_call_operand.vmem [shape: f32[16,1], index: 5, kind: input, shape index: {}]   ;;  %s4555_s6 = inlined_call_operand.vmem [shape: f32[16,1], index: 6, kind: input, shape index: {}]   ;;  %s4556_s1 = inlined_call_operand.vmem [shape: bf16[32,128], index: 1, kind: input, shape index: {}]   ;;  %s4557_s3 = inlined_call_operand.vmem [shape: f32[9,128], index: 3, kind: input, shape index: {}]   ;;  %s4558_s7 = inlined_call_operand.vmem [shape: bf16[16,144], index: 7, kind: input, shape index: {}]   ;;  %s4559_s8 = inlined_call_operand.vmem [shape: f32[16,1], index: 8, kind: input, shape index: {}]   ;;  %s4560_s9 = inlined_call_operand.vmem [shape: f32[16,1], index: 9, kind: input, shape index: {}]   ;;  %s4561_s2 = inlined_call_operand.vmem [shape: bf16[128,512], index: 2, kind: input, shape index: {}]   ;;  %s4562_s10 = inlined_call_operand.vmem [shape: f32[16,1], index: 10, kind: input, shape index: {}]   ;;  %s4563_s4 = inlined_call_operand.vmem [shape: f32[9,512], index: 4, kind: input, shape index: {}]   ;;  %s4564_s11 = inlined_call_operand.vmem [shape: bf16[8,144], index: 11, kind: input, shape index: {}]   ;;  %s4565_s12 = inlined_call_operand.vmem [shape: f32[8,1], index: 12, kind: input, shape index: {}]   ;;  %s4566_s13 = inlined_call_operand.vmem [shape: f32[8,1], index: 13, kind: input, shape index: {}]   ;;  %s4567_s14 = inlined_call_operand.vmem [shape: f32[8,1], index: 14, kind: input, shape index: {}]   ;;  %s4568_s16 = inlined_call_operand.vmem [shape: f32[3,1], index: 16, kind: input, shape index: {}]   ;;  %s4569_s15 = inlined_call_operand.vmem [shape: bf16[3,72], index: 15, kind: input, shape index: {}]   ;;  %s4570_s17 = inlined_call_operand.vmem [shape: f32[3,512], index: 17, kind: output, shape index: {}]  }
   0x1   :  { %4633 = sst [smem:[#allocation33_spill]] %s4553_s0  ;;  %2595 = vset.pattern.permute.xlu1 %v4573_v2  ;;  %2594 = vset.pattern.permute.xlu0 %v4573_v2  ;;  %v71_v5 = vld [vmem:[%s4555_s6] sm:$0xff]  ;;  %v72_v18 = vld [vmem:[%s4555_s6 + $0x8] sm:$0xff]  ;;  %v186_v22 = vlaneseq  ;;  %s2915_s0 = smov 119   ;;  %vm289_vm2 = vcmask 1039360   ;;  %vm305_vm3 = vcmask 1031168  }
   0x2   :  { %4634 = sst [smem:[#allocation34_spill]] %s4554_s5  ;;  %s4635_s26 = sld [smem:[#allocation33_spill]]  ;;  %836 = vmatprep.mubr.bf16.mxu0 %v4573_v2  ;;  %v2836_v19 = vld [vmem:[%s4556_s1] sm:$0xff]   ;;  %2563 = vmatprep.subr.bf16.mxu1 %v2910_v20  ;;  %v2837_v21 = vld [vmem:[%s4556_s1 + $0x8] sm:$0xff]   ;;  %vm321_vm4 = vcmask 982016   ;;  %vm345_vm5 = vcmask 965632  }
   0x3   :  { %s4636_s30 = sld [smem:[#allocation34_spill]]  ;;  %2564 = vmatpush3.bf16.msra.mxu1 %v2836_v19  ;;  %2567 = vmatprep.mubr.msk.bf16.mxu1 %vm2911_vm1, %v2910_v20  ;;  %v187_v23 = vshrl.u32 %v186_v22, 7  ;;  %v57_v24 = vld [vmem:[%s4557_s3] sm:$0xff]  ;;  %s2912_s1 = smov 120   ;;  %v2512_v39 = vld [vmem:[%s4557_s3 + $0x8] ss:$0 sm:$0xff] }
   0x4   :  { %2565 = vmatprep.subr.bf16.mxu1 %v2910_v20  ;;  %s2917_s18 = smov 1   ;;  %s2918_s19 = smov 7   ;;  %vm361_vm6 = vcmask 916480   ;;  %vm509_vm7 = vcmask 130048   ;;  %vm377_vm8 = vcmask 908288   ;;  %vm393_vm9 = vcmask 900096  }
   0x5   :  { %v3065_v25 = vsub.s32 1, %v187_v23  ;;  %v3067_v26 = vsub.s32 2, %v187_v23  ;;  %v3069_v27 = vsub.s32 7, %v187_v23  ;;  %v3071_v28 = vsub.s32 0, %v187_v23  ;;  %s2919_s21 = smov 9   ;;  %s2920_s3 = smov 126  }
   0x6   :  { %v3077_v32 = vsub.s32 3, %v187_v23  ;;  %v3081_v35 = vsub.s32 5, %v187_v23  ;;  %v3086_v37 = vsub.s32 6, %v187_v23  ;;  %v3097_v61 = vsub.s32 4, %v187_v23  ;;  %s2921_s22 = smov 118   ;;  %s2922_s23 = smov 112  }
   0x7   :  { %2566 = vmatpush3.bf16.msra.mxu1 %v2837_v21  ;;  %v200_v29 = vrot.slane %v57_v24, %v3065_v25  ;;  %v261_v30 = vrot.slane %v57_v24, %v3069_v27  ;;  %v211_v31 = vrot.slane %v57_v24, %v3067_v26  ;;  %v189_v33 = vrot.slane %v57_v24, %v3071_v28  ;;  %s2923_s24 = smov 111   ;;  %s2924_s25 = smov 110  }
   0x8   :  { %v67_v0 = vld [vmem:[%s4635_s26] sm:$0xff]  ;;  %v68_v1 = vld [vmem:[%s4635_s26 + $0x8] sm:$0xff]  ;;  %513 = vmatprep.subr.bf16.mxu1 %v4573_v2  ;;  %v222_v34 = vrot.slane %v57_v24, %v3077_v32  ;;  %v239_v36 = vrot.slane %v57_v24, %v3081_v35  ;;  %v250_v38 = vrot.slane %v57_v24, %v3086_v37  ;;  %vm491_vm10 = vcmask 72704   ;;  %s2925_s5 = smov 113   ;;  %s2928_s26 = smov 17  }
   0x9   :  { %v70_v3 = vld [vmem:[%s4636_s30 + $0x8] sm:$0xff]  ;;  %v74_v4 = vsel %vm73_vm0, %v67_v0, 0.0  ;;  %v77_v6 = vsel %vm73_vm0, %v68_v1, 0.0  ;;  %v69_v7 = vld [vmem:[%s4636_s30] sm:$0xff]  ;;  %s2916_s30 = smov 127   ;;  %vm1008_vm13 = vcmask 924672  }
   0xa   :  { %108 = vperm.xlu1 %2595, %v70_v3   ;;  %75 = vadd.xlane.f32.xlu0 %v74_v4  ;;  %vm1123_vm14 = vcmask 7168   ;;  %vm1169_vm15 = vcmask 121856   ;;  %vm1617_vm1 = vcmask 769024  }
   0xe   :  { %115 = vperm.xlu1 %2595, %v71_v5   ;;  %78 = vadd.xlane.f32.xlu0 %v77_v6 }
  0x24   :  { %103 = vperm.xlu0 %2594, %v69_v7  }
  0x28   :  { %263 = vrot.lane.b32.xlu0 %v261_v30, %s2913_s28 }
  0x2c   :  { %191 = vrot.lane.b32.xlu0 %v189_v33, %s2915_s0 }
  0x89   :  { %v109_v40 = vpop.permute.xlu1 %108 }
  0x8d   :  { %v116_v41 = vpop.permute.xlu1 %115 }
  0x97   :  { %v76_v8 = vpop.xlane.xlu0 %75 }
  0x98   :  { %v81_v9 = vmul.f32 0.03125, %v76_v8 }
  0x9a   :  { %v3042_v10 = vsub.f32 %v67_v0, %v81_v9 }
  0x9b   :  { %v79_v11 = vpop.xlane.xlu0 %78 }
  0x9c   :  { %v82_v12 = vmul.f32 0.03125, %v79_v11  ;;  %v85_v13 = vmul.f32 %v3042_v10, %v3042_v10 }
  0x9e   :  { %v3046_v14 = vsub.f32 %v68_v1, %v82_v12  ;;  %v87_v15 = vsel %vm73_vm0, %v85_v13, 0.0  ;;  %v233_v1 = vrot.slane %v57_v24, %v3097_v61 }
  0x9f   :  { %88 = vadd.xlane.f32.xlu1 %v87_v15 }
  0xa0   :  { %v86_v16 = vmul.f32 %v3046_v14, %v3046_v14 }
  0xa2   :  { %v90_v17 = vsel %vm73_vm0, %v86_v16, 0.0 }
  0xa3   :  { %91 = vadd.xlane.f32.xlu1 %v90_v17  ;;  %v104_v50 = vpop.permute.xlu0 %103 }
  0xa7   :  { %v264_v62 = vpop.permute.xlu0 %263 }
  0xab   :  { %v192_v8 = vpop.permute.xlu0 %191 }
  0xb4   :  { %120 = vperm.xlu1 %2595, %v72_v18  }
  0xb8   :  { %202 = vrot.lane.b32.xlu1 %v200_v29, %s2912_s1 }
  0xbc   :  { %213 = vrot.lane.b32.xlu1 %v211_v31, %s2914_s29  ;;  %s2930_s29 = smov 95  }
  0xc0   :  { %224 = vrot.lane.b32.xlu1 %v222_v34, %s2916_s30 }
  0xc4   :  { %241 = vrot.lane.b32.xlu1 %v239_v36, %s2917_s18 }
  0xc8   :  { %252 = vrot.lane.b32.xlu1 %v250_v38, %s2918_s19 }
  0xcc   :  { %274 = vrot.lane.b32.xlu1 %v2512_v39, %s2919_s21  ;;  %v267_v39 = vmul.f32 0.0, %v264_v62 }
 0x12c   :  { %v89_v42 = vpop.xlane.xlu1 %88 }
 0x12d   :  { %v93_v43 = vmul.f32 0.03125, %v89_v42 }
 0x12f   :  { %v95_v44 = vadd.f32 1e-05, %v93_v43 }
 0x130   :  { %v92_v45 = vpop.xlane.xlu1 %91 }
 0x131   :  { %2891 = vrsqrt.f32 %v95_v44  ;;  %v94_v46 = vmul.f32 0.03125, %v92_v45 }
 0x133   :  { %v96_v47 = vadd.f32 1e-05, %v94_v46 }
 0x134   :  { %v121_v55 = vpop.permute.xlu1 %120 }
 0x135   :  { %2893 = vrsqrt.f32 %v96_v47 }
 0x138   :  { %v203_v59 = vpop.permute.xlu1 %202 }
 0x139   :  { %v205_v63 = vmul.f32 0.0, %v203_v59 }
 0x13b   :  { %v2892_v48 = vpop.eup %2891 }
 0x13c   :  { %v99_v49 = vmul.f32 %v2892_v48, %v3042_v10  ;;  %v214_v60 = vpop.permute.xlu1 %213  ;;  %v194_v48 = vmul.f32 0.0, %v192_v8 }
 0x13d   :  { %v216_v7 = vmul.f32 0.0, %v214_v60 }
 0x13e   :  { %v111_v53 = vmul.f32 %v104_v50, %v99_v49 }
 0x13f   :  { %v2894_v51 = vpop.eup %2893 }
 0x140   :  { %v100_v52 = vmul.f32 %v2894_v51, %v3046_v14  ;;  %v123_v57 = vadd.f32 %v116_v41, %v111_v53  ;;  %v225_v5 = vpop.permute.xlu1 %224  ;;  %v400_v51 = vpack.c.bf16 %v194_v48, %v194_v48 }
 0x141   :  { %v227_v15 = vmul.f32 0.0, %v225_v5 }
 0x142   :  { %v112_v54 = vmul.f32 %v109_v40, %v100_v52 }
 0x144   :  { %v124_v56 = vadd.f32 %v121_v55, %v112_v54  ;;  %v242_v22 = vpop.permute.xlu1 %241 }
 0x145   :  { %v245_v24 = vmul.f32 0.0, %v242_v22 }
 0x146   :  { %v125_v58 = vpack.c.bf16 %v124_v56, %v123_v57 }
 0x148   :  { %2568 = vmatmul.mubr.msk.bf16.vlgmr.msra.gmra.mrb[0].mxu1 %vm73_vm0, %v125_v58  ;;  %v253_v33 = vpop.permute.xlu1 %252  ;;  %vm1260_vm0 = vcmask 138240  }
 0x149   :  { %v256_v34 = vmul.f32 0.0, %v253_v33 }
 0x14c   :  { %v275_v43 = vpop.permute.xlu1 %274 }
 0x14d   :  { %v278_v44 = vmul.f32 0.0, %v275_v43 }
 0x21b   :  { %v179_v0 = vpop.f32.mrb[0].mxu1 }
 0x21c   :  { %v2569_v3 = vpop.f32.mrb[1].mxu1  ;;  %v206_v4 = vmul.f32 %v203_v59, %v179_v0  ;;  %v217_v12 = vmul.f32 %v214_v60, %v179_v0  ;;  %v234_v13 = vmul.f32 %v233_v1, %v179_v0  ;;  %v195_v16 = vmul.f32 %v192_v8, %v179_v0 }
 0x21d   :  { %v182_v6 = vpop.f32.mrb[2].mxu1  ;;  %v228_v20 = vmul.f32 %v225_v5, %v179_v0  ;;  %v244_v31 = vmul.f32 %v242_v22, %v179_v0  ;;  %v255_v38 = vmul.f32 %v253_v33, %v179_v0  ;;  %v266_v42 = vmul.f32 %v264_v62, %v179_v0 }
 0x21e   :  { %v2570_v9 = vpop.f32.mrb[3].mxu1  ;;  %v2596_v10 = vpack.i.bf16 %v206_v4, %v205_v63  ;;  %v207_v11 = vmul.f32 %v203_v59, %v182_v6  ;;  %v235_v14 = vmul.f32 %v233_v1, %v182_v6  ;;  %v2601_v18 = vpack.i.bf16 %v217_v12, %v216_v7 }
 0x21f   :  { %v218_v19 = vmul.f32 %v214_v60, %v182_v6  ;;  %v196_v21 = vmul.f32 %v192_v8, %v182_v6  ;;  %v2606_v29 = vpack.i.bf16 %v228_v20, %v227_v15  ;;  %v229_v30 = vmul.f32 %v225_v5, %v182_v6 }
 0x220   :  { %2597 = vrot.lane.b32.xlu1 %v2596_v10, %s2916_s30  ;;  %287 = vrot.lane.b32.xlu0 %v207_v11, %s2916_s30  ;;  %v2631_v17 = vpack.i.bf16 %v235_v14, %v234_v13  ;;  %v2611_v36 = vpack.i.bf16 %v245_v24, %v244_v31  ;;  %v246_v40 = vmul.f32 %v242_v22, %v182_v6 }
 0x221   :  { %v401_v23 = vpack.c.bf16 %v196_v21, %v195_v16  ;;  %v2616_v41 = vpack.i.bf16 %v256_v34, %v255_v38  ;;  %v257_v45 = vmul.f32 %v253_v33, %v182_v6  ;;  %v2621_v46 = vpack.i.bf16 %v267_v39, %v266_v42 }
 0x222   :  { %v277_v47 = vmul.f32 %v275_v43, %v179_v0  ;;  %v268_v49 = vmul.f32 %v264_v62, %v182_v6  ;;  %v279_v52 = vmul.f32 %v275_v43, %v182_v6 }
 0x224   :  { %2602 = vrot.lane.b32.xlu1 %v2601_v18, %s2920_s3  ;;  %303 = vrot.lane.b32.xlu0 %v218_v19, %s2920_s3  ;;  %v2626_v50 = vpack.i.bf16 %v278_v44, %v277_v47  ;;  %v2838_v44 = vld [vmem:[%s4558_s7 + $0x4] ss:$8 sps:$4 sm:$0xff]  }
 0x225   :  { %2515 = vmatprep.mubr.msk.bf16.mxu1 %vm509_vm7, %v2838_v44  ;;  %v2845_v44 = vld [vmem:[%s4561_s2 + $0xc] ss:$16 sps:$4 sm:$0xff]  }
 0x228   :  { %2607 = vrot.lane.b32.xlu1 %v2606_v29, %s2912_s1  ;;  %319 = vrot.lane.b32.xlu0 %v229_v30, %s2912_s1 }
 0x22c   :  { %2632 = vrot.lane.b32.xlu1 %v2631_v17, %s2915_s0  ;;  %2612 = vrot.lane.b32.xlu0 %v2611_v36, %s2921_s22 }
 0x230   :  { %343 = vrot.lane.b32.xlu1 %v246_v40, %s2921_s22  ;;  %2617 = vrot.lane.b32.xlu0 %v2616_v41, %s2922_s23 }
 0x234   :  { %359 = vrot.lane.b32.xlu1 %v257_v45, %s2922_s23  ;;  %2622 = vrot.lane.b32.xlu0 %v2621_v46, %s2923_s24 }
 0x238   :  { %375 = vrot.lane.b32.xlu1 %v268_v49, %s2923_s24  ;;  %2627 = vrot.lane.b32.xlu0 %v2626_v50, %s2924_s25 }
 0x23c   :  { %391 = vrot.lane.b32.xlu1 %v279_v52, %s2924_s25  ;;  %457 = vrot.lane.b32.xlu0 %v400_v51, %s2919_s21 }
 0x240   :  { %459 = vrot.lane.b32.xlu1 %v401_v23, %s2919_s21 }
 0x292   :  { %v2598_v53 = vpop.permute.xlu1 %2597  ;;  %v288_v54 = vpop.permute.xlu0 %287 }
 0x293   :  { %v2600_v55 = vunpack.i.h.bf16 %v2598_v53  ;;  %v2599_v56 = vunpack.i.l.bf16 %v2598_v53 }
 0x295   :  { %v291_v57 = vsel %vm289_vm2, %v2599_v56, %v288_v54  ;;  %v403_v58 = vpack.c.bf16 %v288_v54, %v2600_v55  ;;  %v290_v59 = vsel %vm289_vm2, %v2599_v56, %v2600_v55 }
 0x296   :  { %v2603_v60 = vpop.permute.xlu1 %2602  ;;  %v304_v62 = vpop.permute.xlu0 %303  ;;  %v402_v63 = vpack.c.bf16 %v291_v57, %v290_v59 }
 0x297   :  { %v2605_v0 = vunpack.i.h.bf16 %v2603_v60  ;;  %v2604_v1 = vunpack.i.l.bf16 %v2603_v60  ;;  %463 = vrot.lane.b32.xlu1 %v403_v58, %s2919_s21 }
 0x298   :  { %461 = vrot.lane.b32.xlu0 %v402_v63, %s2919_s21 }
 0x299   :  { %v307_v3 = vsel %vm305_vm3, %v2604_v1, %v304_v62  ;;  %v405_v4 = vpack.c.bf16 %v304_v62, %v2605_v0  ;;  %v306_v5 = vsel %vm305_vm3, %v2604_v1, %v2605_v0  ;;  %v419_v62 = vld [vmem:[%s4559_s8] sm:$0xff]  ;;  %v420_v0 = vld [vmem:[%s4559_s8 + $0x8] sm:$0xff] }
 0x29a   :  { %v2608_v6 = vpop.permute.xlu1 %2607  ;;  %v320_v7 = vpop.permute.xlu0 %319  ;;  %v404_v8 = vpack.c.bf16 %v307_v3, %v306_v5 }
 0x29b   :  { %v2610_v9 = vunpack.i.h.bf16 %v2608_v6  ;;  %v2609_v10 = vunpack.i.l.bf16 %v2608_v6  ;;  %467 = vrot.lane.b32.xlu1 %v405_v4, %s2919_s21 }
 0x29c   :  { %465 = vrot.lane.b32.xlu0 %v404_v8, %s2919_s21 }
 0x29d   :  { %v323_v11 = vsel %vm321_vm4, %v2609_v10, %v320_v7  ;;  %v407_v12 = vpack.c.bf16 %v320_v7, %v2610_v9  ;;  %v322_v13 = vsel %vm321_vm4, %v2609_v10, %v2610_v9  ;;  %vm1525_vm4 = vcmask 785408  }
 0x29e   :  { %v2633_v14 = vpop.permute.xlu1 %2632  ;;  %v2613_v15 = vpop.permute.xlu0 %2612  ;;  %v406_v16 = vpack.c.bf16 %v323_v11, %v322_v13 }
 0x29f   :  { %v2635_v17 = vunpack.i.h.bf16 %v2633_v14  ;;  %v2634_v18 = vunpack.i.l.bf16 %v2633_v14  ;;  %471 = vrot.lane.b32.xlu1 %v407_v12, %s2919_s21  ;;  %v2615_v19 = vunpack.i.h.bf16 %v2613_v15  ;;  %v2614_v20 = vunpack.i.l.bf16 %v2613_v15 }
 0x2a0   :  { %469 = vrot.lane.b32.xlu0 %v406_v16, %s2919_s21 }
 0x2a1   :  { %v408_v21 = vpack.c.bf16 %v2635_v17, %v2634_v18  ;;  %v346_v33 = vsel %vm345_vm5, %v2614_v20, %v2615_v19 }
 0x2a2   :  { %v344_v22 = vpop.permute.xlu1 %343  ;;  %v2618_v23 = vpop.permute.xlu0 %2617 }
 0x2a3   :  { %v347_v24 = vsel %vm345_vm5, %v344_v22, %v2615_v19  ;;  %v409_v29 = vpack.c.bf16 %v344_v22, %v2614_v20  ;;  %v2620_v30 = vunpack.i.h.bf16 %v2618_v23  ;;  %v2619_v31 = vunpack.i.l.bf16 %v2618_v23 }
 0x2a4   :  { %473 = vrot.lane.b32.xlu0 %v408_v21, %s2919_s21  ;;  %v410_v38 = vpack.c.bf16 %v347_v24, %v346_v33  ;;  %v2840_v24 = vld [vmem:[%s4558_s7] ss:$8 sps:$4 sm:$0xff]   ;;  %vm1571_vm5 = vcmask 777216  }
 0x2a5   :  { %475 = vrot.lane.b32.xlu1 %v409_v29, %s2919_s21  ;;  %v362_v43 = vsel %vm361_vm6, %v2619_v31, %v2620_v30 }
 0x2a6   :  { %v360_v34 = vpop.permute.xlu1 %359  ;;  %v2623_v36 = vpop.permute.xlu0 %2622 }
 0x2a7   :  { %v363_v39 = vsel %vm361_vm6, %v360_v34, %v2620_v30  ;;  %v411_v40 = vpack.c.bf16 %v360_v34, %v2619_v31  ;;  %v2625_v41 = vunpack.i.h.bf16 %v2623_v36  ;;  %v2624_v42 = vunpack.i.l.bf16 %v2623_v36 }
 0x2a8   :  { %477 = vrot.lane.b32.xlu0 %v410_v38, %s2919_s21  ;;  %v412_v47 = vpack.c.bf16 %v363_v39, %v362_v43  ;;  %v2843_v43 = vld [vmem:[%s4561_s2 + $0x8] ss:$16 sps:$4 sm:$0xff]  }
 0x2a9   :  { %479 = vrot.lane.b32.xlu1 %v411_v40, %s2919_s21  ;;  %v378_v52 = vsel %vm377_vm8, %v2624_v42, %v2625_v41  ;;  %v555_v40 = vld [vmem:[%s4560_s9 + $0x8] sm:$0xff] }
 0x2aa   :  { %v376_v45 = vpop.permute.xlu1 %375  ;;  %v2628_v46 = vpop.permute.xlu0 %2627 }
 0x2ab   :  { %v379_v48 = vsel %vm377_vm8, %v376_v45, %v2625_v41  ;;  %v413_v49 = vpack.c.bf16 %v376_v45, %v2624_v42  ;;  %v2630_v50 = vunpack.i.h.bf16 %v2628_v46  ;;  %v2629_v51 = vunpack.i.l.bf16 %v2628_v46  ;;  %v554_v41 = vld [vmem:[%s4560_s9] sm:$0xff]  ;;  %s2931_s9 = smov 94  }
 0x2ac   :  { %481 = vrot.lane.b32.xlu0 %v412_v47, %s2919_s21  ;;  %v414_v54 = vpack.c.bf16 %v379_v48, %v378_v52  ;;  %v2841_v42 = vld [vmem:[%s4561_s2 + $0x4] ss:$16 sps:$4 sm:$0xff]   ;;  %v2846_v45 = vld [vmem:[%s4561_s2] ss:$16 sps:$4 sm:$0xff]  }
 0x2ad   :  { %483 = vrot.lane.b32.xlu1 %v413_v49, %s2919_s21  ;;  %v394_v58 = vsel %vm393_vm9, %v2629_v51, %v2630_v50  ;;  %804 = vmatprep.subr.bf16.mxu0 %v2841_v42 }
 0x2ae   :  { %v392_v53 = vpop.permute.xlu1 %391  ;;  %v458_v57 = vpop.permute.xlu0 %457  ;;  %805 = vmatpush1.bf16.msra.mxu0 %v2846_v45 }
 0x2af   :  { %v395_v55 = vsel %vm393_vm9, %v392_v53, %v2630_v50  ;;  %v415_v56 = vpack.c.bf16 %v392_v53, %v2629_v51 }
 0x2b0   :  { %485 = vrot.lane.b32.xlu0 %v414_v54, %s2919_s21  ;;  %v416_v60 = vpack.c.bf16 %v395_v55, %v394_v58  ;;  %v556_v54 = vld [vmem:[%s4562_s10] sm:$0xff] }
 0x2b1   :  { %487 = vrot.lane.b32.xlu1 %v415_v56, %s2919_s21  ;;  %v2847_v55 = vld [vmem:[%s4561_s2 + $0x24] ss:$16 sps:$4 sm:$0xff]   ;;  %v2851_v56 = vld [vmem:[%s4561_s2 + $0x2c] ss:$16 sps:$4 sm:$0xff]   ;;  %v2852_v58 = vld [vmem:[%s4561_s2 + $0x20] ss:$16 sps:$4 sm:$0xff]  }
 0x2b2   :  { %v460_v59 = vpop.permute.xlu1 %459  ;;  %806 = vmatprep.subr.bf16.mxu0 %v2847_v55  ;;  %v2548_v55 = vld [vmem:[%s4563_s4 + $0x20] ss:$0 sm:$0xff] }
 0x2b3   :  { %v492_v63 = vsel %vm491_vm10, %v458_v57, %v460_v59  ;;  %v2849_v57 = vld [vmem:[%s4561_s2 + $0x28] ss:$16 sps:$4 sm:$0xff]   ;;  %807 = vmatpush1.bf16.msra.mxu0 %v2852_v58 }
 0x2b4   :  { %514 = vmatpush1.bf16.msra.mxu1 %v492_v63  ;;  %489 = vrot.lane.b32.xlu0 %v416_v60, %s2919_s21  ;;  %v557_v59 = vld [vmem:[%s4562_s10 + $0x8] sm:$0xff]  ;;  %v2853_v60 = vld [vmem:[%s4561_s2 + $0x44] ss:$16 sps:$4 sm:$0xff]   ;;  %s2926_s10 = smov 15  }
 0x2b5   :  { %423 = vperm.xlu1 %2595, %v419_v62   ;;  %515 = vmatprep.subr.bf16.mxu1 %v4573_v2  ;;  %v2857_v62 = vld [vmem:[%s4561_s2 + $0x4c] ss:$16 sps:$4 sm:$0xff]   ;;  %v2855_v63 = vld [vmem:[%s4561_s2 + $0x48] ss:$16 sps:$4 sm:$0xff]  }
 0x2b6   :  { %808 = vmatprep.subr.bf16.mxu0 %v2853_v60 }
 0x2b8   :  { %428 = vperm.xlu0 %2594, %v420_v0   ;;  %v2858_v0 = vld [vmem:[%s4561_s2 + $0x40] ss:$16 sps:$4 sm:$0xff]  }
 0x2b9   :  { %809 = vmatpush1.bf16.msra.mxu0 %v2858_v0 }
 0x309   :  { %v464_v1 = vpop.permute.xlu1 %463 }
 0x30a   :  { %v462_v3 = vpop.permute.xlu0 %461 }
 0x30b   :  { %v493_v4 = vsel %vm491_vm10, %v462_v3, %v464_v1  ;;  %v2859_v1 = vld [vmem:[%s4561_s2 + $0x64] ss:$16 sps:$4 sm:$0xff]   ;;  %v2863_v3 = vld [vmem:[%s4561_s2 + $0x6c] ss:$16 sps:$4 sm:$0xff]  }
 0x30c   :  { %516 = vmatpush1.bf16.msra.mxu1 %v493_v4  ;;  %v2861_v4 = vld [vmem:[%s4561_s2 + $0x68] ss:$16 sps:$4 sm:$0xff]   ;;  %810 = vmatprep.subr.bf16.mxu0 %v2859_v1 }
 0x30d   :  { %v468_v5 = vpop.permute.xlu1 %467  ;;  %517 = vmatprep.subr.bf16.mxu1 %v4573_v2 }
 0x30e   :  { %v466_v6 = vpop.permute.xlu0 %465 }
 0x30f   :  { %v494_v7 = vsel %vm491_vm10, %v466_v6, %v468_v5  ;;  %v2864_v5 = vld [vmem:[%s4561_s2 + $0x60] ss:$16 sps:$4 sm:$0xff]   ;;  %v2865_v6 = vld [vmem:[%s4561_s2 + $0x84] ss:$16 sps:$4 sm:$0xff]  }
 0x310   :  { %518 = vmatpush1.bf16.msra.mxu1 %v494_v7  ;;  %811 = vmatpush1.bf16.msra.mxu0 %v2864_v5  ;;  %v2869_v7 = vld [vmem:[%s4561_s2 + $0x8c] ss:$16 sps:$4 sm:$0xff]  }
 0x311   :  { %v472_v8 = vpop.permute.xlu1 %471  ;;  %519 = vmatprep.subr.bf16.mxu1 %v4573_v2  ;;  %812 = vmatprep.subr.bf16.mxu0 %v2865_v6 }
 0x312   :  { %v470_v9 = vpop.permute.xlu0 %469 }
 0x313   :  { %v495_v10 = vsel %vm491_vm10, %v470_v9, %v472_v8  ;;  %v2867_v8 = vld [vmem:[%s4561_s2 + $0x88] ss:$16 sps:$4 sm:$0xff]   ;;  %v2870_v9 = vld [vmem:[%s4561_s2 + $0x80] ss:$16 sps:$4 sm:$0xff]  }
 0x314   :  { %520 = vmatpush1.bf16.msra.mxu1 %v495_v10  ;;  %813 = vmatpush1.bf16.msra.mxu0 %v2870_v9  ;;  %v2871_v10 = vld [vmem:[%s4561_s2 + $0xa4] ss:$16 sps:$4 sm:$0xff]  }
 0x315   :  { %521 = vmatprep.subr.bf16.mxu1 %v4573_v2  ;;  %814 = vmatprep.subr.bf16.mxu0 %v2871_v10 }
 0x316   :  { %v474_v11 = vpop.permute.xlu0 %473 }
 0x317   :  { %v476_v12 = vpop.permute.xlu1 %475 }
 0x318   :  { %522 = vmatpush1.bf16.msra.mxu1 %v474_v11  ;;  %v2875_v11 = vld [vmem:[%s4561_s2 + $0xac] ss:$16 sps:$4 sm:$0xff]  }
 0x319   :  { %523 = vmatprep.subr.bf16.mxu1 %v4573_v2 }
 0x31a   :  { %v478_v13 = vpop.permute.xlu0 %477 }
 0x31b   :  { %v496_v14 = vsel %vm491_vm10, %v476_v12, %v478_v13  ;;  %v480_v15 = vpop.permute.xlu1 %479  ;;  %v2873_v12 = vld [vmem:[%s4561_s2 + $0xa8] ss:$16 sps:$4 sm:$0xff]   ;;  %v2876_v13 = vld [vmem:[%s4561_s2 + $0xa0] ss:$16 sps:$4 sm:$0xff]  }
 0x31c   :  { %524 = vmatpush1.bf16.msra.mxu1 %v496_v14  ;;  %815 = vmatpush1.bf16.msra.mxu0 %v2876_v13  ;;  %v2877_v14 = vld [vmem:[%s4561_s2 + $0xc4] ss:$16 sps:$4 sm:$0xff]  }
 0x31d   :  { %525 = vmatprep.subr.bf16.mxu1 %v4573_v2  ;;  %816 = vmatprep.subr.bf16.mxu0 %v2877_v14 }
 0x31e   :  { %v482_v16 = vpop.permute.xlu0 %481 }
 0x31f   :  { %v497_v17 = vsel %vm491_vm10, %v480_v15, %v482_v16  ;;  %v484_v18 = vpop.permute.xlu1 %483  ;;  %v2879_v15 = vld [vmem:[%s4561_s2 + $0xc8] ss:$16 sps:$4 sm:$0xff]   ;;  %v2881_v16 = vld [vmem:[%s4561_s2 + $0xcc] ss:$16 sps:$4 sm:$0xff]  }
 0x320   :  { %526 = vmatpush1.bf16.msra.mxu1 %v497_v17  ;;  %v2882_v17 = vld [vmem:[%s4561_s2 + $0xc0] ss:$16 sps:$4 sm:$0xff]  }
 0x321   :  { %527 = vmatprep.subr.bf16.mxu1 %v4573_v2  ;;  %817 = vmatpush1.bf16.msra.mxu0 %v2882_v17 }
 0x322   :  { %v486_v19 = vpop.permute.xlu0 %485 }
 0x323   :  { %v498_v20 = vsel %vm491_vm10, %v484_v18, %v486_v19  ;;  %v488_v21 = vpop.permute.xlu1 %487  ;;  %v2883_v18 = vld [vmem:[%s4561_s2 + $0xe4] ss:$16 sps:$4 sm:$0xff]   ;;  %v2887_v19 = vld [vmem:[%s4561_s2 + $0xec] ss:$16 sps:$4 sm:$0xff]  }
 0x324   :  { %528 = vmatpush1.bf16.msra.mxu1 %v498_v20  ;;  %v2888_v20 = vld [vmem:[%s4561_s2 + $0xe0] ss:$16 sps:$4 sm:$0xff]   ;;  %818 = vmatprep.subr.bf16.mxu0 %v2883_v18 }
 0x325   :  { %529 = vmatprep.subr.bf16.mxu1 %v4573_v2  ;;  %819 = vmatpush1.bf16.msra.mxu0 %v2888_v20 }
 0x326   :  { %v490_v22 = vpop.permute.xlu0 %489 }
 0x327   :  { %v499_v23 = vsel %vm491_vm10, %v488_v21, %v490_v22  ;;  %v2885_v21 = vld [vmem:[%s4561_s2 + $0xe8] ss:$16 sps:$4 sm:$0xff]  }
 0x328   :  { %530 = vmatpush1.bf16.msra.mxu1 %v499_v23  ;;  %v3289_v22 = vld [vmem:[%s4563_s4 + $0x8] sm:$0xff]  ;;  %v3294_v23 = vld [vmem:[%s4563_s4] sm:$0xff] }
 0x329   :  { %847 = vmatprep.subr.bf16.mxu1 %v2845_v44  ;;  %v1098_v44 = vrot.slane %v3294_v23, %v3081_v35  ;;  %v893_v58 = vrot.slane %v3294_v23, %v3071_v28 }
 0x32b   :  { %546 = vmatmul.mubr.bf16.vlgmr.msra.gmra.mrb[4].mxu1 %v2840_v24  ;;  %v3299_v24 = vld [vmem:[%s4563_s4 + $0x18] sm:$0xff] }
 0x32c   :  { %879 = vmatprep.mubr.bf16.mxu1 %v4573_v2  ;;  %848 = vmatpush1.bf16.msra.mxu1 %v2843_v43  ;;  %v1041_v42 = vrot.slane %v3299_v24, %v3077_v32  ;;  %v1110_v45 = vrot.slane %v3299_v24, %v3081_v35 }
 0x32d   :  { %849 = vmatprep.subr.bf16.mxu1 %v2851_v56  ;;  %v2551_v56 = vld [vmem:[%s4563_s4 + $0x38] ss:$0 sm:$0xff] }
 0x330   :  { %850 = vmatpush1.bf16.msra.mxu1 %v2849_v57  ;;  %v897_v57 = vrot.slane %v3289_v22, %v3071_v28 }
 0x331   :  { %851 = vmatprep.subr.bf16.mxu1 %v2857_v62 }
 0x334   :  { %v424_v29 = vpop.permute.xlu1 %423  ;;  %852 = vmatpush1.bf16.msra.mxu1 %v2855_v63 }
 0x335   :  { %853 = vmatprep.subr.bf16.mxu1 %v2863_v3 }
 0x337   :  { %v429_v34 = vpop.permute.xlu0 %428 }
 0x338   :  { %854 = vmatpush1.bf16.msra.mxu1 %v2861_v4 }
 0x339   :  { %855 = vmatprep.subr.bf16.mxu1 %v2869_v7 }
 0x33c   :  { %856 = vmatpush1.bf16.msra.mxu1 %v2867_v8 }
 0x33d   :  { %857 = vmatprep.subr.bf16.mxu1 %v2875_v11 }
 0x340   :  { %858 = vmatpush1.bf16.msra.mxu1 %v2873_v12 }
 0x341   :  { %859 = vmatprep.subr.bf16.mxu1 %v2881_v16 }
 0x344   :  { %860 = vmatpush1.bf16.msra.mxu1 %v2879_v15 }
 0x345   :  { %861 = vmatprep.subr.bf16.mxu1 %v2887_v19 }
 0x348   :  { %862 = vmatpush1.bf16.msra.mxu1 %v2885_v21 }
 0x3fe   :  { %v547_v30 = vpop.f32.mrb[4].mxu1 }
 0x3ff   :  { %v548_v31 = vadd.f32 %v547_v30, %v424_v29  ;;  %v549_v33 = vpop.f32.mrb[5].mxu1  ;;  %v942_v29 = vrot.slane %v3289_v22, %v3065_v25  ;;  %v938_v30 = vrot.slane %v3294_v23, %v3065_v25 }
 0x400   :  { %v550_v36 = vpop.f32.mrb[6].mxu1  ;;  %v950_v33 = vrot.slane %v3299_v24, %v3065_v25 }
 0x401   :  { %v551_v38 = vadd.f32 %v550_v36, %v429_v34  ;;  %v552_v39 = vpop.f32.mrb[7].mxu1  ;;  %558 = vadd.xlane.f32.xlu1 %v548_v31  ;;  %v987_v36 = vrot.slane %v3289_v22, %v3067_v26 }
 0x402   :  { %v995_v39 = vrot.slane %v3299_v24, %v3067_v26 }
 0x403   :  { %560 = vadd.xlane.f32.xlu0 %v551_v38 }
 0x412   :  { %588 = vperm.xlu1 %2595, %v555_v40  }
 0x419   :  { %583 = vperm.xlu0 %2594, %v554_v41   ;;  %v1029_v41 = vrot.slane %v3294_v23, %v3077_v32 }
 0x48e   :  { %v559_v46 = vpop.xlane.xlu1 %558 }
 0x48f   :  { %v563_v47 = vmul.f32 0.0078125, %v559_v46  ;;  %v1148_v46 = vrot.slane %v3289_v22, %v3086_v37 }
 0x490   :  { %v561_v48 = vpop.xlane.xlu0 %560 }
 0x491   :  { %v564_v49 = vmul.f32 0.0078125, %v561_v48  ;;  %v3188_v50 = vsub.f32 %v548_v31, %v563_v47  ;;  %v3308_v31 = vld [vmem:[%s4563_s4 + $0x10] sm:$0xff]  ;;  %v1144_v47 = vrot.slane %v3294_v23, %v3086_v37  ;;  %v1156_v48 = vrot.slane %v3299_v24, %v3086_v37 }
 0x492   :  { %v946_v34 = vrot.slane %v3308_v31, %v3065_v25  ;;  %v991_v40 = vrot.slane %v3308_v31, %v3067_v26  ;;  %v1033_v25 = vrot.slane %v3289_v22, %v3077_v32  ;;  %v1037_v43 = vrot.slane %v3308_v31, %v3077_v32  ;;  %v589_v63 = vpop.permute.xlu1 %588 }
 0x493   :  { %v567_v51 = vmul.f32 %v3188_v50, %v3188_v50  ;;  %v3192_v52 = vsub.f32 %v551_v38, %v564_v49  ;;  %v983_v38 = vrot.slane %v3294_v23, %v3067_v26  ;;  %v1102_v26 = vrot.slane %v3289_v22, %v3081_v35 }
 0x494   :  { %v1106_v32 = vrot.slane %v3308_v31, %v3081_v35  ;;  %v1152_v49 = vrot.slane %v3308_v31, %v3086_v37  ;;  %v1194_v35 = vrot.slane %v3289_v22, %v3069_v27  ;;  %v2549_v37 = vld [vmem:[%s4563_s4 + $0x28] ss:$0 sm:$0xff]  ;;  %v901_v60 = vrot.slane %v3308_v31, %v3071_v28 }
 0x495   :  { %569 = vadd.xlane.f32.xlu0 %v567_v51  ;;  %v568_v53 = vmul.f32 %v3192_v52, %v3192_v52  ;;  %v1190_v51 = vrot.slane %v3294_v23, %v3069_v27 }
 0x497   :  { %571 = vadd.xlane.f32.xlu1 %v568_v53  ;;  %v1202_v53 = vrot.slane %v3299_v24, %v3069_v27 }
 0x498   :  { %v584_v62 = vpop.permute.xlu0 %583 }
 0x4a8   :  { %595 = vperm.xlu1 %2595, %v556_v54   ;;  %v1198_v54 = vrot.slane %v3308_v31, %v3069_v27  ;;  %v2550_v27 = vld [vmem:[%s4563_s4 + $0x30] ss:$0 sm:$0xff]  ;;  %s2929_s4 = smov 96  }
 0x4ab   :  { %600 = vperm.xlu0 %2594, %v557_v59   ;;  %v905_v59 = vrot.slane %v3299_v24, %v3071_v28 }
 0x4ac   :  { %955 = vrot.lane.b32.xlu1 %v938_v30, %s2922_s23 }
 0x4af   :  { %957 = vrot.lane.b32.xlu0 %v942_v29, %s2922_s23 }
 0x4b0   :  { %959 = vrot.lane.b32.xlu1 %v946_v34, %s2922_s23 }
 0x4b3   :  { %961 = vrot.lane.b32.xlu0 %v950_v33, %s2922_s23 }
 0x4b4   :  { %1000 = vrot.lane.b32.xlu1 %v983_v38, %s2925_s5 }
 0x4b7   :  { %1002 = vrot.lane.b32.xlu0 %v987_v36, %s2925_s5 }
 0x4b8   :  { %1004 = vrot.lane.b32.xlu1 %v991_v40, %s2925_s5 }
 0x4bb   :  { %1006 = vrot.lane.b32.xlu0 %v995_v39, %s2925_s5 }
 0x4bc   :  { %1046 = vrot.lane.b32.xlu1 %v1029_v41, %s2916_s30 }
 0x4bf   :  { %1048 = vrot.lane.b32.xlu0 %v1033_v25, %s2916_s30 }
 0x4c0   :  { %1050 = vrot.lane.b32.xlu1 %v1037_v43, %s2916_s30 }
 0x4c3   :  { %1052 = vrot.lane.b32.xlu0 %v1041_v42, %s2916_s30 }
 0x4c4   :  { %1115 = vrot.lane.b32.xlu1 %v1098_v44, %s2917_s18 }
 0x4c7   :  { %1117 = vrot.lane.b32.xlu0 %v1102_v26, %s2917_s18 }
 0x4c8   :  { %1119 = vrot.lane.b32.xlu1 %v1106_v32, %s2917_s18 }
 0x4cb   :  { %1121 = vrot.lane.b32.xlu0 %v1110_v45, %s2917_s18  ;;  %s2927_s18 = smov 16  }
 0x4cc   :  { %1161 = vrot.lane.b32.xlu1 %v1144_v47, %s2926_s10 }
 0x4cf   :  { %1163 = vrot.lane.b32.xlu0 %v1148_v46, %s2926_s10 }
 0x4d0   :  { %1165 = vrot.lane.b32.xlu1 %v1152_v49, %s2926_s10 }
 0x4d3   :  { %1167 = vrot.lane.b32.xlu0 %v1156_v48, %s2926_s10 }
 0x4d4   :  { %1207 = vrot.lane.b32.xlu1 %v1190_v51, %s2927_s18 }
 0x4d7   :  { %1209 = vrot.lane.b32.xlu0 %v1194_v35, %s2927_s18 }
 0x4d8   :  { %1211 = vrot.lane.b32.xlu1 %v1198_v54, %s2927_s18 }
 0x4db   :  { %1213 = vrot.lane.b32.xlu0 %v1202_v53, %s2927_s18 }
 0x4dc   :  { %1252 = vrot.lane.b32.xlu1 %v2548_v55, %s2928_s26 }
 0x4df   :  { %1254 = vrot.lane.b32.xlu0 %v2549_v37, %s2928_s26 }
 0x4e0   :  { %1256 = vrot.lane.b32.xlu1 %v2550_v27, %s2928_s26 }
 0x4e3   :  { %1258 = vrot.lane.b32.xlu0 %v2551_v56, %s2928_s26 }
 0x4e4   :  { %910 = vrot.lane.b32.xlu1 %v893_v58, %s2923_s24 }
 0x4e7   :  { %912 = vrot.lane.b32.xlu0 %v897_v57, %s2923_s24 }
 0x4e8   :  { %914 = vrot.lane.b32.xlu1 %v901_v60, %s2923_s24 }
 0x4eb   :  { %916 = vrot.lane.b32.xlu0 %v905_v59, %s2923_s24 }
 0x522   :  { %v570_v0 = vpop.xlane.xlu0 %569 }
 0x523   :  { %v573_v1 = vmul.f32 0.0078125, %v570_v0 }
 0x524   :  { %v572_v3 = vpop.xlane.xlu1 %571 }
 0x525   :  { %v575_v4 = vadd.f32 1e-05, %v573_v1  ;;  %v574_v5 = vmul.f32 0.0078125, %v572_v3  ;;  %v3447_v3 = vrot.slane %v3294_v23, %v3097_v61 }
 0x527   :  { %2895 = vrsqrt.f32 %v575_v4  ;;  %v576_v6 = vadd.f32 1e-05, %v574_v5  ;;  %4651 = vst [vmem:[#allocation16_spill] sm:$0xff] %v3447_v3 }
 0x528   :  { %v596_v11 = vpop.permute.xlu1 %595 }
 0x529   :  { %2897 = vrsqrt.f32 %v576_v6 }
 0x52a   :  { %v601_v14 = vpop.permute.xlu0 %600 }
 0x52c   :  { %v956_v18 = vpop.permute.xlu1 %955 }
 0x52d   :  { %v971_v27 = vmul.f32 0.0, %v956_v18 }
 0x52e   :  { %v958_v45 = vpop.permute.xlu0 %957 }
 0x52f   :  { %v3425_v57 = vsel %vm361_vm6, %v956_v18, %v958_v45 }
 0x530   :  { %4645 = vst [vmem:[#allocation10_spill] sm:$0xff] %v3425_v57 }
 0x531   :  { %v2896_v7 = vpop.eup %2895 }
 0x532   :  { %v579_v8 = vmul.f32 %v2896_v7, %v3188_v50  ;;  %v960_v50 = vpop.permute.xlu1 %959  ;;  %v3414_v32 = vpop.permute.xlu0 %961 }
 0x533   :  { %v2898_v9 = vpop.eup %2897  ;;  %4642 = vst [vmem:[#allocation7_spill] sm:$0xff] %v3414_v32  ;;  %v3428_v58 = vsel %vm361_vm6, %v958_v45, %v960_v50  ;;  %v3432_v59 = vsel %vm361_vm6, %v960_v50, %v3414_v32 }
 0x534   :  { %v591_v10 = vmul.f32 %v584_v62, %v579_v8  ;;  %v580_v28 = vmul.f32 %v2898_v9, %v3192_v52  ;;  %4646 = vst [vmem:[#allocation11_spill] sm:$0xff] %v3428_v58  ;;  %4647 = vst [vmem:[#allocation12_spill] sm:$0xff] %v3432_v59 }
 0x536   :  { %v603_v12 = vadd.f32 %v596_v11, %v591_v10  ;;  %v592_v13 = vmul.f32 %v589_v63, %v580_v28  ;;  %v1001_v29 = vpop.permute.xlu1 %1000  ;;  %v1003_v46 = vpop.permute.xlu0 %1002  ;;  %v3477_v28 = vrot.slane %v3289_v22, %v3097_v61 }
 0x537   :  { %v3434_v60 = vmul.f32 0.0, %v1001_v29  ;;  %v3436_v62 = vsel %vm1008_vm13, %v1001_v29, %v1003_v46 }
 0x538   :  { %v607_v15 = vmul.f32 0.2, %v603_v12  ;;  %v604_v16 = vadd.f32 %v601_v14, %v592_v13  ;;  %vm605_vm11 = vcmp.ge.f32.partialorder %v603_v12, 0.0  ;;  %4648 = vst [vmem:[#allocation13_spill] sm:$0xff] %v3436_v62  ;;  %4659 = vst [vmem:[#allocation24_spill] sm:$0xff] %v3477_v28 }
 0x53a   :  { %vm606_vm12 = vcmp.ge.f32.partialorder %v604_v16, 0.0  ;;  %v608_v17 = vmul.f32 0.2, %v604_v16  ;;  %v609_v19 = vsel %vm605_vm11, %v603_v12, %v607_v15  ;;  %v1005_v30 = vpop.permute.xlu1 %1004  ;;  %v3416_v47 = vpop.permute.xlu0 %1006 }
 0x53b   :  { %4643 = vst [vmem:[#allocation8_spill] sm:$0xff] %v3416_v47  ;;  %v3438_v63 = vsel %vm1008_vm13, %v1003_v46, %v1005_v30  ;;  %v3441_v0 = vsel %vm1008_vm13, %v1005_v30, %v3416_v47 }
 0x53c   :  { %v610_v20 = vsel %vm606_vm12, %v604_v16, %v608_v17  ;;  %4649 = vst [vmem:[#allocation14_spill] sm:$0xff] %v3438_v63  ;;  %4650 = vst [vmem:[#allocation15_spill] sm:$0xff] %v3441_v0 }
 0x53d   :  { %v611_v21 = vpack.c.bf16 %v610_v20, %v609_v19 }
 0x53e   :  { %v1047_v33 = vpop.permute.xlu1 %1046  ;;  %v1049_v48 = vpop.permute.xlu0 %1048 }
 0x53f   :  { %837 = vmatmul.mubr.bf16.vlgmr.msra.gmra.mrb[0].mxu0 %v611_v21  ;;  %880 = vmatmul.mubr.bf16.vlgmr.msra.gmra.mrb[8].mxu1 %v611_v21  ;;  %v3443_v1 = vmul.f32 0.0, %v1047_v33  ;;  %v3450_v4 = vsel %vm289_vm2, %v1047_v33, %v1049_v48 }
 0x540   :  { %4652 = vst [vmem:[#allocation17_spill] sm:$0xff] %v3450_v4 }
 0x542   :  { %v1051_v52 = vpop.permute.xlu1 %1050  ;;  %v3418_v49 = vpop.permute.xlu0 %1052 }
 0x543   :  { %4644 = vst [vmem:[#allocation9_spill] sm:$0xff] %v3418_v49  ;;  %v3453_v5 = vsel %vm289_vm2, %v1049_v48, %v1051_v52  ;;  %v3457_v6 = vsel %vm289_vm2, %v1051_v52, %v3418_v49 }
 0x544   :  { %4653 = vst [vmem:[#allocation18_spill] sm:$0xff] %v3453_v5  ;;  %4654 = vst [vmem:[#allocation19_spill] sm:$0xff] %v3457_v6 }
 0x546   :  { %v3396_v34 = vpop.permute.xlu1 %1115  ;;  %v1118_v35 = vpop.permute.xlu0 %1117 }
 0x547   :  { %4637 = vst [vmem:[#allocation2_spill] sm:$0xff] %v3396_v34  ;;  %v3461_v7 = vsel %vm1123_vm14, %v3396_v34, %v1118_v35 }
 0x548   :  { %4655 = vst [vmem:[#allocation20_spill] sm:$0xff] %v3461_v7 }
 0x54a   :  { %v1120_v36 = vpop.permute.xlu1 %1119  ;;  %v1122_v51 = vpop.permute.xlu0 %1121 }
 0x54b   :  { %v3466_v9 = vsel %vm1123_vm14, %v1118_v35, %v1120_v36  ;;  %v3469_v23 = vsel %vm1123_vm14, %v1120_v36, %v1122_v51 }
 0x54c   :  { %4657 = vst [vmem:[#allocation22_spill] sm:$0xff] %v3466_v9  ;;  %4658 = vst [vmem:[#allocation23_spill] sm:$0xff] %v3469_v23 }
 0x54e   :  { %v3398_v38 = vpop.permute.xlu1 %1161  ;;  %v1164_v53 = vpop.permute.xlu0 %1163 }
 0x54f   :  { %4638 = vst [vmem:[#allocation3_spill] sm:$0xff] %v3398_v38  ;;  %v3473_v10 = vsel %vm1169_vm15, %v3398_v38, %v1164_v53 }
 0x552   :  { %v1166_v39 = vpop.permute.xlu1 %1165  ;;  %v3420_v54 = vpop.permute.xlu0 %1167 }
 0x553   :  { %v3480_v11 = vsel %vm1169_vm15, %v1164_v53, %v1166_v39  ;;  %v3484_v12 = vsel %vm1169_vm15, %v1166_v39, %v3420_v54 }
 0x556   :  { %v3400_v40 = vpop.permute.xlu1 %1207  ;;  %v1210_v37 = vpop.permute.xlu0 %1209 }
 0x557   :  { %4639 = vst [vmem:[#allocation4_spill] sm:$0xff] %v3400_v40  ;;  %v3488_v13 = vsel %vm509_vm7, %v3400_v40, %v1210_v37 }
 0x55a   :  { %v1212_v25 = vpop.permute.xlu1 %1211  ;;  %v3422_v55 = vpop.permute.xlu0 %1213 }
 0x55b   :  { %v3491_v14 = vsel %vm509_vm7, %v1210_v37, %v1212_v25  ;;  %v3513_v50 = vsel %vm509_vm7, %v1212_v25, %v3422_v55 }
 0x55c   :  { %4660 = vst [vmem:[#allocation25_spill] sm:$0xff] %v3513_v50 }
 0x55e   :  { %v3402_v41 = vpop.permute.xlu1 %1252  ;;  %v1255_v56 = vpop.permute.xlu0 %1254 }
 0x55f   :  { %4640 = vst [vmem:[#allocation5_spill] sm:$0xff] %v3402_v41  ;;  %v3527_v39 = vsel %vm1260_vm0, %v3402_v41, %v1255_v56 }
 0x562   :  { %v3404_v42 = vpop.permute.xlu1 %1256  ;;  %v3463_v8 = vpop.permute.xlu0 %1258 }
 0x563   :  { %4656 = vst [vmem:[#allocation21_spill] sm:$0xff] %v3463_v8  ;;  %v3543_v35 = vsel %vm1260_vm0, %v1255_v56, %v3404_v42  ;;  %v1136_v56 = vmul.f32 0.0, %v1122_v51 }
 0x566   :  { %v3406_v43 = vpop.permute.xlu1 %910  ;;  %v3545_v53 = vpop.permute.xlu0 %912 }
 0x567   :  { %v3409_v26 = vmul.f32 0.0, %v3406_v43 }
 0x569   :  { %4641 = vst [vmem:[#allocation6_spill] sm:$0xff] %v3409_v26  ;;  %v1636_v44 = vpack.c.bf16 %v3409_v26, %v3409_v26 }
 0x56b   :  { %1739 = vrot.lane.b32.xlu0 %v1636_v44, %s2928_s26 }
 0x612   :  { %v3493_v15 = vpop.f32.mrb[0].mxu0  ;;  %v3495_v16 = vpop.f32.mrb[8].mxu1 }
 0x613   :  { %v3497_v22 = vpop.f32.mrb[1].mxu0  ;;  %v3499_v17 = vpop.f32.mrb[9].mxu1  ;;  %v972_v18 = vmul.f32 %v3425_v57, %v3493_v15  ;;  %v1018_v19 = vmul.f32 %v3436_v62, %v3493_v15  ;;  %v1063_v20 = vmul.f32 %v3450_v4, %v3493_v15  ;;  %v3509_v21 = vmul.f32 %v3447_v3, %v3493_v15 }
 0x614   :  { %v3515_v29 = vpop.f32.mrb[2].mxu0  ;;  %v3517_v30 = vpop.f32.mrb[10].mxu1  ;;  %v973_v33 = vmul.f32 %v3428_v58, %v3497_v22  ;;  %v975_v52 = vmul.f32 %v3414_v32, %v3499_v17  ;;  %v1019_v36 = vmul.f32 %v3438_v63, %v3497_v22  ;;  %v1021_v45 = vmul.f32 %v3416_v47, %v3499_v17 }
 0x615   :  { %v3529_v44 = vpop.f32.mrb[3].mxu0  ;;  %v3531_v25 = vpop.f32.mrb[11].mxu1  ;;  %v1064_v46 = vmul.f32 %v3453_v5, %v3497_v22  ;;  %v3539_v48 = vmul.f32 %v3477_v28, %v3497_v22  ;;  %v3550_v47 = vsel %vm377_vm8, %v3406_v43, %v3545_v53  ;;  %v3566_v43 = vmul.f32 %v3461_v7, %v3497_v22 }
 0x616   :  { %4661 = vst [vmem:[#allocation26_spill] sm:$0xff] %v3531_v25  ;;  %v2636_v37 = vpack.i.bf16 %v973_v33, %v972_v18  ;;  %v2641_v2 = vpack.i.bf16 %v975_v52, %v971_v27  ;;  %v2646_v26 = vpack.i.bf16 %v1019_v36, %v1018_v19  ;;  %4662 = vst [vmem:[#allocation27_spill] sm:$0xff] %v3550_v47 }
 0x617   :  { %v2656_v32 = vpack.i.bf16 %v1064_v46, %v1063_v20  ;;  %v2666_v8 = vpack.i.bf16 %v3539_v48, %v3509_v21  ;;  %v3556_v25 = vrot.slane %v3308_v31, %v3097_v61  ;;  %v3562_v27 = vmul.f32 %v3396_v34, %v3493_v15 }
 0x618   :  { %2637 = vrot.lane.b32.xlu1 %v2636_v37, %s2916_s30  ;;  %2642 = vrot.lane.b32.xlu0 %v2641_v2, %s2916_s30  ;;  %v3570_v18 = vmul.f32 %v3398_v38, %v3493_v15  ;;  %v2651_v31 = vpack.i.bf16 %v1021_v45, %v3434_v60  ;;  %v1066_v51 = vmul.f32 %v3418_v49, %v3499_v17  ;;  %v1227_v49 = vmul.f32 0.0, %v3422_v55 }
 0x619   :  { %4663 = vst [vmem:[#allocation28_spill] sm:$0xff] %v3556_v25  ;;  %v3577_v2 = vmul.f32 %v3473_v10, %v3497_v22  ;;  %v3581_v19 = vmul.f32 %v3400_v40, %v3493_v15  ;;  %v3587_v21 = vmul.f32 %v3488_v13, %v3497_v22  ;;  %v3591_v60 = vmul.f32 %v3402_v41, %v3493_v15 }
 0x61a   :  { %v3595_v33 = vmul.f32 %v3527_v39, %v3497_v22  ;;  %v1135_v52 = vmul.f32 %v3469_v23, %v3499_v17  ;;  %v3603_v45 = vmul.f32 %v3441_v0, %v3495_v16  ;;  %v3607_v46 = vrot.slane %v3299_v24, %v3097_v61  ;;  %v3657_v23 = vpop.permute.xlu0 %916 }
 0x61b   :  { %v2681_v36 = vpack.i.bf16 %v3577_v2, %v3570_v18  ;;  %v3617_v18 = vmul.f32 %v3436_v62, %v3515_v29  ;;  %v2661_v2 = vpack.i.bf16 %v1066_v51, %v3443_v1  ;;  %v3622_v61 = vmul.f32 %v3556_v25, %v3495_v16  ;;  %4666 = vst [vmem:[#allocation31_spill] sm:$0xff] %v3657_v23 }
 0x61c   :  { %4664 = vst [vmem:[#allocation29_spill] sm:$0xff] %v3607_v46  ;;  %2647 = vrot.lane.b32.xlu0 %v2646_v26, %s2920_s3  ;;  %2652 = vrot.lane.b32.xlu1 %v2651_v31, %s2920_s3  ;;  %v3626_v24 = vmul.f32 %v3447_v3, %v3515_v29  ;;  %v3630_v26 = vmul.f32 %v3432_v59, %v3495_v16  ;;  %v1182_v62 = vmul.f32 0.0, %v3420_v54 }
 0x61d   :  { %v3636_v37 = vmul.f32 %v3425_v57, %v3515_v29  ;;  %v3640_v1 = vmul.f32 %v3466_v9, %v3495_v16  ;;  %v3644_v51 = vmul.f32 %v3396_v34, %v3515_v29  ;;  %v2676_v48 = vpack.i.bf16 %v1136_v56, %v1135_v52  ;;  %v915_v57 = vpop.permute.xlu1 %914 }
 0x61e   :  { %v3650_v3 = vmul.f32 %v3457_v6, %v3495_v16  ;;  %v3654_v31 = vmul.f32 %v3450_v4, %v3515_v29  ;;  %v3667_v20 = vmul.f32 %v3491_v14, %v3495_v16  ;;  %v3673_v34 = vmul.f32 %v3400_v40, %v3515_v29 }
 0x61f   :  { %v3685_v52 = vmul.f32 %v3428_v58, %v3529_v44  ;;  %v3689_v56 = vmul.f32 %v3432_v59, %v3517_v30  ;;  %v3693_v54 = vmul.f32 %v3543_v35, %v3495_v16  ;;  %v3697_v40 = vmul.f32 %v3402_v41, %v3515_v29 }
 0x620   :  { %4665 = vst [vmem:[#allocation30_spill] sm:$0xff] %v3650_v3  ;;  %2657 = vrot.lane.b32.xlu1 %v2656_v32, %s2922_s23  ;;  %2662 = vrot.lane.b32.xlu0 %v2661_v2, %s2922_s23  ;;  %v3677_v32 = vmul.f32 %v3480_v11, %v3495_v16  ;;  %v3681_v2 = vmul.f32 %v3398_v38, %v3515_v29 }
 0x621   :  { %v3701_v38 = vsel %vm377_vm8, %v915_v57, %v3657_v23  ;;  %v3709_v59 = vmul.f32 %v3438_v63, %v3529_v44  ;;  %v2751_v41 = vpack.i.bf16 %v3689_v56, %v3685_v52  ;;  %v2746_v3 = vpack.i.bf16 %v3697_v40, %v3693_v54 }
 0x622   :  { %4667 = vst [vmem:[#allocation32_spill] sm:$0xff] %v3701_v38  ;;  %v3720_v4 = vmul.f32 %v3441_v0, %v3517_v30  ;;  %v1181_v58 = vmul.f32 %v3484_v12, %v3499_v17  ;;  %v1226_v55 = vmul.f32 %v3513_v50, %v3499_v17  ;;  %v3738_v56 = vmul.f32 %v3477_v28, %v3529_v44 }
 0x623   :  { %v3742_v52 = vmul.f32 %v3556_v25, %v3517_v30  ;;  %v3746_v54 = vmul.f32 %v3607_v46, %v3499_v17  ;;  %v4669_v25 = vpack.i.bf16 %v3566_v43, %v3562_v27  ;;  %v1230_v27 = vmul.f32 %v3491_v14, %v3517_v30 }
 0x624   :  { %2667 = vrot.lane.b32.xlu0 %v2666_v8, %s2923_s24  ;;  %2677 = vrot.lane.b32.xlu1 %v2676_v48, %s2924_s25  ;;  %v3728_v8 = vmul.f32 %v3453_v5, %v3529_v44  ;;  %v3732_v48 = vmul.f32 %v3457_v6, %v3517_v30  ;;  %v2756_v40 = vpack.i.bf16 %v3720_v4, %v3709_v59  ;;  %v4668_v6 = vld [vmem:[#allocation26_spill] sm:$0xff] }
 0x625   :  { %v1094_v0 = vmul.f32 %v3607_v46, %v4668_v6  ;;  %v1138_v59 = vmul.f32 %v3461_v7, %v3529_v44  ;;  %v1139_v4 = vmul.f32 %v3466_v9, %v3517_v30  ;;  %v1185_v46 = vmul.f32 %v3480_v11, %v3517_v30 }
 0x626   :  { %v2761_v5 = vpack.i.bf16 %v3732_v48, %v3728_v8  ;;  %v2766_v8 = vpack.i.bf16 %v3742_v52, %v3738_v56  ;;  %v1184_v48 = vmul.f32 %v3473_v10, %v3529_v44  ;;  %v2686_v7 = vpack.i.bf16 %v1182_v62, %v1181_v58 }
 0x627   :  { %v2696_v28 = vpack.i.bf16 %v1227_v49, %v1226_v55  ;;  %v2771_v9 = vpack.i.bf16 %v1094_v0, %v3746_v54  ;;  %v2776_v63 = vpack.i.bf16 %v1139_v4, %v1138_v59  ;;  %v1275_v43 = vmul.f32 %v3527_v39, %v3529_v44 }
 0x628   :  { %2672 = vrot.lane.b32.xlu0 %v4669_v25, %s2924_s25  ;;  %2682 = vrot.lane.b32.xlu1 %v2681_v36, %s2929_s4  ;;  %v2781_v50 = vpack.i.bf16 %v1185_v46, %v1184_v48  ;;  %v1229_v25 = vmul.f32 %v3488_v13, %v3529_v44  ;;  %v4670_v36 = vld [vmem:[#allocation21_spill] sm:$0xff]  ;;  %v3781_v49 = vsel %vm377_vm8, %v3545_v53, %v915_v57 }
 0x629   :  { %v3777_v56 = vsel %vm1260_vm0, %v3404_v42, %v4670_v36  ;;  %4671 = vst [vmem:[#allocation26_spill] sm:$0xff] %v3781_v49  ;;  %v1276_v58 = vmul.f32 %v3543_v35, %v3517_v30  ;;  %v927_v62 = vmul.f32 %v3550_v47, %v3493_v15  ;;  %v1273_v0 = vmul.f32 0.0, %v4670_v36 }
 0x62a   :  { %v2786_v46 = vpack.i.bf16 %v1230_v27, %v1229_v25  ;;  %v931_v42 = vmul.f32 %v3550_v47, %v3515_v29  ;;  %v930_v57 = vmul.f32 %v3657_v23, %v3499_v17  ;;  %v934_v55 = vmul.f32 %v3657_v23, %v4668_v6 }
 0x62b   :  { %v2791_v53 = vpack.i.bf16 %v1276_v58, %v1275_v43  ;;  %v929_v15 = vmul.f32 %v3701_v38, %v3495_v16  ;;  %v928_v29 = vmul.f32 %v3781_v49, %v3497_v22  ;;  %v932_v54 = vmul.f32 %v3781_v49, %v3529_v44 }
 0x62c   :  { %2687 = vrot.lane.b32.xlu0 %v2686_v7, %s2929_s4  ;;  %2697 = vrot.lane.b32.xlu1 %v2696_v28, %s2930_s29  ;;  %v933_v7 = vmul.f32 %v3701_v38, %v3517_v30  ;;  %v1272_v28 = vmul.f32 %v3777_v56, %v3499_v17  ;;  %v1637_v52 = vpack.c.bf16 %v931_v42, %v927_v62 }
 0x62d   :  { %v1640_v59 = vpack.c.bf16 %v934_v55, %v930_v57  ;;  %v4672_v48 = vpack.i.bf16 %v3587_v21, %v3581_v19  ;;  %v4673_v16 = vpack.i.bf16 %v3595_v33, %v3591_v60  ;;  %v1638_v17 = vpack.c.bf16 %v932_v54, %v928_v29  ;;  %v4678_v60 = vld [vmem:[#allocation30_spill] sm:$0xff] }
 0x62e   :  { %v1639_v4 = vpack.c.bf16 %v933_v7, %v929_v15  ;;  %v2706_v30 = vpack.i.bf16 %v1273_v0, %v1272_v28  ;;  %v4674_v22 = vpack.i.bf16 %v3617_v18, %v3603_v45  ;;  %v4675_v44 = vpack.i.bf16 %v3626_v24, %v3622_v61  ;;  %v4682_v18 = vld [vmem:[#allocation7_spill] sm:$0xff]  ;;  %v4683_v24 = vld [vmem:[#allocation8_spill] sm:$0xff] }
 0x62f   :  { %v4676_v19 = vpack.i.bf16 %v3636_v37, %v3630_v26  ;;  %v4677_v21 = vpack.i.bf16 %v3644_v51, %v3640_v1  ;;  %v4679_v33 = vpack.i.bf16 %v3654_v31, %v4678_v60  ;;  %v4680_v45 = vpack.i.bf16 %v3673_v34, %v3667_v20  ;;  %v4684_v20 = vld [vmem:[#allocation9_spill] sm:$0xff] }
 0x630   :  { %2692 = vrot.lane.b32.xlu0 %v4672_v48, %s2930_s29  ;;  %2702 = vrot.lane.b32.xlu1 %v4673_v16, %s2931_s9  ;;  %v4681_v37 = vpack.i.bf16 %v3681_v2, %v3677_v32  ;;  %v979_v61 = vmul.f32 %v4682_v18, %v4668_v6  ;;  %v1025_v34 = vmul.f32 %v4683_v24, %v4668_v6  ;;  %v4686_v31 = vld [vmem:[#allocation25_spill] sm:$0xff] }
 0x631   :  { %v1070_v26 = vmul.f32 %v4684_v20, %v4668_v6  ;;  %v1231_v1 = vmul.f32 %v4686_v31, %v4668_v6 }
 0x634   :  { %2717 = vrot.lane.b32.xlu1 %v4674_v22, %s2920_s3  ;;  %2707 = vrot.lane.b32.xlu0 %v2706_v30, %s2931_s9 }
 0x638   :  { %2727 = vrot.lane.b32.xlu1 %v4675_v44, %s2923_s24  ;;  %2712 = vrot.lane.b32.xlu0 %v4676_v19, %s2916_s30 }
 0x63c   :  { %2732 = vrot.lane.b32.xlu1 %v4677_v21, %s2924_s25  ;;  %2722 = vrot.lane.b32.xlu0 %v4679_v33, %s2922_s23 }
 0x640   :  { %2742 = vrot.lane.b32.xlu1 %v4680_v45, %s2930_s29  ;;  %2737 = vrot.lane.b32.xlu0 %v4681_v37, %s2929_s4 }
 0x644   :  { %2752 = vrot.lane.b32.xlu1 %v2751_v41, %s2916_s30  ;;  %2747 = vrot.lane.b32.xlu0 %v2746_v3, %s2931_s9  ;;  %v4685_v41 = vld [vmem:[#allocation23_spill] sm:$0xff] }
 0x645   :  { %v1140_v3 = vmul.f32 %v4685_v41, %v4668_v6 }
 0x648   :  { %1303 = vrot.lane.b32.xlu1 %v979_v61, %s2916_s30  ;;  %2757 = vrot.lane.b32.xlu0 %v2756_v40, %s2920_s3 }
 0x64c   :  { %2762 = vrot.lane.b32.xlu1 %v2761_v5, %s2922_s23  ;;  %1348 = vrot.lane.b32.xlu0 %v1025_v34, %s2920_s3  ;;  %v1186_v5 = vmul.f32 %v3484_v12, %v4668_v6 }
 0x650   :  { %1393 = vrot.lane.b32.xlu1 %v1070_v26, %s2922_s23  ;;  %2767 = vrot.lane.b32.xlu0 %v2766_v8, %s2923_s24 }
 0x654   :  { %2772 = vrot.lane.b32.xlu1 %v2771_v9, %s2923_s24  ;;  %2777 = vrot.lane.b32.xlu0 %v2776_v63, %s2924_s25  ;;  %v1277_v63 = vmul.f32 %v3777_v56, %v4668_v6  ;;  %v3878_v9 = vpop.permute.xlu0 %1739 }
 0x658   :  { %2782 = vrot.lane.b32.xlu1 %v2781_v50, %s2929_s4  ;;  %1478 = vrot.lane.b32.xlu0 %v1140_v3, %s2924_s25 }
 0x65c   :  { %1523 = vrot.lane.b32.xlu1 %v1186_v5, %s2929_s4  ;;  %2787 = vrot.lane.b32.xlu0 %v2786_v46, %s2930_s29 }
 0x660   :  { %2792 = vrot.lane.b32.xlu1 %v2791_v53, %s2931_s9  ;;  %1569 = vrot.lane.b32.xlu0 %v1231_v1, %s2930_s29 }
 0x664   :  { %1615 = vrot.lane.b32.xlu1 %v1277_v63, %s2931_s9  ;;  %1741 = vrot.lane.b32.xlu0 %v1637_v52, %s2928_s26 }
 0x668   :  { %1747 = vrot.lane.b32.xlu0 %v1640_v59, %s2928_s26  ;;  %1745 = vrot.lane.b32.xlu1 %v1639_v4, %s2928_s26 }
 0x66c   :  { %1743 = vrot.lane.b32.xlu1 %v1638_v17, %s2928_s26 }
 0x68a   :  { %v3880_v50 = vpop.permute.xlu1 %2637  ;;  %v3882_v51 = vpop.permute.xlu0 %2642 }
 0x68b   :  { %v2639_v19 = vunpack.i.l.bf16 %v3880_v50  ;;  %v3945_v21 = vunpack.i.l.bf16 %v3882_v51 }
 0x68d   :  { %4687 = vst [vmem:[#allocation21_spill] sm:$0xff] %v3945_v21  ;;  %v1305_v5 = vsel %vm289_vm2, %v3945_v21, %v2639_v19 }
 0x68e   :  { %v3884_v32 = vpop.permute.xlu1 %2652  ;;  %v3886_v2 = vpop.permute.xlu0 %2647 }
 0x68f   :  { %v3969_v1 = vunpack.i.l.bf16 %v3884_v32  ;;  %v4618_v63 = vunpack.i.l.bf16 %v3886_v2  ;;  %v2650_v38 = vunpack.i.h.bf16 %v3886_v2 }
 0x691   :  { %4688 = vst [vmem:[#allocation30_spill] sm:$0xff] %v3969_v1 }
 0x692   :  { %v3888_v6 = vpop.permute.xlu1 %2657  ;;  %v3890_v40 = vpop.permute.xlu0 %2662 }
 0x696   :  { %v3892_v8 = vpop.permute.xlu1 %2677  ;;  %v3894_v25 = vpop.permute.xlu0 %2667 }
 0x697   :  { %v4613_v55 = vunpack.i.l.bf16 %v3894_v25 }
 0x69a   :  { %v3896_v27 = vpop.permute.xlu1 %2682  ;;  %v3898_v43 = vpop.permute.xlu0 %2672 }
 0x69b   :  { %v4612_v29 = vunpack.i.l.bf16 %v3898_v43  ;;  %v4610_v17 = vunpack.i.l.bf16 %v3896_v27 }
 0x69e   :  { %v3900_v36 = vpop.permute.xlu1 %2697  ;;  %v3902_v58 = vpop.permute.xlu0 %2687 }
 0x6a2   :  { %v3904_v62 = vpop.permute.xlu1 %2702  ;;  %v3906_v0 = vpop.permute.xlu0 %2692 }
 0x6a3   :  { %v4608_v30 = vunpack.i.l.bf16 %v3906_v0  ;;  %v4617_v26 = vunpack.i.l.bf16 %v3904_v62 }
 0x6a6   :  { %v3908_v46 = vpop.permute.xlu1 %2717  ;;  %v3910_v42 = vpop.permute.xlu0 %2707 }
 0x6a7   :  { %v4621_v45 = vunpack.i.h.bf16 %v3908_v46 }
 0x6aa   :  { %v3912_v57 = vpop.permute.xlu1 %2727  ;;  %v3914_v53 = vpop.permute.xlu0 %2712 }
 0x6ab   :  { %v4615_v15 = vunpack.i.h.bf16 %v3912_v57  ;;  %v2715_v4 = vunpack.i.h.bf16 %v3914_v53 }
 0x6ad   :  { %v1656_v7 = vpack.c.bf16 %v4615_v15, %v4613_v55  ;;  %v1309_v37 = vsel %vm289_vm2, %v3945_v21, %v2715_v4 }
 0x6ae   :  { %v3922_v28 = vpop.permute.xlu1 %2732  ;;  %v3924_v52 = vpop.permute.xlu0 %2722 }
 0x6af   :  { %v4614_v54 = vunpack.i.h.bf16 %v3922_v28  ;;  %1779 = vrot.lane.b32.xlu0 %v1656_v7, %s2928_s26 }
 0x6b1   :  { %v1661_v59 = vpack.c.bf16 %v4614_v54, %v4612_v29  ;;  %v2655_v54 = vunpack.i.h.bf16 %v3884_v32  ;;  %v2640_v32 = vunpack.i.h.bf16 %v3880_v50 }
 0x6b2   :  { %v3934_v48 = vpop.permute.xlu1 %2742  ;;  %v3936_v16 = vpop.permute.xlu0 %2737 }
 0x6b3   :  { %v4609_v22 = vunpack.i.h.bf16 %v3934_v48  ;;  %v4611_v44 = vunpack.i.h.bf16 %v3936_v16  ;;  %1789 = vrot.lane.b32.xlu1 %v1661_v59, %s2928_s26  ;;  %v1641_v59 = vpack.c.bf16 %v1309_v37, %v1305_v5  ;;  %v1350_v37 = vsel %vm305_vm3, %v3969_v1, %v4618_v63 }
 0x6b4   :  { %v4620_v5 = vunpack.i.l.bf16 %v3888_v6 }
 0x6b5   :  { %v1671_v60 = vpack.c.bf16 %v4609_v22, %v4608_v30  ;;  %v1666_v33 = vpack.c.bf16 %v4611_v44, %v4610_v17  ;;  %v2645_v17 = vunpack.i.h.bf16 %v3882_v51  ;;  %v3992_v44 = vunpack.i.l.bf16 %v3890_v40 }
 0x6b6   :  { %v3958_v61 = vpop.permute.xlu1 %2752  ;;  %v3960_v34 = vpop.permute.xlu0 %2747 }
 0x6b7   :  { %v4616_v3 = vunpack.i.h.bf16 %v3960_v34  ;;  %1809 = vrot.lane.b32.xlu1 %v1671_v60, %s2928_s26  ;;  %1799 = vrot.lane.b32.xlu0 %v1666_v33, %s2928_s26  ;;  %v1354_v60 = vsel %vm305_vm3, %v3969_v1, %v4621_v45  ;;  %v4619_v33 = vunpack.i.h.bf16 %v3924_v52  ;;  %4689 = vst [vmem:[#allocation7_spill] sm:$0xff] %v3992_v44  ;;  %v1395_v15 = vsel %vm361_vm6, %v3992_v44, %v4620_v5 }
 0x6b8   :  { %v1646_v55 = vpack.c.bf16 %v1354_v60, %v1350_v37 }
 0x6b9   :  { %v1676_v7 = vpack.c.bf16 %v4616_v3, %v4617_v26  ;;  %v1399_v51 = vsel %vm361_vm6, %v3992_v44, %v4619_v33  ;;  %v2754_v3 = vunpack.i.l.bf16 %v3958_v61  ;;  %v4623_v33 = vunpack.i.h.bf16 %v3890_v40 }
 0x6ba   :  { %v1304_v30 = vpop.permute.xlu1 %1303  ;;  %v3981_v22 = vpop.permute.xlu0 %2757  ;;  %v1651_v37 = vpack.c.bf16 %v1399_v51, %v1395_v15  ;;  %v2755_v15 = vunpack.i.h.bf16 %v3958_v61  ;;  %v2719_v61 = vunpack.i.l.bf16 %v3908_v46 }
 0x6bb   :  { %1819 = vrot.lane.b32.xlu0 %v1676_v7, %s2928_s26  ;;  %1749 = vrot.lane.b32.xlu1 %v1641_v59, %s2928_s26  ;;  %v1645_v29 = vpack.c.bf16 %v1304_v30, %v2645_v17  ;;  %v2760_v51 = vunpack.i.h.bf16 %v3981_v22  ;;  %v2759_v5 = vunpack.i.l.bf16 %v3981_v22 }
 0x6bc   :  { %v1311_v1 = vsel %vm289_vm2, %v2754_v3, %v2755_v15 }
 0x6bd   :  { %v1356_v44 = vsel %vm305_vm3, %v2759_v5, %v2760_v51 }
 0x6be   :  { %v3998_v7 = vpop.permute.xlu1 %2762  ;;  %v1349_v59 = vpop.permute.xlu0 %1348 }
 0x6bf   :  { %1759 = vrot.lane.b32.xlu0 %v1646_v55, %s2928_s26  ;;  %1757 = vrot.lane.b32.xlu1 %v1645_v29, %s2928_s26  ;;  %v1650_v60 = vpack.c.bf16 %v1349_v59, %v2655_v54  ;;  %v1310_v29 = vsel %vm289_vm2, %v2715_v4, %v2754_v3  ;;  %v2714_v4 = vunpack.i.l.bf16 %v3914_v53  ;;  %v1352_v53 = vsel %vm305_vm3, %v2650_v38, %v2719_v61 }
 0x6c0   :  { %v2764_v3 = vunpack.i.l.bf16 %v3998_v7 }
 0x6c2   :  { %v4008_v26 = vpop.permute.xlu1 %1393  ;;  %v4010_v63 = vpop.permute.xlu0 %2767 }
 0x6c3   :  { %1767 = vrot.lane.b32.xlu0 %v1650_v60, %s2928_s26  ;;  %1769 = vrot.lane.b32.xlu1 %v1651_v37, %s2928_s26  ;;  %v1655_v55 = vpack.c.bf16 %v4008_v26, %v4623_v33  ;;  %v1306_v37 = vsel %vm289_vm2, %v2639_v19, %v2640_v32  ;;  %v1307_v19 = vsel %vm289_vm2, %v2640_v32, %v2714_v4 }
 0x6c4   :  { %v1642_v33 = vpack.c.bf16 %v1310_v29, %v1306_v37  ;;  %v1648_v29 = vpack.c.bf16 %v1356_v44, %v1352_v53  ;;  %v1312_v37 = vsel %vm289_vm2, %v2755_v15, %v1304_v30  ;;  %v1353_v44 = vsel %vm305_vm3, %v2719_v61, %v2655_v54 }
 0x6c5   :  { %v4632_v30 = vunpack.i.h.bf16 %v3904_v62 }
 0x6c6   :  { %v4023_v45 = vpop.permute.xlu1 %2772  ;;  %v4025_v23 = vpop.permute.xlu0 %2777 }
 0x6c7   :  { %v4628_v60 = vunpack.i.h.bf16 %v4023_v45  ;;  %v4629_v50 = vunpack.i.l.bf16 %v4023_v45  ;;  %1777 = vrot.lane.b32.xlu1 %v1655_v55, %s2928_s26 }
 0x6c9   :  { %v1660_v22 = vpack.c.bf16 %v4628_v60, %v4629_v50  ;;  %v1643_v60 = vpack.c.bf16 %v1311_v1, %v1307_v19  ;;  %v1357_v50 = vsel %vm305_vm3, %v2760_v51, %v1349_v59  ;;  %v1308_v1 = vsel %vm289_vm2, %v2714_v4, %v2645_v17 }
 0x6ca   :  { %v4040_v21 = vpop.permute.xlu1 %2782  ;;  %v4042_v55 = vpop.permute.xlu0 %1478  ;;  %v1644_v32 = vpack.c.bf16 %v1312_v37, %v1308_v1  ;;  %v4690_v59 = vunpack.i.h.bf16 %v3908_v46  ;;  %v1649_v51 = vpack.c.bf16 %v1357_v50, %v1353_v44  ;;  %v2770_v19 = vunpack.i.h.bf16 %v4010_v63 }
 0x6cb   :  { %1787 = vrot.lane.b32.xlu0 %v1660_v22, %s2928_s26  ;;  %1751 = vrot.lane.b32.xlu1 %v1642_v33, %s2928_s26  ;;  %v2660_v33 = vunpack.i.h.bf16 %v3888_v6  ;;  %v2765_v22 = vunpack.i.h.bf16 %v3998_v7  ;;  %v2769_v17 = vunpack.i.l.bf16 %v4010_v63  ;;  %v4692_v46 = vunpack.i.l.bf16 %v3886_v2 }
 0x6cc   :  { %v1355_v15 = vsel %vm305_vm3, %v4690_v59, %v2759_v5  ;;  %v4693_v7 = vunpack.i.l.bf16 %v3888_v6  ;;  %v2729_v63 = vunpack.i.l.bf16 %v3912_v57  ;;  %v4694_v37 = vunpack.i.l.bf16 %v3904_v62 }
 0x6cd   :  { %v1351_v5 = vsel %vm305_vm3, %v4692_v46, %v2650_v38  ;;  %v4695_v2 = vunpack.i.h.bf16 %v3960_v34  ;;  %v1441_v59 = vsel %vm377_vm8, %v2769_v17, %v2770_v19 }
 0x6ce   :  { %v4051_v47 = vpop.permute.xlu1 %1523  ;;  %v4053_v49 = vpop.permute.xlu0 %2787  ;;  %v1396_v50 = vsel %vm361_vm6, %v4693_v7, %v2660_v33  ;;  %v4090_v1 = vsel %vm1617_vm1, %v4694_v37, %v4632_v30  ;;  %v1647_v6 = vpack.c.bf16 %v1355_v15, %v1351_v5 }
 0x6cf   :  { %1753 = vrot.lane.b32.xlu0 %v1643_v60, %s2928_s26  ;;  %1763 = vrot.lane.b32.xlu1 %v1648_v29, %s2928_s26  ;;  %v4691_v60 = vunpack.i.h.bf16 %v3924_v52  ;;  %v2724_v29 = vunpack.i.l.bf16 %v3924_v52  ;;  %v1401_v52 = vsel %vm361_vm6, %v2764_v3, %v2765_v22 }
 0x6d1   :  { %v1400_v53 = vsel %vm361_vm6, %v4691_v60, %v2764_v3  ;;  %v1397_v15 = vsel %vm361_vm6, %v2660_v33, %v2724_v29  ;;  %v1402_v3 = vsel %vm361_vm6, %v2765_v22, %v4008_v26  ;;  %v2675_v26 = vunpack.i.h.bf16 %v3898_v43 }
 0x6d2   :  { %v4070_v4 = vpop.permute.xlu1 %2792  ;;  %v4072_v54 = vpop.permute.xlu0 %1569  ;;  %v1652_v44 = vpack.c.bf16 %v1400_v53, %v1396_v50  ;;  %v1653_v53 = vpack.c.bf16 %v1401_v52, %v1397_v15  ;;  %v4696_v50 = vunpack.i.l.bf16 %v4023_v45  ;;  %v4698_v22 = vunpack.i.h.bf16 %v3890_v40 }
 0x6d3   :  { %v2794_v61 = vunpack.i.l.bf16 %v4070_v4  ;;  %1755 = vrot.lane.b32.xlu0 %v1644_v32, %s2928_s26  ;;  %1765 = vrot.lane.b32.xlu1 %v1649_v51, %s2928_s26  ;;  %v2670_v32 = vunpack.i.h.bf16 %v3894_v25  ;;  %v4700_v15 = vunpack.i.h.bf16 %v3922_v28  ;;  %v2679_v40 = vunpack.i.l.bf16 %v3892_v8 }
 0x6d4   :  { %v1439_v37 = vsel %vm377_vm8, %v2729_v63, %v4696_v50  ;;  %v2734_v50 = vunpack.i.l.bf16 %v3922_v28  ;;  %v2739_v28 = vunpack.i.l.bf16 %v3936_v16 }
 0x6d5   :  { %v4097_v38 = vsel %vm1617_vm1, %v4695_v2, %v2794_v61  ;;  %v1438_v7 = vsel %vm377_vm8, %v2670_v32, %v2729_v63  ;;  %v4697_v2 = vunpack.i.h.bf16 %v4023_v45  ;;  %v1398_v63 = vsel %vm361_vm6, %v2724_v29, %v4698_v22 }
 0x6d6   :  { %v4102_v51 = vpop.permute.xlu1 %1615  ;;  %v1742_v60 = vpop.permute.xlu0 %1741  ;;  %v1658_v5 = vpack.c.bf16 %v1441_v59, %v1438_v7  ;;  %v1654_v45 = vpack.c.bf16 %v1402_v3, %v1398_v63  ;;  %v2780_v7 = vunpack.i.h.bf16 %v4025_v23 }
 0x6d7   :  { %1761 = vrot.lane.b32.xlu0 %v1647_v6, %s2928_s26  ;;  %1771 = vrot.lane.b32.xlu1 %v1652_v44, %s2928_s26  ;;  %v1442_v46 = vsel %vm377_vm8, %v2770_v19, %v4697_v2  ;;  %v2779_v6 = vunpack.i.l.bf16 %v4025_v23  ;;  %v4699_v19 = vunpack.i.h.bf16 %v3912_v57  ;;  %v4701_v23 = vunpack.i.l.bf16 %v3894_v25 }
 0x6d8   :  { %v1659_v52 = vpack.c.bf16 %v1442_v46, %v1439_v37  ;;  %v4702_v46 = vunpack.i.l.bf16 %v3898_v43  ;;  %v2785_v25 = vunpack.i.h.bf16 %v4040_v21  ;;  %v1486_v63 = vsel %vm393_vm9, %v2780_v7, %v4042_v55 }
 0x6d9   :  { %v1440_v59 = vsel %vm377_vm8, %v4699_v19, %v2769_v17  ;;  %v1437_v17 = vsel %vm377_vm8, %v4701_v23, %v2670_v32  ;;  %v2784_v32 = vunpack.i.l.bf16 %v4040_v21  ;;  %v2685_v21 = vunpack.i.h.bf16 %v3896_v27 }
 0x6da   :  { %v1746_v44 = vpop.permute.xlu1 %1745  ;;  %v1748_v30 = vpop.permute.xlu0 %1747  ;;  %v1480_v3 = vsel %vm393_vm9, %v4702_v46, %v2675_v26  ;;  %v1657_v37 = vpack.c.bf16 %v1440_v59, %v1437_v17  ;;  %v2689_v59 = vunpack.i.l.bf16 %v3902_v58 }
 0x6db   :  { %1773 = vrot.lane.b32.xlu0 %v1653_v53, %s2928_s26  ;;  %1783 = vrot.lane.b32.xlu1 %v1658_v5, %s2928_s26  ;;  %v1833_v33 = vsel %vm1260_vm0, %v1746_v44, %v1748_v30  ;;  %v1484_v53 = vsel %vm393_vm9, %v4700_v15, %v2779_v6  ;;  %v4134_v5 = vunpack.i.h.bf16 %v3892_v8  ;;  %v1830_v8 = vsel %vm1260_vm0, %v3878_v9, %v1742_v60 }
 0x6dc   :  { %1946 = vmatprep.subr.bf16.mxu1 %v1833_v33  ;;  %v1662_v2 = vpack.c.bf16 %v1484_v53, %v1480_v3  ;;  %v1481_v9 = vsel %vm393_vm9, %v2675_v26, %v2734_v50  ;;  %v1531_v22 = vsel %vm1525_vm4, %v2784_v32, %v2785_v25  ;;  %v1527_v26 = vsel %vm1525_vm4, %v2685_v21, %v2739_v28 }
 0x6dd   :  { %v1487_v43 = vsel %vm393_vm9, %v4042_v55, %v4134_v5  ;;  %v1668_v19 = vpack.c.bf16 %v1531_v22, %v1527_v26  ;;  %v4703_v15 = vunpack.i.h.bf16 %v3936_v16  ;;  %v2789_v55 = vunpack.i.l.bf16 %v4053_v49 }
 0x6de   :  { %v1744_v30 = vpop.permute.xlu1 %1743  ;;  %v2695_v16 = vunpack.i.h.bf16 %v3906_v0  ;;  %v2790_v3 = vunpack.i.h.bf16 %v4053_v49  ;;  %v4707_v22 = vunpack.i.h.bf16 %v3904_v62  ;;  %v2709_v26 = vunpack.i.l.bf16 %v3910_v42 }
 0x6df   :  { %v1832_v29 = vsel %vm1260_vm0, %v1744_v30, %v1746_v44  ;;  %1775 = vrot.lane.b32.xlu0 %v1654_v45, %s2928_s26  ;;  %1785 = vrot.lane.b32.xlu1 %v1659_v52, %s2928_s26  ;;  %v1831_v57 = vsel %vm1260_vm0, %v1742_v60, %v1744_v30  ;;  %v1485_v44 = vsel %vm393_vm9, %v2779_v6, %v2780_v7  ;;  %v4704_v7 = vunpack.i.l.bf16 %v3896_v27 }
 0x6e0   :  { %1905 = vmatprep.subr.bf16.mxu0 %v1831_v57  ;;  %1947 = vmatpush1.bf16.msra.mxu1 %v1832_v29  ;;  %v1483_v60 = vsel %vm393_vm9, %v2679_v40, %v4134_v5  ;;  %v1663_v33 = vpack.c.bf16 %v1485_v44, %v1481_v9  ;;  %v1482_v45 = vsel %vm393_vm9, %v2734_v50, %v2679_v40  ;;  %v4183_v29 = vunpack.i.h.bf16 %v3902_v58 }
 0x6e1   :  { %1906 = vmatpush1.bf16.msra.mxu0 %v1830_v8  ;;  %v1665_v6 = vpack.c.bf16 %v1487_v43, %v1483_v60  ;;  %v1664_v52 = vpack.c.bf16 %v1486_v63, %v1482_v45  ;;  %v1530_v53 = vsel %vm1525_vm4, %v4703_v15, %v2784_v32  ;;  %v1532_v30 = vsel %vm1525_vm4, %v2785_v25, %v4051_v47 }
 0x6e2   :  { %v1526_v40 = vsel %vm1525_vm4, %v4704_v7, %v2685_v21  ;;  %v1528_v57 = vsel %vm1525_vm4, %v2739_v28, %v2689_v59  ;;  %v1533_v46 = vsel %vm1525_vm4, %v4051_v47, %v4183_v29  ;;  %v4705_v27 = vunpack.i.h.bf16 %v3934_v48  ;;  %v4225_v21 = vld [vmem:[%s4564_s11] sm:$0xff] }
 0x6e3   :  { %1781 = vrot.lane.b32.xlu0 %v1657_v37, %s2928_s26  ;;  %1791 = vrot.lane.b32.xlu1 %v1662_v2, %s2928_s26  ;;  %v1669_v23 = vpack.c.bf16 %v1532_v30, %v1528_v57  ;;  %v1667_v17 = vpack.c.bf16 %v1530_v53, %v1526_v40  ;;  %v4195_v58 = vunpack.i.h.bf16 %v3900_v36  ;;  %v2699_v8 = vunpack.i.l.bf16 %v3900_v36 }
 0x6e4   :  { %v1576_v50 = vsel %vm1571_vm5, %v4705_v27, %v2789_v55  ;;  %v4706_v37 = vunpack.i.l.bf16 %v3906_v0  ;;  %v2744_v47 = vunpack.i.l.bf16 %v3934_v48  ;;  %v1529_v49 = vsel %vm1525_vm4, %v2689_v59, %v4183_v29 }
 0x6e5   :  { %v1670_v44 = vpack.c.bf16 %v1533_v46, %v1529_v49  ;;  %v1577_v32 = vsel %vm1571_vm5, %v2789_v55, %v2790_v3  ;;  %v2795_v43 = vunpack.i.h.bf16 %v4070_v4  ;;  %v1579_v9 = vsel %vm1571_vm5, %v4072_v54, %v4195_v58 }
 0x6e6   :  { %v1572_v2 = vsel %vm1571_vm5, %v4706_v37, %v2695_v16  ;;  %v1573_v36 = vsel %vm1571_vm5, %v2695_v16, %v2744_v47  ;;  %v2749_v0 = vunpack.i.l.bf16 %v3960_v34  ;;  %v1575_v48 = vsel %vm1571_vm5, %v2699_v8, %v4195_v58 }
 0x6e7   :  { %1793 = vrot.lane.b32.xlu0 %v1663_v33, %s2928_s26  ;;  %1797 = vrot.lane.b32.xlu1 %v1665_v6, %s2928_s26  ;;  %v1672_v25 = vpack.c.bf16 %v1576_v50, %v1572_v2  ;;  %v1675_v28 = vpack.c.bf16 %v1579_v9, %v1575_v48  ;;  %v1673_v60 = vpack.c.bf16 %v1577_v32, %v1573_v36  ;;  %v4243_v62 = vunpack.i.h.bf16 %v3910_v42  ;;  %v1682_v42 = vld [vmem:[%s4565_s12] sm:$0xff] }
 0x6e8   :  { %v1623_v6 = vsel %vm1617_vm1, %v2794_v61, %v2795_v43  ;;  %v1578_v33 = vsel %vm1571_vm5, %v2790_v3, %v4072_v54  ;;  %v2553_v34 = vcombine.high %v4225_v21, %v4225_v21  ;;  %v1619_v4 = vsel %vm1617_vm1, %v4707_v22, %v2749_v0 }
 0x6e9   :  { %v1574_v61 = vsel %vm1571_vm5, %v2744_v47, %v2699_v8  ;;  %v1678_v54 = vpack.c.bf16 %v1623_v6, %v1619_v4  ;;  %v1624_v45 = vsel %vm1617_vm1, %v2795_v43, %v4102_v51  ;;  %v1625_v59 = vsel %vm1617_vm1, %v4102_v51, %v4243_v62 }
 0x6ea   :  { %v1674_v63 = vpack.c.bf16 %v1578_v33, %v1574_v61  ;;  %2554 = vmatprep.mubr.msk.bf16.mxu0 %vm509_vm7, %v2553_v34  ;;  %2555 = vmatprep.mubr.msk.bf16.mxu1 %vm509_vm7, %v2553_v34  ;;  %v4708_v15 = vpack.c.bf16 %v4097_v38, %v4090_v1  ;;  %v1621_v53 = vsel %vm1617_vm1, %v2709_v26, %v4243_v62 }
 0x6eb   :  { %1795 = vrot.lane.b32.xlu0 %v1664_v52, %s2928_s26  ;;  %1803 = vrot.lane.b32.xlu1 %v1668_v19, %s2928_s26  ;;  %v1620_v52 = vsel %vm1617_vm1, %v2749_v0, %v2709_v26  ;;  %v1680_v30 = vpack.c.bf16 %v1625_v59, %v1621_v53 }
 0x6ec   :  { %v1679_v19 = vpack.c.bf16 %v1624_v45, %v1620_v52 }
 0x6ef   :  { %1801 = vrot.lane.b32.xlu0 %v1667_v17, %s2928_s26  ;;  %1805 = vrot.lane.b32.xlu1 %v1669_v23, %s2928_s26 }
 0x6f3   :  { %1807 = vrot.lane.b32.xlu0 %v1670_v44, %s2928_s26  ;;  %1811 = vrot.lane.b32.xlu1 %v1672_v25, %s2928_s26 }
 0x6f7   :  { %1813 = vrot.lane.b32.xlu0 %v1673_v60, %s2928_s26  ;;  %1817 = vrot.lane.b32.xlu1 %v1675_v28, %s2928_s26 }
 0x6fb   :  { %1815 = vrot.lane.b32.xlu0 %v1674_v63, %s2928_s26  ;;  %1823 = vrot.lane.b32.xlu1 %v1678_v54, %s2928_s26 }
 0x6ff   :  { %1821 = vrot.lane.b32.xlu0 %v4708_v15, %s2928_s26  ;;  %1825 = vrot.lane.b32.xlu1 %v1679_v19, %s2928_s26 }
 0x703   :  { %1827 = vrot.lane.b32.xlu0 %v1680_v30, %s2928_s26  ;;  %1685 = vperm.xlu1 %2595, %v1682_v42  }
 0x721   :  { %v1780_v55 = vpop.permute.xlu0 %1779 }
 0x725   :  { %v1790_v51 = vpop.permute.xlu1 %1789 }
 0x729   :  { %v4260_v7 = vpop.permute.xlu1 %1809  ;;  %v4262_v40 = vpop.permute.xlu0 %1799 }
 0x72d   :  { %v4264_v1 = vpop.permute.xlu0 %1819  ;;  %v1750_v38 = vpop.permute.xlu1 %1749 }
 0x731   :  { %v1758_v16 = vpop.permute.xlu1 %1757  ;;  %v1760_v57 = vpop.permute.xlu0 %1759 }
 0x735   :  { %v1770_v23 = vpop.permute.xlu1 %1769  ;;  %v1768_v17 = vpop.permute.xlu0 %1767 }
 0x739   :  { %v1778_v46 = vpop.permute.xlu1 %1777 }
 0x73d   :  { %v1788_v3 = vpop.permute.xlu0 %1787  ;;  %v1752_v27 = vpop.permute.xlu1 %1751 }
 0x73e   :  { %v1834_v2 = vsel %vm1260_vm0, %v1750_v38, %v1752_v27 }
 0x741   :  { %v1754_v50 = vpop.permute.xlu0 %1753  ;;  %v1764_v8 = vpop.permute.xlu1 %1763 }
 0x742   :  { %v1835_v37 = vsel %vm1260_vm0, %v1752_v27, %v1754_v50 }
 0x743   :  { %1907 = vmatprep.subr.bf16.mxu0 %v1835_v37 }
 0x744   :  { %1908 = vmatpush1.bf16.msra.mxu0 %v1834_v2 }
 0x745   :  { %v1756_v47 = vpop.permute.xlu0 %1755  ;;  %v1766_v49 = vpop.permute.xlu1 %1765 }
 0x746   :  { %v1836_v44 = vsel %vm1260_vm0, %v1754_v50, %v1756_v47  ;;  %v1837_v25 = vsel %vm1260_vm0, %v1756_v47, %v1758_v16  ;;  %v1841_v32 = vsel %vm1260_vm0, %v1766_v49, %v1768_v17  ;;  %v1840_v48 = vsel %vm1260_vm0, %v1764_v8, %v1766_v49 }
 0x747   :  { %1948 = vmatprep.subr.bf16.mxu1 %v1837_v25 }
 0x748   :  { %1949 = vmatpush1.bf16.msra.mxu1 %v1836_v44 }
 0x749   :  { %v1762_v43 = vpop.permute.xlu0 %1761  ;;  %1950 = vmatprep.subr.bf16.mxu1 %v1841_v32  ;;  %v1772_v9 = vpop.permute.xlu1 %1771 }
 0x74a   :  { %v1838_v36 = vsel %vm1260_vm0, %v1760_v57, %v1762_v43  ;;  %v1839_v0 = vsel %vm1260_vm0, %v1762_v43, %v1764_v8  ;;  %v1842_v33 = vsel %vm1260_vm0, %v1770_v23, %v1772_v9 }
 0x74b   :  { %1909 = vmatprep.subr.bf16.mxu0 %v1839_v0 }
 0x74c   :  { %1910 = vmatpush1.bf16.msra.mxu0 %v1838_v36  ;;  %1951 = vmatpush1.bf16.msra.mxu1 %v1840_v48 }
 0x74d   :  { %v1774_v28 = vpop.permute.xlu0 %1773  ;;  %v1784_v60 = vpop.permute.xlu1 %1783 }
 0x74e   :  { %v1843_v6 = vsel %vm1260_vm0, %v1772_v9, %v1774_v28 }
 0x74f   :  { %1911 = vmatprep.subr.bf16.mxu0 %v1843_v6 }
 0x750   :  { %1912 = vmatpush1.bf16.msra.mxu0 %v1842_v33 }
 0x751   :  { %v1776_v34 = vpop.permute.xlu0 %1775  ;;  %v1786_v22 = vpop.permute.xlu1 %1785 }
 0x752   :  { %v1844_v4 = vsel %vm1260_vm0, %v1774_v28, %v1776_v34  ;;  %v1845_v61 = vsel %vm1260_vm0, %v1776_v34, %v1778_v46  ;;  %v1849_v63 = vsel %vm1260_vm0, %v1786_v22, %v1788_v3  ;;  %v1848_v19 = vsel %vm1260_vm0, %v1784_v60, %v1786_v22 }
 0x753   :  { %1952 = vmatprep.subr.bf16.mxu1 %v1845_v61 }
 0x754   :  { %1953 = vmatpush1.bf16.msra.mxu1 %v1844_v4 }
 0x755   :  { %v1782_v54 = vpop.permute.xlu0 %1781  ;;  %1954 = vmatprep.subr.bf16.mxu1 %v1849_v63  ;;  %v1792_v26 = vpop.permute.xlu1 %1791 }
 0x756   :  { %v1846_v45 = vsel %vm1260_vm0, %v1780_v55, %v1782_v54  ;;  %v1847_v52 = vsel %vm1260_vm0, %v1782_v54, %v1784_v60  ;;  %v1850_v42 = vsel %vm1260_vm0, %v1790_v51, %v1792_v26  ;;  %v4709_v60 = vmov 0  }
 0x757   :  { %1913 = vmatprep.subr.bf16.mxu0 %v1847_v52 }
 0x758   :  { %1914 = vmatpush1.bf16.msra.mxu0 %v1846_v45  ;;  %1955 = vmatpush1.bf16.msra.mxu1 %v1848_v19 }
 0x759   :  { %v1794_v59 = vpop.permute.xlu0 %1793  ;;  %v1798_v15 = vpop.permute.xlu1 %1797 }
 0x75a   :  { %v1851_v53 = vsel %vm1260_vm0, %v1792_v26, %v1794_v59 }
 0x75b   :  { %1915 = vmatprep.subr.bf16.mxu0 %v1851_v53  ;;  %v1987_v53 = vld [vmem:[%s4566_s13] sm:$0xff] }
 0x75c   :  { %1916 = vmatpush1.bf16.msra.mxu0 %v1850_v42 }
 0x75d   :  { %v1796_v30 = vpop.permute.xlu0 %1795  ;;  %v1804_v38 = vpop.permute.xlu1 %1803 }
 0x75e   :  { %v1852_v16 = vsel %vm1260_vm0, %v1794_v59, %v1796_v30  ;;  %v1853_v55 = vsel %vm1260_vm0, %v1796_v30, %v1798_v15 }
 0x75f   :  { %1956 = vmatprep.subr.bf16.mxu1 %v1853_v55 }
 0x760   :  { %1957 = vmatpush1.bf16.msra.mxu1 %v1852_v16 }
 0x761   :  { %v1802_v57 = vpop.permute.xlu0 %1801  ;;  %v1806_v23 = vpop.permute.xlu1 %1805 }
 0x762   :  { %v1854_v17 = vsel %vm1260_vm0, %v4262_v40, %v1802_v57  ;;  %v1855_v46 = vsel %vm1260_vm0, %v1802_v57, %v1804_v38  ;;  %v1856_v50 = vsel %vm1260_vm0, %v1804_v38, %v1806_v23 }
 0x763   :  { %1917 = vmatprep.subr.bf16.mxu0 %v1855_v46 }
 0x764   :  { %1918 = vmatpush1.bf16.msra.mxu0 %v1854_v17 }
 0x765   :  { %v1808_v51 = vpop.permute.xlu0 %1807  ;;  %v1812_v3 = vpop.permute.xlu1 %1811 }
 0x766   :  { %v1857_v27 = vsel %vm1260_vm0, %v1806_v23, %v1808_v51  ;;  %v1858_v47 = vsel %vm1260_vm0, %v4260_v7, %v1812_v3  ;;  %v2552_v7 = vcombine.low %v4225_v21, %v4225_v21 }
 0x767   :  { %1958 = vmatprep.subr.bf16.mxu1 %v1857_v27 }
 0x768   :  { %1959 = vmatpush1.bf16.msra.mxu1 %v1856_v50 }
 0x769   :  { %v1814_v8 = vpop.permute.xlu0 %1813  ;;  %v1818_v37 = vpop.permute.xlu1 %1817 }
 0x76a   :  { %v1859_v2 = vsel %vm1260_vm0, %v1812_v3, %v1814_v8 }
 0x76b   :  { %1919 = vmatprep.subr.bf16.mxu0 %v1859_v2 }
 0x76c   :  { %1920 = vmatpush1.bf16.msra.mxu0 %v1858_v47 }
 0x76d   :  { %v1816_v40 = vpop.permute.xlu0 %1815  ;;  %v1824_v44 = vpop.permute.xlu1 %1823 }
 0x76e   :  { %v1860_v49 = vsel %vm1260_vm0, %v1814_v8, %v1816_v40  ;;  %v1861_v25 = vsel %vm1260_vm0, %v1816_v40, %v1818_v37  ;;  %v1988_v8 = vld [vmem:[%s4567_s14] sm:$0xff] }
 0x76f   :  { %1960 = vmatprep.subr.bf16.mxu1 %v1861_v25 }
 0x770   :  { %1961 = vmatpush1.bf16.msra.mxu1 %v1860_v49 }
 0x771   :  { %v1822_v32 = vpop.permute.xlu0 %1821  ;;  %v1826_v36 = vpop.permute.xlu1 %1825 }
 0x772   :  { %v1862_v43 = vsel %vm1260_vm0, %v4264_v1, %v1822_v32  ;;  %v1863_v9 = vsel %vm1260_vm0, %v1822_v32, %v1824_v44  ;;  %v1864_v28 = vsel %vm1260_vm0, %v1824_v44, %v1826_v36 }
 0x773   :  { %1921 = vmatprep.subr.bf16.mxu0 %v1863_v9 }
 0x774   :  { %1922 = vmatpush1.bf16.msra.mxu0 %v1862_v43 }
 0x775   :  { %v1828_v0 = vpop.permute.xlu0 %1827 }
 0x776   :  { %v1865_v48 = vsel %vm1260_vm0, %v1826_v36, %v1828_v0 }
 0x777   :  { %1938 = vmatmul.mubr.bf16.vlgmr.msra.gmra.mrb[4].mxu0 %v2552_v7  ;;  %1962 = vmatprep.subr.bf16.mxu1 %v1865_v48 }
 0x778   :  { %1963 = vmatpush1.bf16.msra.mxu1 %v1864_v28  ;;  %2441 = vmatprep.mubr.bf16.mxu0 %v4709_v60 }
 0x77b   :  { %1979 = vmatmul.mubr.bf16.vlgmr.msra.gmra.mrb[12].mxu1 %v2552_v7 }
 0x782   :  { %v1686_v1 = vpop.permute.xlu1 %1685 }
 0x84a   :  { %v1939_v6 = vpop.f32.mrb[4].mxu0 }
 0x84b   :  { %v1940_v33 = vadd.f32 %v1939_v6, %v1686_v1  ;;  %v1941_v34 = vpop.f32.mrb[5].mxu0 }
 0x84c   :  { %v1942_v22 = vadd.f32 %v1941_v34, %v1686_v1  ;;  %v1943_v4 = vpop.f32.mrb[6].mxu0 }
 0x84d   :  { %v1944_v21 = vpop.f32.mrb[7].mxu0 }
 0x84e   :  { %v1989_v61 = vadd.f32 %v1942_v22, %v1940_v33  ;;  %v1980_v63 = vpop.f32.mrb[12].mxu1  ;;  %v4710_v21 = vld [vmem:[#allocation12_spill] sm:$0xff] }
 0x84f   :  { %v1981_v54 = vadd.f32 %v1980_v63, %v1686_v1  ;;  %v1982_v26 = vpop.f32.mrb[13].mxu1  ;;  %v4711_v63 = vld [vmem:[#allocation10_spill] sm:$0xff] }
 0x850   :  { %v1983_v45 = vadd.f32 %v1982_v26, %v1686_v1  ;;  %v1984_v52 = vpop.f32.mrb[14].mxu1  ;;  %v4712_v26 = vld [vmem:[#allocation11_spill] sm:$0xff] }
 0x851   :  { %v1990_v19 = vadd.f32 %v1989_v61, %v1981_v54  ;;  %v1985_v59 = vpop.f32.mrb[15].mxu1 }
 0x853   :  { %v1991_v15 = vadd.f32 %v1990_v19, %v1983_v45  ;;  %v4713_v19 = vld [vmem:[#allocation13_spill] sm:$0xff] }
 0x855   :  { %1992 = vadd.xlane.f32.xlu0 %v1991_v15  ;;  %v4714_v15 = vld [vmem:[#allocation14_spill] sm:$0xff] }
 0x86b   :  { %2018 = vperm.xlu0 %2594, %v1987_v53  }
 0x8e2   :  { %v1993_v42 = vpop.xlane.xlu0 %1992 }
 0x8e3   :  { %v1995_v30 = vmul.f32 0.001953125, %v1993_v42  ;;  %v4715_v42 = vld [vmem:[#allocation15_spill] sm:$0xff] }
 0x8e5   :  { %v1996_v38 = vsub.f32 %v1940_v33, %v1995_v30  ;;  %v1997_v16 = vsub.f32 %v1942_v22, %v1995_v30  ;;  %v1998_v55 = vsub.f32 %v1981_v54, %v1995_v30  ;;  %v1999_v57 = vsub.f32 %v1983_v45, %v1995_v30 }
 0x8e7   :  { %v2000_v23 = vmul.f32 %v1996_v38, %v1996_v38  ;;  %v2001_v17 = vmul.f32 %v1997_v16, %v1997_v16  ;;  %v2002_v46 = vmul.f32 %v1998_v55, %v1998_v55  ;;  %v2003_v3 = vmul.f32 %v1999_v57, %v1999_v57 }
 0x8e9   :  { %v2004_v51 = vadd.f32 %v2001_v17, %v2000_v23  ;;  %v4717_v23 = vld [vmem:[#allocation18_spill] sm:$0xff] }
 0x8ea   :  { %v2019_v32 = vpop.permute.xlu0 %2018 }
 0x8eb   :  { %v2005_v27 = vadd.f32 %v2004_v51, %v2002_v46  ;;  %v4718_v46 = vld [vmem:[#allocation19_spill] sm:$0xff] }
 0x8ed   :  { %v2006_v50 = vadd.f32 %v2005_v27, %v2003_v3  ;;  %v4719_v27 = vld [vmem:[#allocation16_spill] sm:$0xff] }
 0x8ef   :  { %2007 = vadd.xlane.f32.xlu1 %v2006_v50 }
 0x900   :  { %2027 = vperm.xlu1 %2595, %v1988_v8   ;;  %v4720_v8 = vld [vmem:[#allocation24_spill] sm:$0xff] }
 0x97c   :  { %v2008_v37 = vpop.xlane.xlu1 %2007 }
 0x97d   :  { %v2009_v2 = vmul.f32 0.001953125, %v2008_v37 }
 0x97f   :  { %v2010_v47 = vadd.f32 1e-05, %v2009_v2  ;;  %v4721_v2 = vld [vmem:[#allocation28_spill] sm:$0xff] }
 0x980   :  { %v2028_v36 = vpop.permute.xlu1 %2027 }
 0x981   :  { %2899 = vrsqrt.f32 %v2010_v47 }
 0x98b   :  { %v2900_v40 = vpop.eup %2899 }
 0x98c   :  { %v2012_v49 = vmul.f32 %v2900_v40, %v1996_v38  ;;  %v2013_v44 = vmul.f32 %v2900_v40, %v1997_v16  ;;  %v2014_v25 = vmul.f32 %v2900_v40, %v1998_v55  ;;  %v4716_v16 = vld [vmem:[#allocation17_spill] sm:$0xff] }
 0x98e   :  { %v2021_v43 = vmul.f32 %v2019_v32, %v2012_v49  ;;  %v2022_v9 = vmul.f32 %v2019_v32, %v2013_v44  ;;  %v2023_v7 = vmul.f32 %v2019_v32, %v2014_v25  ;;  %v2015_v49 = vmul.f32 %v2900_v40, %v1999_v57  ;;  %v4722_v25 = vld [vmem:[#allocation2_spill] sm:$0xff] }
 0x990   :  { %v2030_v0 = vadd.f32 %v2028_v36, %v2021_v43  ;;  %v2031_v48 = vadd.f32 %v2028_v36, %v2022_v9  ;;  %v2032_v28 = vadd.f32 %v2028_v36, %v2023_v7  ;;  %v4723_v9 = vld [vmem:[#allocation20_spill] sm:$0xff] }
 0x992   :  { %vm2034_vm7 = vcmp.ge.f32.partialorder %v2030_v0, 0.0  ;;  %vm2035_vm10 = vcmp.ge.f32.partialorder %v2031_v48, 0.0  ;;  %vm2036_vm11 = vcmp.ge.f32.partialorder %v2032_v28, 0.0  ;;  %v2038_v1 = vmul.f32 0.2, %v2030_v0 }
 0x993   :  { %v2039_v6 = vmul.f32 0.2, %v2031_v48  ;;  %v2040_v33 = vmul.f32 0.2, %v2032_v28 }
 0x994   :  { %v4310_v34 = vsel %vm2034_vm7, %v2030_v0, %v2038_v1  ;;  %v4724_v0 = vld [vmem:[#allocation22_spill] sm:$0xff] }
 0x995   :  { %v4312_v22 = vsel %vm2035_vm10, %v2031_v48, %v2039_v6  ;;  %v4314_v4 = vsel %vm2036_vm11, %v2032_v28, %v2040_v33  ;;  %v2050_v54 = vmul.f32 %v4310_v34, %v4711_v63  ;;  %v2054_v59 = vmul.f32 %v4310_v34, %v4713_v19  ;;  %v4725_v6 = vld [vmem:[#allocation3_spill] sm:$0xff]  ;;  %v4726_v63 = vld [vmem:[#allocation4_spill] sm:$0xff] }
 0x996   :  { %v2052_v61 = vmul.f32 %v4314_v4, %v4710_v21  ;;  %v2051_v45 = vmul.f32 %v4312_v22, %v4712_v26  ;;  %v2055_v53 = vmul.f32 %v4312_v22, %v4714_v15  ;;  %v2056_v30 = vmul.f32 %v4314_v4, %v4715_v42  ;;  %v4728_v15 = vld [vmem:[#allocation29_spill] sm:$0xff] }
 0x997   :  { %v2058_v55 = vmul.f32 %v4310_v34, %v4716_v16  ;;  %v2059_v17 = vmul.f32 %v4312_v22, %v4717_v23  ;;  %v2060_v51 = vmul.f32 %v4314_v4, %v4718_v46  ;;  %v2062_v50 = vmul.f32 %v4310_v34, %v4719_v27 }
 0x998   :  { %2090 = vrot.lane.b32.xlu1 %v2052_v61, %s2916_s30  ;;  %v2796_v52 = vpack.i.bf16 %v2051_v45, %v2050_v54  ;;  %v2801_v38 = vpack.i.bf16 %v2055_v53, %v2054_v59  ;;  %v2063_v37 = vmul.f32 %v4312_v22, %v4720_v8  ;;  %v2064_v47 = vmul.f32 %v4314_v4, %v4721_v2 }
 0x999   :  { %v2806_v3 = vpack.i.bf16 %v2059_v17, %v2058_v55  ;;  %v2066_v43 = vmul.f32 %v4310_v34, %v4722_v25  ;;  %v2067_v7 = vmul.f32 %v4312_v22, %v4723_v9  ;;  %v2068_v48 = vmul.f32 %v4314_v4, %v4724_v0 }
 0x99a   :  { %2797 = vrot.lane.b32.xlu0 %v2796_v52, %s2916_s30  ;;  %v2811_v44 = vpack.i.bf16 %v2063_v37, %v2062_v50  ;;  %v2024_v28 = vmul.f32 %v2019_v32, %v2015_v49  ;;  %v2070_v57 = vmul.f32 %v4310_v34, %v4725_v6  ;;  %v2071_v40 = vmul.f32 %v4312_v22, %v3473_v10 }
 0x99b   :  { %v2816_v1 = vpack.i.bf16 %v2067_v7, %v2066_v43  ;;  %v2072_v33 = vmul.f32 %v4314_v4, %v3480_v11  ;;  %v2074_v32 = vmul.f32 %v4310_v34, %v4726_v63  ;;  %v2075_v54 = vmul.f32 %v4312_v22, %v3488_v13  ;;  %v4729_v7 = vld [vmem:[#allocation26_spill] sm:$0xff] }
 0x99c   :  { %2111 = vrot.lane.b32.xlu1 %v2056_v30, %s2920_s3  ;;  %v2033_v21 = vadd.f32 %v2028_v36, %v2024_v28  ;;  %v2821_v61 = vpack.i.bf16 %v2071_v40, %v2070_v57  ;;  %v2076_v10 = vmul.f32 %v4314_v4, %v3491_v14  ;;  %v4727_v36 = vld [vmem:[#allocation5_spill] sm:$0xff]  ;;  %v2079_v52 = vmul.f32 %v4312_v22, %v3527_v39 }
 0x99d   :  { %v2826_v11 = vpack.i.bf16 %v2075_v54, %v2074_v32  ;;  %v2078_v45 = vmul.f32 %v4310_v34, %v4727_v36  ;;  %v2080_v13 = vmul.f32 %v4314_v4, %v3543_v35  ;;  %v2047_v0 = vmul.f32 %v4312_v22, %v4729_v7  ;;  %v4732_v36 = vld [vmem:[#allocation7_spill] sm:$0xff] }
 0x99e   :  { %2802 = vrot.lane.b32.xlu0 %v2801_v38, %s2920_s3  ;;  %v2041_v26 = vmul.f32 0.2, %v2033_v21  ;;  %vm2037_vm12 = vcmp.ge.f32.partialorder %v2033_v21, 0.0 }
 0x99f   :  { %v2831_v14 = vpack.i.bf16 %v2079_v52, %v2078_v45 }
 0x9a0   :  { %2132 = vrot.lane.b32.xlu1 %v2060_v51, %s2922_s23  ;;  %v4378_v19 = vsel %vm2037_vm12, %v2033_v21, %v2041_v26  ;;  %v4731_v26 = vld [vmem:[#allocation21_spill] sm:$0xff] }
 0x9a1   :  { %v2057_v59 = vmul.f32 %v4378_v19, %v4683_v24  ;;  %v2053_v39 = vmul.f32 %v4378_v19, %v4682_v18  ;;  %v2065_v35 = vmul.f32 %v4378_v19, %v4728_v15  ;;  %v2061_v53 = vmul.f32 %v4378_v19, %v4684_v20 }
 0x9a2   :  { %2807 = vrot.lane.b32.xlu0 %v2806_v3, %s2922_s23  ;;  %v2073_v24 = vmul.f32 %v4378_v19, %v3484_v12  ;;  %v2069_v18 = vmul.f32 %v4378_v19, %v4685_v41  ;;  %v2081_v42 = vmul.f32 %v4378_v19, %v3777_v56  ;;  %v2077_v20 = vmul.f32 %v4378_v19, %v4686_v31 }
 0x9a4   :  { %2153 = vrot.lane.b32.xlu1 %v2064_v47, %s2923_s24 }
 0x9a6   :  { %2812 = vrot.lane.b32.xlu0 %v2811_v44, %s2923_s24 }
 0x9a8   :  { %2173 = vrot.lane.b32.xlu1 %v2068_v48, %s2924_s25 }
 0x9aa   :  { %2817 = vrot.lane.b32.xlu0 %v2816_v1, %s2924_s25 }
 0x9ac   :  { %2194 = vrot.lane.b32.xlu1 %v2072_v33, %s2929_s4 }
 0x9ae   :  { %2822 = vrot.lane.b32.xlu0 %v2821_v61, %s2929_s4  ;;  %v4730_v61 = vld [vmem:[#allocation27_spill] sm:$0xff] }
 0x9af   :  { %v2046_v63 = vmul.f32 %v4310_v34, %v4730_v61  ;;  %v4733_v34 = vld [vmem:[#allocation30_spill] sm:$0xff] }
 0x9b0   :  { %2215 = vrot.lane.b32.xlu1 %v2076_v10, %s2930_s29 }
 0x9b2   :  { %2827 = vrot.lane.b32.xlu0 %v2826_v11, %s2930_s29 }
 0x9b4   :  { %2236 = vrot.lane.b32.xlu1 %v2080_v13, %s2931_s9 }
 0x9b6   :  { %2832 = vrot.lane.b32.xlu0 %v2831_v14, %s2931_s9 }
 0x9b8   :  { %2113 = vrot.lane.b32.xlu1 %v2057_v59, %s2920_s3  ;;  %v4734_v59 = vld [vmem:[#allocation6_spill] sm:$0xff] }
 0x9ba   :  { %2092 = vrot.lane.b32.xlu0 %v2053_v39, %s2916_s30 }
 0x9bc   :  { %2155 = vrot.lane.b32.xlu1 %v2065_v35, %s2923_s24 }
 0x9be   :  { %2134 = vrot.lane.b32.xlu0 %v2061_v53, %s2922_s23 }
 0x9c0   :  { %2196 = vrot.lane.b32.xlu1 %v2073_v24, %s2929_s4 }
 0x9c2   :  { %2175 = vrot.lane.b32.xlu0 %v2069_v18, %s2924_s25 }
 0x9c4   :  { %2238 = vrot.lane.b32.xlu1 %v2081_v42, %s2931_s9 }
 0x9c6   :  { %2217 = vrot.lane.b32.xlu0 %v2077_v20, %s2930_s29 }
 0xa0a   :  { %v4406_v30 = vpop.permute.xlu1 %2090 }
 0xa0c   :  { %v2798_v12 = vpop.permute.xlu0 %2797 }
 0xa0d   :  { %v2800_v50 = vunpack.i.h.bf16 %v2798_v12  ;;  %v2799_v44 = vunpack.i.l.bf16 %v2798_v12 }
 0xa0e   :  { %v4408_v16 = vpop.permute.xlu1 %2111 }
 0xa0f   :  { %v2096_v49 = vsel %vm289_vm2, %v2800_v50, %v4406_v30  ;;  %v2095_v33 = vsel %vm289_vm2, %v2799_v44, %v2800_v50  ;;  %v2094_v11 = vsel %vm289_vm2, %v4731_v26, %v2799_v44 }
 0xa10   :  { %v2803_v38 = vpop.permute.xlu0 %2802  ;;  %v2251_v57 = vpack.c.bf16 %v2096_v49, %v2047_v0  ;;  %v2250_v32 = vpack.c.bf16 %v2095_v33, %v2046_v63  ;;  %v2249_v39 = vpack.c.bf16 %v2094_v11, %v4734_v59  ;;  %v4735_v0 = vld [vmem:[#allocation32_spill] sm:$0xff] }
 0xa11   :  { %v2805_v1 = vunpack.i.h.bf16 %v2803_v38  ;;  %v2804_v6 = vunpack.i.l.bf16 %v2803_v38 }
 0xa12   :  { %v4410_v41 = vpop.permute.xlu1 %2132 }
 0xa13   :  { %v2116_v22 = vsel %vm305_vm3, %v2804_v6, %v2805_v1  ;;  %v2115_v13 = vsel %vm305_vm3, %v4733_v34, %v2804_v6  ;;  %v2117_v42 = vsel %vm305_vm3, %v2805_v1, %v4408_v16  ;;  %v2048_v1 = vmul.f32 %v4314_v4, %v4735_v0 }
 0xa14   :  { %v2808_v55 = vpop.permute.xlu0 %2807 }
 0xa15   :  { %v2810_v25 = vunpack.i.h.bf16 %v2808_v55  ;;  %v2809_v43 = vunpack.i.l.bf16 %v2808_v55 }
 0xa16   :  { %v4414_v56 = vpop.permute.xlu1 %2153 }
 0xa17   :  { %v2137_v21 = vsel %vm361_vm6, %v2809_v43, %v2810_v25  ;;  %v2136_v45 = vsel %vm361_vm6, %v4732_v36, %v2809_v43  ;;  %v2138_v35 = vsel %vm361_vm6, %v2810_v25, %v4410_v41 }
 0xa18   :  { %v4412_v23 = vpop.permute.xlu0 %2812  ;;  %v2255_v54 = vpack.c.bf16 %v2137_v21, %v2116_v22  ;;  %v2254_v15 = vpack.c.bf16 %v2136_v45, %v2115_v13  ;;  %v2256_v38 = vpack.c.bf16 %v2138_v35, %v2117_v42  ;;  %v4736_v21 = vld [vmem:[#allocation31_spill] sm:$0xff] }
 0xa19   :  { %v2814_v46 = vunpack.i.l.bf16 %v4412_v23  ;;  %v2815_v14 = vunpack.i.h.bf16 %v4412_v23  ;;  %v2049_v61 = vmul.f32 %v4378_v19, %v4736_v21 }
 0xa1a   :  { %v4420_v27 = vpop.permute.xlu1 %2173 }
 0xa1b   :  { %v2158_v20 = vsel %vm377_vm8, %v2815_v14, %v4414_v56 }
 0xa1c   :  { %v2818_v17 = vpop.permute.xlu0 %2817 }
 0xa1d   :  { %v2819_v51 = vunpack.i.l.bf16 %v2818_v17  ;;  %v2820_v52 = vunpack.i.h.bf16 %v2818_v17 }
 0xa1e   :  { %v4427_v48 = vpop.permute.xlu1 %2194 }
 0xa1f   :  { %v2259_v31 = vpack.c.bf16 %v2819_v51, %v2814_v46  ;;  %v2178_v53 = vsel %vm393_vm9, %v2820_v52, %v4420_v27  ;;  %v2177_v17 = vsel %vm393_vm9, %v2819_v51, %v2820_v52 }
 0xa20   :  { %v4417_v3 = vpop.permute.xlu0 %2822  ;;  %v2261_v55 = vpack.c.bf16 %v2178_v53, %v2158_v20 }
 0xa21   :  { %2326 = vrot.lane.b32.xlu0 %v2259_v31, %s2928_s26  ;;  %v2824_v37 = vunpack.i.l.bf16 %v4417_v3  ;;  %v2825_v12 = vunpack.i.h.bf16 %v4417_v3 }
 0xa22   :  { %v4437_v10 = vpop.permute.xlu1 %2215 }
 0xa24   :  { %v2828_v8 = vpop.permute.xlu0 %2827 }
 0xa25   :  { %v2829_v2 = vunpack.i.l.bf16 %v2828_v8  ;;  %v2830_v24 = vunpack.i.h.bf16 %v2828_v8  ;;  %v2157_v8 = vsel %vm377_vm8, %v2814_v46, %v2815_v14 }
 0xa26   :  { %v2237_v18 = vpop.permute.xlu1 %2236  ;;  %v2260_v49 = vpack.c.bf16 %v2177_v17, %v2157_v8 }
 0xa27   :  { %v2264_v47 = vpack.c.bf16 %v2829_v2, %v2824_v37  ;;  %v2219_v31 = vsel %vm1571_vm5, %v2829_v2, %v2830_v24  ;;  %v2220_v3 = vsel %vm1571_vm5, %v2830_v24, %v4437_v10  ;;  %v2199_v2 = vsel %vm1525_vm4, %v2825_v12, %v4427_v48 }
 0xa28   :  { %v2833_v9 = vpop.permute.xlu0 %2832 }
 0xa29   :  { %v2834_v28 = vunpack.i.l.bf16 %v2833_v9  ;;  %2336 = vrot.lane.b32.xlu1 %v2264_v47, %s2928_s26  ;;  %v2835_v50 = vunpack.i.h.bf16 %v2833_v9  ;;  %v2198_v47 = vsel %vm1525_vm4, %v2824_v37, %v2825_v12  ;;  %v2266_v9 = vpack.c.bf16 %v2220_v3, %v2199_v2 }
 0xa2a   :  { %v2265_v44 = vpack.c.bf16 %v2219_v31, %v2198_v47  ;;  %v2114_v25 = vpop.permute.xlu1 %2113 }
 0xa2b   :  { %v2269_v40 = vpack.c.bf16 %v2834_v28, %v2834_v28  ;;  %v2240_v43 = vsel %vm1617_vm1, %v2834_v28, %v2835_v50  ;;  %v2241_v37 = vsel %vm1617_vm1, %v2835_v50, %v2237_v18  ;;  %v2118_v4 = vsel %vm305_vm3, %v4408_v16, %v2114_v25 }
 0xa2c   :  { %v2093_v23 = vpop.permute.xlu0 %2092  ;;  %v2270_v46 = vpack.c.bf16 %v2240_v43, %v2240_v43  ;;  %v2271_v28 = vpack.c.bf16 %v2241_v37, %v2241_v37  ;;  %vm2392_vm3 = vcmask 588800  }
 0xa2d   :  { %2346 = vrot.lane.b32.xlu0 %v2269_v40, %s2928_s26  ;;  %2310 = vrot.lane.b32.xlu1 %v2251_v57, %s2928_s26  ;;  %v2097_v7 = vsel %vm289_vm2, %v4406_v30, %v2093_v23  ;;  %v2253_v30 = vpack.c.bf16 %v2093_v23, %v2049_v61  ;;  %vm2396_vm2 = vcmask 1043456  }
 0xa2e   :  { %v2156_v6 = vpop.permute.xlu1 %2155  ;;  %v2252_v57 = vpack.c.bf16 %v2097_v7, %v2048_v1 }
 0xa2f   :  { %v2159_v19 = vsel %vm377_vm8, %v4414_v56, %v2156_v6 }
 0xa30   :  { %v2135_v51 = vpop.permute.xlu0 %2134 }
 0xa31   :  { %2318 = vrot.lane.b32.xlu1 %v2255_v54, %s2928_s26  ;;  %2308 = vrot.lane.b32.xlu0 %v2250_v32, %s2928_s26  ;;  %v2139_v33 = vsel %vm361_vm6, %v4410_v41, %v2135_v51  ;;  %v2258_v41 = vpack.c.bf16 %v2135_v51, %v2114_v25 }
 0xa32   :  { %v2257_v63 = vpack.c.bf16 %v2139_v33, %v2118_v4  ;;  %v2197_v22 = vpop.permute.xlu1 %2196 }
 0xa34   :  { %v2176_v40 = vpop.permute.xlu0 %2175 }
 0xa35   :  { %2316 = vrot.lane.b32.xlu1 %v2254_v15, %s2928_s26  ;;  %2306 = vrot.lane.b32.xlu0 %v2249_v39, %s2928_s26  ;;  %v2179_v32 = vsel %vm393_vm9, %v4420_v27, %v2176_v40  ;;  %v2180_v11 = vsel %vm393_vm9, %v2176_v40, %v4134_v5  ;;  %v2200_v27 = vsel %vm1525_vm4, %v4427_v48, %v2197_v22 }
 0xa36   :  { %v2262_v26 = vpack.c.bf16 %v2179_v32, %v2159_v19  ;;  %v2239_v36 = vpop.permute.xlu1 %2238  ;;  %v2263_v45 = vpack.c.bf16 %v2180_v11, %v2156_v6  ;;  %v2201_v5 = vsel %vm1525_vm4, %v2197_v22, %v4183_v29 }
 0xa37   :  { %v2242_v56 = vsel %vm1617_vm1, %v2237_v18, %v2239_v36  ;;  %v2243_v14 = vsel %vm1617_vm1, %v2239_v36, %v4243_v62 }
 0xa38   :  { %v2218_v54 = vpop.permute.xlu0 %2217  ;;  %v2273_v48 = vpack.c.bf16 %v2243_v14, %v2243_v14 }
 0xa39   :  { %2330 = vrot.lane.b32.xlu1 %v2261_v55, %s2928_s26  ;;  %2320 = vrot.lane.b32.xlu0 %v2256_v38, %s2928_s26  ;;  %v2221_v16 = vsel %vm1571_vm5, %v4437_v10, %v2218_v54  ;;  %v2222_v34 = vsel %vm1571_vm5, %v2218_v54, %v4195_v58  ;;  %v2272_v10 = vpack.c.bf16 %v2242_v56, %v2242_v56  ;;  %v2275_v58 = vld [vmem:[%s4568_s16] sm:$0x7] }
 0xa3a   :  { %v2267_v52 = vpack.c.bf16 %v2221_v16, %v2200_v27  ;;  %v2268_v13 = vpack.c.bf16 %v2222_v34, %v2201_v5 }
 0xa3d   :  { %2338 = vrot.lane.b32.xlu1 %v2265_v44, %s2928_s26  ;;  %2328 = vrot.lane.b32.xlu0 %v2260_v49, %s2928_s26 }
 0xa41   :  { %2348 = vrot.lane.b32.xlu1 %v2270_v46, %s2928_s26  ;;  %2340 = vrot.lane.b32.xlu0 %v2266_v9, %s2928_s26  ;;  %v2274_v9 = vld [vmem:[%s4569_s15] sm:$0x3] }
 0xa45   :  { %2312 = vrot.lane.b32.xlu1 %v2252_v57, %s2928_s26  ;;  %2350 = vrot.lane.b32.xlu0 %v2271_v28, %s2928_s26 }
 0xa49   :  { %2322 = vrot.lane.b32.xlu1 %v2257_v63, %s2928_s26  ;;  %2314 = vrot.lane.b32.xlu0 %v2253_v30, %s2928_s26 }
 0xa4d   :  { %2332 = vrot.lane.b32.xlu1 %v2262_v26, %s2928_s26  ;;  %2324 = vrot.lane.b32.xlu0 %v2258_v41, %s2928_s26 }
 0xa51   :  { %2342 = vrot.lane.b32.xlu1 %v2267_v52, %s2928_s26  ;;  %2334 = vrot.lane.b32.xlu0 %v2263_v45, %s2928_s26 }
 0xa55   :  { %2352 = vrot.lane.b32.xlu1 %v2272_v10, %s2928_s26  ;;  %2344 = vrot.lane.b32.xlu0 %v2268_v13, %s2928_s26 }
 0xa59   :  { %2278 = vperm.xlu1 %2595, %v2275_v58   ;;  %2354 = vrot.lane.b32.xlu0 %v2273_v48, %s2928_s26 }
 0xa93   :  { %v2327_v59 = vpop.permute.xlu0 %2326 }
 0xa9b   :  { %v2337_v39 = vpop.permute.xlu1 %2336 }
 0xa9f   :  { %v2347_v29 = vpop.permute.xlu0 %2346  ;;  %v2311_v15 = vpop.permute.xlu1 %2310 }
 0xaa3   :  { %v2319_v35 = vpop.permute.xlu1 %2318  ;;  %v2309_v53 = vpop.permute.xlu0 %2308 }
 0xaa4   :  { %v2357_v62 = vsel %vm1260_vm0, %v2309_v53, %v2311_v15 }
 0xaa5   :  { %2409 = vmatprep.subr.bf16.mxu0 %v2357_v62 }
 0xaa7   :  { %v2317_v24 = vpop.permute.xlu1 %2316  ;;  %v2307_v18 = vpop.permute.xlu0 %2306 }
 0xaa8   :  { %v2356_v42 = vsel %vm1260_vm0, %v2307_v18, %v2309_v53  ;;  %v2360_v55 = vsel %vm1260_vm0, %v2317_v24, %v2319_v35 }
 0xaa9   :  { %2410 = vmatpush1.bf16.msra.mxu0 %v2356_v42 }
 0xaab   :  { %v2331_v20 = vpop.permute.xlu1 %2330  ;;  %v2321_v12 = vpop.permute.xlu0 %2320 }
 0xaac   :  { %v2361_v38 = vsel %vm1260_vm0, %v2319_v35, %v2321_v12 }
 0xaad   :  { %2411 = vmatprep.subr.bf16.mxu0 %v2361_v38 }
 0xaae   :  { %2412 = vmatpush1.bf16.msra.mxu0 %v2360_v55 }
 0xaaf   :  { %v2339_v23 = vpop.permute.xlu1 %2338  ;;  %v2329_v17 = vpop.permute.xlu0 %2328 }
 0xab0   :  { %v2364_v31 = vsel %vm1260_vm0, %v2327_v59, %v2329_v17  ;;  %v2365_v50 = vsel %vm1260_vm0, %v2329_v17, %v2331_v20  ;;  %v2368_v44 = vsel %vm1260_vm0, %v2337_v39, %v2339_v23 }
 0xab1   :  { %2413 = vmatprep.subr.bf16.mxu0 %v2365_v50 }
 0xab2   :  { %2414 = vmatpush1.bf16.msra.mxu0 %v2364_v31 }
 0xab3   :  { %v2349_v8 = vpop.permute.xlu1 %2348  ;;  %v2341_v47 = vpop.permute.xlu0 %2340 }
 0xab4   :  { %v2369_v49 = vsel %vm1260_vm0, %v2339_v23, %v2341_v47  ;;  %v2372_v25 = vsel %vm1260_vm0, %v2347_v29, %v2349_v8 }
 0xab5   :  { %2415 = vmatprep.subr.bf16.mxu0 %v2369_v49  ;;  %v2398_v2 = vsel %vm2396_vm2, %v2372_v25, 0 }
 0xab6   :  { %2416 = vmatpush1.bf16.msra.mxu0 %v2368_v44 }
 0xab7   :  { %v2313_v3 = vpop.permute.xlu1 %2312  ;;  %v2351_v43 = vpop.permute.xlu0 %2350 }
 0xab8   :  { %v2373_v51 = vsel %vm1260_vm0, %v2349_v8, %v2351_v43  ;;  %v2358_v0 = vsel %vm1260_vm0, %v2311_v15, %v2313_v3 }
 0xab9   :  { %2556 = vmatprep.subr.msk.bf16.mxu0 %vm2396_vm2, %v2373_v51 }
 0xaba   :  { %2418 = vmatpush1.bf16.msra.mxu0 %v2398_v2 }
 0xabb   :  { %v2323_v46 = vpop.permute.xlu1 %2322  ;;  %v2315_v37 = vpop.permute.xlu0 %2314 }
 0xabc   :  { %v2359_v7 = vsel %vm1260_vm0, %v2313_v3, %v2315_v37  ;;  %v2362_v57 = vsel %vm1260_vm0, %v2321_v12, %v2323_v46 }
 0xabd   :  { %2557 = vmatmul.mubr.msk.bf16.vlgmr.msra.gmra.mrb[8].mxu0 %vm2392_vm3, %v2274_v9  ;;  %2450 = vmatprep.subr.bf16.mxu0 %v2359_v7 }
 0xabe   :  { %2451 = vmatpush1.bf16.msra.mxu0 %v2358_v0  ;;  %2482 = vmatprep.mubr.bf16.mxu0 %v4709_v60 }
 0xabf   :  { %v2333_v1 = vpop.permute.xlu1 %2332  ;;  %v2325_v6 = vpop.permute.xlu0 %2324 }
 0xac0   :  { %v2363_v28 = vsel %vm1260_vm0, %v2323_v46, %v2325_v6  ;;  %v2366_v61 = vsel %vm1260_vm0, %v2331_v20, %v2333_v1 }
 0xac1   :  { %2452 = vmatprep.subr.bf16.mxu0 %v2363_v28 }
 0xac2   :  { %2453 = vmatpush1.bf16.msra.mxu0 %v2362_v57 }
 0xac3   :  { %v2343_v40 = vpop.permute.xlu1 %2342  ;;  %v2335_v33 = vpop.permute.xlu0 %2334 }
 0xac4   :  { %v2367_v21 = vsel %vm1260_vm0, %v2333_v1, %v2335_v33  ;;  %v2370_v63 = vsel %vm1260_vm0, %v2341_v47, %v2343_v40 }
 0xac5   :  { %2454 = vmatprep.subr.bf16.mxu0 %v2367_v21 }
 0xac6   :  { %2455 = vmatpush1.bf16.msra.mxu0 %v2366_v61 }
 0xac7   :  { %v2353_v4 = vpop.permute.xlu1 %2352  ;;  %v2345_v30 = vpop.permute.xlu0 %2344 }
 0xac8   :  { %v2371_v60 = vsel %vm1260_vm0, %v2343_v40, %v2345_v30  ;;  %v2374_v22 = vsel %vm1260_vm0, %v2351_v43, %v2353_v4 }
 0xac9   :  { %2456 = vmatprep.subr.bf16.mxu0 %v2371_v60  ;;  %v2404_v19 = vsel %vm2396_vm2, %v2374_v22, 0 }
 0xaca   :  { %2457 = vmatpush1.bf16.msra.mxu0 %v2370_v63 }
 0xacb   :  { %v2355_v32 = vpop.permute.xlu0 %2354 }
 0xacc   :  { %v2375_v54 = vsel %vm1260_vm0, %v2353_v4, %v2355_v32 }
 0xacd   :  { %2558 = vmatprep.subr.msk.bf16.mxu0 %vm2396_vm2, %v2375_v54 }
 0xace   :  { %2459 = vmatpush1.bf16.msra.mxu0 %v2404_v19 }
 0xad1   :  { %2559 = vmatmul.mubr.msk.bf16.vlgmr.msra.gmra.mrb[12].mxu0 %vm2392_vm3, %v2274_v9 }
 0xad8   :  { %v2279_v41 = vpop.permute.xlu1 %2278 }
 0xb90   :  { %v2443_v26 = vpop.f32.mrb[8].mxu0 }
 0xb91   :  { %v2444_v11 = vadd.f32 %v2443_v26, %v2279_v41  ;;  %v2445_v16 = vpop.f32.mrb[9].mxu0 }
 0xb92   :  { %v2446_v36 = vadd.f32 %v2445_v16, %v2279_v41  ;;  %v2447_v27 = vpop.f32.mrb[10].mxu0 }
 0xb93   :  { %2901 = vtanh.f32 %v2444_v11  ;;  %v2448_v45 = vpop.f32.mrb[11].mxu0 }
 0xb94   :  { %2903 = vtanh.f32 %v2446_v36 }
 0xb9d   :  { %v2902_v52 = vpop.eup %2901 }
 0xb9e   :  { %v2904_v56 = vpop.eup %2903 }
 0xb9f   :  { %v2499_v34 = vcombine.low %v2902_v52, %v2904_v56 }
 0xba1   :  { %2503 = vst [vmem:[%s4570_s17] sm:$0x77] %v2499_v34 }
 0xba4   :  { %v2484_v5 = vpop.f32.mrb[12].mxu0 }
 0xba5   :  { %v2485_v10 = vadd.f32 %v2484_v5, %v2279_v41  ;;  %v2486_v13 = vpop.f32.mrb[13].mxu0 }
 0xba6   :  { %v2487_v14 = vadd.f32 %v2486_v13, %v2279_v41  ;;  %v2488_v58 = vpop.f32.mrb[14].mxu0 }
 0xba7   :  { %2905 = vtanh.f32 %v2485_v10  ;;  %v2489_v48 = vpop.f32.mrb[15].mxu0 }
 0xba8   :  { %2907 = vtanh.f32 %v2487_v14 }
 0xbb1   :  { %v2906_v59 = vpop.eup %2905 }
 0xbb2   :  { %v2908_v39 = vpop.eup %2907 }
 0xbb3   :  { %v2500_v29 = vcombine.low %v2906_v59, %v2908_v39 }
 0xbb5   :  { %2504 = vst [vmem:[%s4570_s17 + $0x8] sm:$0x77] %v2500_v29 }

</bundles_post_ra>
